<compile_context>
chip_gen: v7x
topology: tpu7x:2x2x1
jax: 0.10.0
libtpu: 0.0.40
codegen_flags: <defaults>
</compile_context>

<pallas_src>
import functools
import numpy as np
import jax
import jax.numpy as jnp
from jax.experimental import pallas as pl
from jax.experimental.pallas import tpu as pltpu


_TM_CAP = 2048                    # lane (M) tile; multiple of 128 when used
_VMEM_LIMIT = 32 * 1024 * 1024    # safe on v5e/v6e (128 MiB) and v7x (64 MiB)


# ----------------------------------------------------------------------------
# Pallas kernel: multi-input split-K GEMM + fused ReLU + bias (+ residual)
# ----------------------------------------------------------------------------
def _gemm_kernel(*refs, n_in, relu_in, has_res):
    xs = refs[:n_in]                     # each (K_i, TM) bf16 patch tiles
    ws = refs[n_in:2 * n_in]             # each (Cout, K_i) bf16, VMEM-resident
    b_ref = refs[2 * n_in]               # (Cout, 1) f32 bias
    r_ref = refs[2 * n_in + 1] if has_res else None
    o_ref = refs[-1]

    acc = None
    for x_ref, w_ref in zip(xs, ws):
        x = x_ref[...]
        if relu_in:
            x = jnp.maximum(x, 0)        # fused ReLU (VPU slots idle here)
        d = jnp.dot(w_ref[...], x, preferred_element_type=jnp.float32)  # MXU
        acc = d if acc is None else acc + d
    acc = acc + b_ref[...]               # f32 bias broadcast
    if has_res:
        acc = acc + r_ref[...].astype(jnp.float32)   # fused residual (exit conv)
    o_ref[...] = acc.astype(o_ref.dtype)


def _patch_gemm(xcols, w_flats, bias, *, relu_in, out_dtype, residual=None):
    """xcols: list of (K_i, M) bf16; w_flats: list of (Cout, K_i) bf16;
    bias (Cout, 1) f32; residual (Cout, M) f32 or None.
    Returns (Cout, M) in out_dtype."""
    M = xcols[0].shape[1]
    Cout = w_flats[0].shape[0]
    if M <= _TM_CAP:
        tm, mpad = M, M                  # single full-extent tile
    else:
        tm = _TM_CAP
        mpad = ((M + tm - 1) // tm) * tm
    if mpad != M:
        xcols = [jnp.pad(x, ((0, 0), (0, mpad - M))) for x in xcols]
        if residual is not None:
            residual = jnp.pad(residual, ((0, 0), (0, mpad - M)))

    n_in = len(xcols)
    in_specs = []
    for x in xcols:                      # activation tiles, walk along M
        in_specs.append(pl.BlockSpec((x.shape[0], tm), lambda m: (0, m)))
    for w in w_flats:                    # weights: constant index -> resident
        in_specs.append(pl.BlockSpec(w.shape, lambda m: (0, 0)))
    in_specs.append(pl.BlockSpec((bias.shape[0], 1), lambda m: (0, 0)))
    args = list(xcols) + list(w_flats) + [bias]
    if residual is not None:
        in_specs.append(pl.BlockSpec((Cout, tm), lambda m: (0, m)))
        args.append(residual)

    k_total = sum(int(x.shape[0]) for x in xcols)
    bytes_acc = (sum(int(x.size) * x.dtype.itemsize for x in xcols)
                 + sum(int(w.size) * w.dtype.itemsize for w in w_flats)
                 + int(Cout) * int(mpad) * jnp.dtype(out_dtype).itemsize
                 + (int(Cout) * int(mpad) * 4 if residual is not None else 0))
    cost = pl.CostEstimate(flops=2 * int(Cout) * k_total * int(mpad),
                           transcendentals=0, bytes_accessed=bytes_acc)

    # NOTE(v7x): at production resolutions mpad//tm >= 2 so the single
    # "parallel" axis still feeds both TensorCores; small deep-level tiles
    # are negligible work.
    out = pl.pallas_call(
        functools.partial(_gemm_kernel, n_in=n_in, relu_in=relu_in,
                          has_res=residual is not None),
        out_shape=jax.ShapeDtypeStruct((Cout, mpad), out_dtype),
        grid=(mpad // tm,),
        in_specs=in_specs,
        out_specs=pl.BlockSpec((Cout, tm), lambda m: (0, m)),
        compiler_params=pltpu.CompilerParams(
            dimension_semantics=("parallel",),
            vmem_limit_bytes=_VMEM_LIMIT),
        cost_estimate=cost,
    )(*args)
    if mpad != M:
        out = out[:, :M]
    return out


# ----------------------------------------------------------------------------
# Conv2d(k=3, pad=1, stride in {1,2}) — CNHW, stride-aware patch gather
# ----------------------------------------------------------------------------
def conv3x3(x, w_flat, bias, *, stride=1, relu_in=True,
            out_dtype=jnp.bfloat16, residual=None):
    """x: (Cin, B, H, W). residual (optional): (Cout, B*Ho*Wo) f32."""
    Cin, B, H, W = x.shape
    Cout = w_flat.shape[0]
    xb = x.astype(jnp.bfloat16)
    xp = jnp.pad(xb, ((0, 0), (0, 0), (1, 1), (1, 1)))
    Ho = (H - 1) // stride + 1
    Wo = (W - 1) // stride + 1
    cols = [
        xp[:, :, ky:ky + stride * (Ho - 1) + 1:stride,
               kx:kx + stride * (Wo - 1) + 1:stride]
        for ky in range(3) for kx in range(3)
    ]
    xcol = jnp.concatenate(cols, axis=0).reshape(9 * Cin, B * Ho * Wo)
    out = _patch_gemm([xcol], [w_flat], bias, relu_in=relu_in,
                      out_dtype=out_dtype, residual=residual)
    return out.reshape(Cout, B, Ho, Wo)


def conv3x3_multi(xs, w_flats, bias, *, out_dtype=jnp.bfloat16):
    """First Up-path conv on the (never materialized) channel concat of `xs`:
    split-K partial dots against the matching per-segment weight slices."""
    _, B, H, W = xs[0].shape
    Cout = w_flats[0].shape[0]
    xcols = []
    for x in xs:
        Cin = x.shape[0]
        xb = x.astype(jnp.bfloat16)
        xp = jnp.pad(xb, ((0, 0), (0, 0), (1, 1), (1, 1)))
        cols = [xp[:, :, ky:ky + H, kx:kx + W]
                for ky in range(3) for kx in range(3)]
        xcols.append(jnp.concatenate(cols, axis=0).reshape(9 * Cin, B * H * W))
    out = _patch_gemm(xcols, list(w_flats), bias, relu_in=True,
                      out_dtype=out_dtype)
    return out.reshape(Cout, B, H, W)


# ----------------------------------------------------------------------------
# ConvTranspose2d(k=3, stride=2, pad=1) — fused 4-phase sub-pixel GEMM
#   out[2a  ,2b  ] = x[a  ,b  ]w[1,1]
#   out[2a  ,2b+1] = x[a  ,b+1]w[1,0] + x[a  ,b]w[1,2]
#   out[2a+1,2b  ] = x[a+1,b  ]w[0,1] + x[a  ,b]w[2,1]
#   out[2a+1,2b+1] = x[a+1,b+1]w[0,0] + x[a+1,b]w[0,2] + x[a,b+1]w[2,0] + x[a,b]w[2,2]
# One GEMM: (4*Cout, 4*Cin) block-sparse weight @ 4-offset gather of x.
# Out-of-range x contributions are handled by a bottom/right zero pad of x;
# the affected output rows/cols lie beyond 2H-1 / 2W-1 and are cropped.
# ----------------------------------------------------------------------------
_TCONV_OFFSETS = ((0, 0), (0, 1), (1, 0), (1, 1))       # K-block order (dy,dx)
_TCONV_PHASE_TAPS = (                                    # row-block order ee,eo,oe,oo
    ((0, (1, 1)),),
    ((1, (1, 0)), (0, (1, 2))),
    ((2, (0, 1)), (0, (2, 1))),
    ((3, (0, 0)), (2, (0, 2)), (1, (2, 0)), (0, (2, 2))),
)


def conv_transpose3x3_s2(x, w_comb, bias4, *, out_dtype=jnp.bfloat16):
    """x: (Cin, B, H, W) -> (Cout, B, 2H-1, 2W-1) matching PyTorch semantics."""
    Cin, B, H, W = x.shape
    Cout = w_comb.shape[0] // 4
    xb = x.astype(jnp.bfloat16)
    xp = jnp.pad(xb, ((0, 0), (0, 0), (0, 1), (0, 1)))
    cols = [xp[:, :, dy:dy + H, dx:dx + W] for dy, dx in _TCONV_OFFSETS]
    xcol = jnp.concatenate(cols, axis=0).reshape(4 * Cin, B * H * W)
    out = _patch_gemm([xcol], [w_comb], bias4, relu_in=True,
                      out_dtype=out_dtype)
    out = out.reshape(4, Cout, B, H, W)
    ee, eo, oe, oo = out[0], out[1], out[2], out[3]
    # TODO(synk): do the even/odd lane interleave in-kernel via a 2xbf16->u32
    # pltpu.bitcast pack to avoid this XLA permute copy at full resolution.
    row_e = jnp.stack([ee, eo], axis=-1).reshape(Cout, B, H, 2 * W)
    row_o = jnp.stack([oe, oo], axis=-1).reshape(Cout, B, H, 2 * W)
    full = jnp.stack([row_e, row_o], axis=3).reshape(Cout, B, 2 * H, 2 * W)
    return full[:, :, :2 * H - 1, :2 * W - 1]


# ----------------------------------------------------------------------------
# Parameters: deterministic synthetic init, pre-flattened ONCE to GEMM layout
# ----------------------------------------------------------------------------
class _KeyGen:
    def __init__(self, key):
        self.key = key

    def __call__(self):
        self.key, sub = jax.random.split(self.key)
        return sub


def _conv_flat(kg, cout, cin):
    """Conv2d (cout,cin,3,3) -> (cout, 9*cin) bf16, patch order (ky,kx,ci)."""
    bound = 1.0 / np.sqrt(cin * 9)
    w = jax.random.uniform(kg(), (cout, cin, 3, 3), jnp.float32, -bound, bound)
    b = jax.random.uniform(kg(), (cout,), jnp.float32, -bound, bound)
    w_flat = jnp.transpose(w, (0, 2, 3, 1)).reshape(cout, 9 * cin).astype(jnp.bfloat16)
    return w_flat, b.reshape(cout, 1)


def _conv_flat_split(kg, cout, cin_segments):
    """Conv over a channel-concat: per-segment (cout, 9*cin_s) bf16 slices."""
    cin = int(sum(cin_segments))
    bound = 1.0 / np.sqrt(cin * 9)
    w = jax.random.uniform(kg(), (cout, cin, 3, 3), jnp.float32, -bound, bound)
    b = jax.random.uniform(kg(), (cout,), jnp.float32, -bound, bound)
    flats, c0 = [], 0
    for cs in cin_segments:
        ws = w[:, c0:c0 + cs]
        flats.append(jnp.transpose(ws, (0, 2, 3, 1))
                     .reshape(cout, 9 * cs).astype(jnp.bfloat16))
        c0 += cs
    return flats, b.reshape(cout, 1)


def _convT_combined(kg, cout, cin):
    """ConvTranspose2d (cin,cout,3,3) -> one (4*cout, 4*cin) bf16 block-sparse
    matrix covering all 4 sub-pixel phases, plus tiled bias (4*cout, 1)."""
    bound = 1.0 / np.sqrt(cout * 9)
    wt = jax.random.uniform(kg(), (cin, cout, 3, 3), jnp.float32, -bound, bound)
    b = jax.random.uniform(kg(), (cout,), jnp.float32, -bound, bound)
    W = jnp.zeros((4 * cout, 4 * cin), jnp.float32)
    for p, taps in enumerate(_TCONV_PHASE_TAPS):
        for off_idx, (ky, kx) in taps:
            W = W.at[p * cout:(p + 1) * cout,
                     off_idx * cin:(off_idx + 1) * cin].set(wt[:, :, ky, kx].T)
    return W.astype(jnp.bfloat16), jnp.tile(b.reshape(cout, 1), (4, 1))


def init_params(key, nf_in, nf_base, nlevel, nf_out):
    kg = _KeyGen(key)
    p = {}
    # inconv: Conv(nf_in->nf_base), ReLU, Conv(nf_base->nf_base)
    p["in0_w"], p["in0_b"] = _conv_flat(kg, nf_base, nf_in)
    p["in1_w"], p["in1_b"] = _conv_flat(kg, nf_base, nf_base)
    p["down"], p["up"], p["out"] = [], [], []
    for lvl in range(nlevel):
        d = {}
        d["w0"], d["b0"] = _conv_flat(kg, nf_base, nf_base)     # ReLU, Conv
        d["w1"], d["b1"] = _conv_flat(kg, nf_base, nf_base)     # ReLU, Conv s2
        d["w2"], d["b2"] = _conv_flat(kg, nf_base, nf_base)     # ReLU, Conv
        p["down"].append(d)
        ups = []
        for u in range(lvl + 1):
            up = {}
            up["wt"], up["bt"] = _convT_combined(kg, nf_base, nf_base)
            up["w0"], up["b0"] = _conv_flat_split(kg, nf_base,
                                                  [nf_base] * (2 + u))
            up["w1"], up["b1"] = _conv_flat(kg, nf_base, nf_base)
            ups.append(up)
        p["up"].append(ups)
        o = {}
        o["w"], o["b"] = _conv_flat(kg, nf_out, nf_base)        # ReLU, Conv
        p["out"].append(o)
    return p


# ----------------------------------------------------------------------------
# Network forward (idx_out=-1; if_residual=True; no ECA / separable)
# ----------------------------------------------------------------------------
def network_forward(params, inp_nchw, *, nlevel, idx_out=-1):
    B, C, H, W = inp_nchw.shape
    x = jnp.transpose(inp_nchw.astype(jnp.float32), (1, 0, 2, 3))   # CNHW
    # residual add (`out_t += inp_t`) requires nf_out == nf_in:
    res_flat = x.reshape(C, B * H * W)

    # inconv: Conv, ReLU, Conv
    feat = conv3x3(x, params["in0_w"], params["in0_b"], relu_in=False)
    feat = conv3x3(feat, params["in1_w"], params["in1_b"], relu_in=True)

    feat_lst_lst = []
    feat_lst = [feat]
    out_lst, out_nchw = [], None
    for lvl in range(nlevel):
        feat_lst_lst.append(feat_lst)
        d = params["down"][lvl]
        y = feat_lst_lst[-1][0]
        # Down(strideconv): ReLU,Conv, ReLU,Conv(s2), ReLU,Conv  (ReLU in-kernel)
        y = conv3x3(y, d["w0"], d["b0"], relu_in=True)
        y = conv3x3(y, d["w1"], d["b1"], relu_in=True, stride=2)
        y = conv3x3(y, d["w2"], d["b2"], relu_in=True)
        feat_lst = [y]
        for u in range(lvl + 1):
            ndepth = lvl + 1 - u
            inp_lst = [fl[-ndepth] for fl in feat_lst_lst if len(fl) >= ndepth]
            up = params["up"][lvl][u]
            # Up: ReLU + ConvTranspose2d(s=2, p=1), fused 4-phase GEMM
            t = conv_transpose3x3_s2(feat_lst[-1], up["wt"], up["bt"])
            # crop-from-top/left if larger, then pad [dw//2, dw-dw//2, dh//2,
            # dh-dh//2] exactly as nnf.pad in the reference Up block.
            h, w = inp_lst[0].shape[2:4]
            if t.shape[2] > h:
                t = t[:, :, :h]
            if t.shape[3] > w:
                t = t[:, :, :, :w]
            dh, dw = h - t.shape[2], w - t.shape[3]
            t = jnp.pad(t, ((0, 0), (0, 0), (dh // 2, dh - dh // 2),
                            (dw // 2, dw - dw // 2)))
            # conv_lst: ReLU, Conv(nf_base*(2+u)->nf_base), ReLU, Conv
            # (the channel concat is never materialized: split-K multi-input GEMM)
            f = conv3x3_multi([t] + inp_lst, up["w0"], up["b0"])
            f = conv3x3(f, up["w1"], up["b1"], relu_in=True)
            feat_lst.append(f)
        if idx_out == -1 or lvl == idx_out:
            o = params["out"][lvl]
            # outconv: ReLU, Conv  (+ fused residual add)
            out_t = conv3x3(feat_lst[-1], o["w"], o["b"], relu_in=True,
                            out_dtype=jnp.float32, residual=res_flat)
            out_nchw = jnp.transpose(out_t, (1, 0, 2, 3))
            if idx_out == -1:
                out_lst.append(out_nchw)
            else:
                break
    if idx_out == -1:
        return jnp.stack(out_lst, axis=0)            # (nlevel, B, C, H, W)
    return out_nchw


if __name__ == "__main__":
    B, C_IN, H, W = 2, 3, 16, 16
    NF_BASE, NLEVEL, C_OUT = 16, 3, 3
    assert C_OUT == C_IN, "residual add requires nf_out == nf_in"

    key = jax.random.PRNGKey(0)
    pkey, xkey = jax.random.split(key)
    params = init_params(pkey, C_IN, NF_BASE, NLEVEL, C_OUT)
    x = jax.random.normal(xkey, (B, C_IN, H, W), jnp.float32)

    fwd = jax.jit(functools.partial(network_forward, nlevel=NLEVEL, idx_out=-1))
    out = fwd(params, x)
    jax.block_until_ready(out)
    assert out.shape == (NLEVEL, B, C_OUT, H, W), out.shape
    assert jnp.all(jnp.isfinite(out))
    print("KERNEL_OK")
</pallas_src>

<mosaic_0001>
module attributes {stable_mosaic.version = 11 : i64} {
  func.func @_gemm_kernel(%arg0: i32, %arg1: memref<27x512xbf16, #tpu.memory_space<vmem>>, %arg2: memref<16x27xbf16, #tpu.memory_space<vmem>>, %arg3: memref<16x1xf32, #tpu.memory_space<vmem>>, %arg4: memref<16x512xbf16, #tpu.memory_space<vmem>>) attributes {dimension_semantics = [#tpu.dimension_semantics<parallel>], iteration_bounds = array<i64: 1>, scalar_prefetch = 0 : i64, scratch_operands = 0 : i64, tpu.core_type = #tpu.core_type<tc>, window_params = [{transform_indices = @transform_0, window_bounds = array<i64: 27, 512>}, {pipeline_mode = #tpu.pipeline_mode<synchronous>, transform_indices = @transform_1, window_bounds = array<i64: 16, 27>}, {pipeline_mode = #tpu.pipeline_mode<synchronous>, transform_indices = @transform_2, window_bounds = array<i64: 16, 1>}, {transform_indices = @transform_3, window_bounds = array<i64: 16, 512>}]} {
    %c0 = arith.constant 0 : index
    %c0_0 = arith.constant 0 : index
    %0 = vector.load %arg1[%c0, %c0_0] : memref<27x512xbf16, #tpu.memory_space<vmem>>, vector<27x512xbf16>
    %c0_1 = arith.constant 0 : index
    %c0_2 = arith.constant 0 : index
    %1 = vector.load %arg2[%c0_1, %c0_2] : memref<16x27xbf16, #tpu.memory_space<vmem>>, vector<16x27xbf16>
    %cst = arith.constant dense<0.000000e+00> : vector<16x512xf32>
    %2 = tpu.matmul %1, %0, %cst {dimension_numbers = #tpu.dot_dimension_numbers<[1], [0], [0], [1], [0, 0, 1, 1], [], []>} : vector<16x27xbf16>, vector<27x512xbf16>, vector<16x512xf32> -> vector<16x512xf32>
    %c0_3 = arith.constant 0 : index
    %c0_4 = arith.constant 0 : index
    %3 = vector.load %arg3[%c0_3, %c0_4] : memref<16x1xf32, #tpu.memory_space<vmem>>, vector<16x1xf32>
    %4 = vector.broadcast %3 : vector<16x1xf32> to vector<16x512xf32>
    %5 = arith.addf %2, %4 : vector<16x512xf32>
    %6 = arith.truncf %5 : vector<16x512xf32> to vector<16x512xbf16>
    %c0_5 = arith.constant 0 : index
    %c0_6 = arith.constant 0 : index
    %7 = vector.load %arg4[%c0_5, %c0_6] : memref<16x512xbf16, #tpu.memory_space<vmem>>, vector<16x512xbf16>
    tpu.vector_store %arg4[%c0_5, %c0_6], %6 {strides = array<i32>} : memref<16x512xbf16, #tpu.memory_space<vmem>>, vector<16x512xbf16>,
    return
  }
  func.func @transform_0(%arg0: i32) -> (i32, i32) {
    %c0_i32 = arith.constant 0 : i32
    %c0_i32_0 = arith.constant 0 : i32
    return %c0_i32, %arg0 : i32, i32
  }
  func.func @transform_1(%arg0: i32) -> (i32, i32) {
    %c0_i32 = arith.constant 0 : i32
    %c0_i32_0 = arith.constant 0 : i32
    %c0_i32_1 = arith.constant 0 : i32
    return %c0_i32, %c0_i32_0 : i32, i32
  }
  func.func @transform_2(%arg0: i32) -> (i32, i32) {
    %c0_i32 = arith.constant 0 : i32
    %c0_i32_0 = arith.constant 0 : i32
    %c0_i32_1 = arith.constant 0 : i32
    return %c0_i32, %c0_i32_0 : i32, i32
  }
  func.func @transform_3(%arg0: i32) -> (i32, i32) {
    %c0_i32 = arith.constant 0 : i32
    %c0_i32_0 = arith.constant 0 : i32
    return %c0_i32, %arg0 : i32, i32
  }
}

module attributes {stable_mosaic.version = 11 : i64} {
  func.func @_gemm_kernel(%arg0: i32, %arg1: memref<144x512xbf16, #tpu.memory_space<vmem>>, %arg2: memref<16x144xbf16, #tpu.memory_space<vmem>>, %arg3: memref<16x1xf32, #tpu.memory_space<vmem>>, %arg4: memref<16x512xbf16, #tpu.memory_space<vmem>>) attributes {dimension_semantics = [#tpu.dimension_semantics<parallel>], iteration_bounds = array<i64: 1>, scalar_prefetch = 0 : i64, scratch_operands = 0 : i64, tpu.core_type = #tpu.core_type<tc>, window_params = [{transform_indices = @transform_0, window_bounds = array<i64: 144, 512>}, {pipeline_mode = #tpu.pipeline_mode<synchronous>, transform_indices = @transform_1, window_bounds = array<i64: 16, 144>}, {pipeline_mode = #tpu.pipeline_mode<synchronous>, transform_indices = @transform_2, window_bounds = array<i64: 16, 1>}, {transform_indices = @transform_3, window_bounds = array<i64: 16, 512>}]} {
    %c0 = arith.constant 0 : index
    %c0_0 = arith.constant 0 : index
    %0 = vector.load %arg1[%c0, %c0_0] : memref<144x512xbf16, #tpu.memory_space<vmem>>, vector<144x512xbf16>
    %cst = arith.constant 0.000000e+00 : bf16
    %1 = vector.broadcast %cst : bf16 to vector<144x512xbf16>
    %2 = arith.maximumf %0, %1 : vector<144x512xbf16>
    %c0_1 = arith.constant 0 : index
    %c0_2 = arith.constant 0 : index
    %3 = vector.load %arg2[%c0_1, %c0_2] : memref<16x144xbf16, #tpu.memory_space<vmem>>, vector<16x144xbf16>
    %cst_3 = arith.constant dense<0.000000e+00> : vector<16x512xf32>
    %4 = tpu.matmul %3, %2, %cst_3 {dimension_numbers = #tpu.dot_dimension_numbers<[1], [0], [0], [1], [0, 0, 1, 1], [], []>} : vector<16x144xbf16>, vector<144x512xbf16>, vector<16x512xf32> -> vector<16x512xf32>
    %c0_4 = arith.constant 0 : index
    %c0_5 = arith.constant 0 : index
    %5 = vector.load %arg3[%c0_4, %c0_5] : memref<16x1xf32, #tpu.memory_space<vmem>>, vector<16x1xf32>
    %6 = vector.broadcast %5 : vector<16x1xf32> to vector<16x512xf32>
    %7 = arith.addf %4, %6 : vector<16x512xf32>
    %8 = arith.truncf %7 : vector<16x512xf32> to vector<16x512xbf16>
    %c0_6 = arith.constant 0 : index
    %c0_7 = arith.constant 0 : index
    %9 = vector.load %arg4[%c0_6, %c0_7] : memref<16x512xbf16, #tpu.memory_space<vmem>>, vector<16x512xbf16>
    tpu.vector_store %arg4[%c0_6, %c0_7], %8 {strides = array<i32>} : memref<16x512xbf16, #tpu.memory_space<vmem>>, vector<16x512xbf16>,
    return
  }
  func.func @transform_0(%arg0: i32) -> (i32, i32) {
    %c0_i32 = arith.constant 0 : i32
    %c0_i32_0 = arith.constant 0 : i32
    return %c0_i32, %arg0 : i32, i32
  }
  func.func @transform_1(%arg0: i32) -> (i32, i32) {
    %c0_i32 = arith.constant 0 : i32
    %c0_i32_0 = arith.constant 0 : i32
    %c0_i32_1 = arith.constant 0 : i32
    return %c0_i32, %c0_i32_0 : i32, i32
  }
  func.func @transform_2(%arg0: i32) -> (i32, i32) {
    %c0_i32 = arith.constant 0 : i32
    %c0_i32_0 = arith.constant 0 : i32
    %c0_i32_1 = arith.constant 0 : i32
    return %c0_i32, %c0_i32_0 : i32, i32
  }
  func.func @transform_3(%arg0: i32) -> (i32, i32) {
    %c0_i32 = arith.constant 0 : i32
    %c0_i32_0 = arith.constant 0 : i32
    return %c0_i32, %arg0 : i32, i32
  }
}

module attributes {stable_mosaic.version = 11 : i64} {
  func.func @_gemm_kernel(%arg0: i32, %arg1: memref<144x128xbf16, #tpu.memory_space<vmem>>, %arg2: memref<16x144xbf16, #tpu.memory_space<vmem>>, %arg3: memref<16x1xf32, #tpu.memory_space<vmem>>, %arg4: memref<16x128xbf16, #tpu.memory_space<vmem>>) attributes {dimension_semantics = [#tpu.dimension_semantics<parallel>], iteration_bounds = array<i64: 1>, scalar_prefetch = 0 : i64, scratch_operands = 0 : i64, tpu.core_type = #tpu.core_type<tc>, window_params = [{transform_indices = @transform_0, window_bounds = array<i64: 144, 128>}, {pipeline_mode = #tpu.pipeline_mode<synchronous>, transform_indices = @transform_1, window_bounds = array<i64: 16, 144>}, {pipeline_mode = #tpu.pipeline_mode<synchronous>, transform_indices = @transform_2, window_bounds = array<i64: 16, 1>}, {transform_indices = @transform_3, window_bounds = array<i64: 16, 128>}]} {
    %c0 = arith.constant 0 : index
    %c0_0 = arith.constant 0 : index
    %0 = vector.load %arg1[%c0, %c0_0] : memref<144x128xbf16, #tpu.memory_space<vmem>>, vector<144x128xbf16>
    %cst = arith.constant 0.000000e+00 : bf16
    %1 = vector.broadcast %cst : bf16 to vector<144x128xbf16>
    %2 = arith.maximumf %0, %1 : vector<144x128xbf16>
    %c0_1 = arith.constant 0 : index
    %c0_2 = arith.constant 0 : index
    %3 = vector.load %arg2[%c0_1, %c0_2] : memref<16x144xbf16, #tpu.memory_space<vmem>>, vector<16x144xbf16>
    %cst_3 = arith.constant dense<0.000000e+00> : vector<16x128xf32>
    %4 = tpu.matmul %3, %2, %cst_3 {dimension_numbers = #tpu.dot_dimension_numbers<[1], [0], [0], [1], [0, 0, 1, 1], [], []>} : vector<16x144xbf16>, vector<144x128xbf16>, vector<16x128xf32> -> vector<16x128xf32>
    %c0_4 = arith.constant 0 : index
    %c0_5 = arith.constant 0 : index
    %5 = vector.load %arg3[%c0_4, %c0_5] : memref<16x1xf32, #tpu.memory_space<vmem>>, vector<16x1xf32>
    %6 = vector.broadcast %5 : vector<16x1xf32> to vector<16x128xf32>
    %7 = arith.addf %4, %6 : vector<16x128xf32>
    %8 = arith.truncf %7 : vector<16x128xf32> to vector<16x128xbf16>
    %c0_6 = arith.constant 0 : index
    %c0_7 = arith.constant 0 : index
    %9 = vector.load %arg4[%c0_6, %c0_7] : memref<16x128xbf16, #tpu.memory_space<vmem>>, vector<16x128xbf16>
    tpu.vector_store %arg4[%c0_6, %c0_7], %8 {strides = array<i32>} : memref<16x128xbf16, #tpu.memory_space<vmem>>, vector<16x128xbf16>,
    return
  }
  func.func @transform_0(%arg0: i32) -> (i32, i32) {
    %c0_i32 = arith.constant 0 : i32
    %c0_i32_0 = arith.constant 0 : i32
    return %c0_i32, %arg0 : i32, i32
  }
  func.func @transform_1(%arg0: i32) -> (i32, i32) {
    %c0_i32 = arith.constant 0 : i32
    %c0_i32_0 = arith.constant 0 : i32
    %c0_i32_1 = arith.constant 0 : i32
    return %c0_i32, %c0_i32_0 : i32, i32
  }
  func.func @transform_2(%arg0: i32) -> (i32, i32) {
    %c0_i32 = arith.constant 0 : i32
    %c0_i32_0 = arith.constant 0 : i32
    %c0_i32_1 = arith.constant 0 : i32
    return %c0_i32, %c0_i32_0 : i32, i32
  }
  func.func @transform_3(%arg0: i32) -> (i32, i32) {
    %c0_i32 = arith.constant 0 : i32
    %c0_i32_0 = arith.constant 0 : i32
    return %c0_i32, %arg0 : i32, i32
  }
}

module attributes {stable_mosaic.version = 11 : i64} {
  func.func @_gemm_kernel(%arg0: i32, %arg1: memref<144x32xbf16, #tpu.memory_space<vmem>>, %arg2: memref<16x144xbf16, #tpu.memory_space<vmem>>, %arg3: memref<16x1xf32, #tpu.memory_space<vmem>>, %arg4: memref<16x32xbf16, #tpu.memory_space<vmem>>) attributes {dimension_semantics = [#tpu.dimension_semantics<parallel>], iteration_bounds = array<i64: 1>, scalar_prefetch = 0 : i64, scratch_operands = 0 : i64, tpu.core_type = #tpu.core_type<tc>, window_params = [{transform_indices = @transform_0, window_bounds = array<i64: 144, 32>}, {pipeline_mode = #tpu.pipeline_mode<synchronous>, transform_indices = @transform_1, window_bounds = array<i64: 16, 144>}, {pipeline_mode = #tpu.pipeline_mode<synchronous>, transform_indices = @transform_2, window_bounds = array<i64: 16, 1>}, {transform_indices = @transform_3, window_bounds = array<i64: 16, 32>}]} {
    %c0 = arith.constant 0 : index
    %c0_0 = arith.constant 0 : index
    %0 = vector.load %arg1[%c0, %c0_0] : memref<144x32xbf16, #tpu.memory_space<vmem>>, vector<144x32xbf16>
    %cst = arith.constant 0.000000e+00 : bf16
    %1 = vector.broadcast %cst : bf16 to vector<144x32xbf16>
    %2 = arith.maximumf %0, %1 : vector<144x32xbf16>
    %c0_1 = arith.constant 0 : index
    %c0_2 = arith.constant 0 : index
    %3 = vector.load %arg2[%c0_1, %c0_2] : memref<16x144xbf16, #tpu.memory_space<vmem>>, vector<16x144xbf16>
    %cst_3 = arith.constant dense<0.000000e+00> : vector<16x32xf32>
    %4 = tpu.matmul %3, %2, %cst_3 {dimension_numbers = #tpu.dot_dimension_numbers<[1], [0], [0], [1], [0, 0, 1, 1], [], []>} : vector<16x144xbf16>, vector<144x32xbf16>, vector<16x32xf32> -> vector<16x32xf32>
    %c0_4 = arith.constant 0 : index
    %c0_5 = arith.constant 0 : index
    %5 = vector.load %arg3[%c0_4, %c0_5] : memref<16x1xf32, #tpu.memory_space<vmem>>, vector<16x1xf32>
    %6 = vector.broadcast %5 : vector<16x1xf32> to vector<16x32xf32>
    %7 = arith.addf %4, %6 : vector<16x32xf32>
    %8 = arith.truncf %7 : vector<16x32xf32> to vector<16x32xbf16>
    %c0_6 = arith.constant 0 : index
    %c0_7 = arith.constant 0 : index
    %9 = vector.load %arg4[%c0_6, %c0_7] : memref<16x32xbf16, #tpu.memory_space<vmem>>, vector<16x32xbf16>
    tpu.vector_store %arg4[%c0_6, %c0_7], %8 {strides = array<i32>} : memref<16x32xbf16, #tpu.memory_space<vmem>>, vector<16x32xbf16>,
    return
  }
  func.func @transform_0(%arg0: i32) -> (i32, i32) {
    %c0_i32 = arith.constant 0 : i32
    %c0_i32_0 = arith.constant 0 : i32
    return %c0_i32, %arg0 : i32, i32
  }
  func.func @transform_1(%arg0: i32) -> (i32, i32) {
    %c0_i32 = arith.constant 0 : i32
    %c0_i32_0 = arith.constant 0 : i32
    %c0_i32_1 = arith.constant 0 : i32
    return %c0_i32, %c0_i32_0 : i32, i32
  }
  func.func @transform_2(%arg0: i32) -> (i32, i32) {
    %c0_i32 = arith.constant 0 : i32
    %c0_i32_0 = arith.constant 0 : i32
    %c0_i32_1 = arith.constant 0 : i32
    return %c0_i32, %c0_i32_0 : i32, i32
  }
  func.func @transform_3(%arg0: i32) -> (i32, i32) {
    %c0_i32 = arith.constant 0 : i32
    %c0_i32_0 = arith.constant 0 : i32
    return %c0_i32, %arg0 : i32, i32
  }
}

module attributes {stable_mosaic.version = 11 : i64} {
  func.func @_gemm_kernel(%arg0: i32, %arg1: memref<144x8xbf16, #tpu.memory_space<vmem>>, %arg2: memref<16x144xbf16, #tpu.memory_space<vmem>>, %arg3: memref<16x1xf32, #tpu.memory_space<vmem>>, %arg4: memref<16x8xbf16, #tpu.memory_space<vmem>>) attributes {dimension_semantics = [#tpu.dimension_semantics<parallel>], iteration_bounds = array<i64: 1>, scalar_prefetch = 0 : i64, scratch_operands = 0 : i64, tpu.core_type = #tpu.core_type<tc>, window_params = [{transform_indices = @transform_0, window_bounds = array<i64: 144, 8>}, {pipeline_mode = #tpu.pipeline_mode<synchronous>, transform_indices = @transform_1, window_bounds = array<i64: 16, 144>}, {pipeline_mode = #tpu.pipeline_mode<synchronous>, transform_indices = @transform_2, window_bounds = array<i64: 16, 1>}, {transform_indices = @transform_3, window_bounds = array<i64: 16, 8>}]} {
    %c0 = arith.constant 0 : index
    %c0_0 = arith.constant 0 : index
    %0 = vector.load %arg1[%c0, %c0_0] : memref<144x8xbf16, #tpu.memory_space<vmem>>, vector<144x8xbf16>
    %cst = arith.constant 0.000000e+00 : bf16
    %1 = vector.broadcast %cst : bf16 to vector<144x8xbf16>
    %2 = arith.maximumf %0, %1 : vector<144x8xbf16>
    %c0_1 = arith.constant 0 : index
    %c0_2 = arith.constant 0 : index
    %3 = vector.load %arg2[%c0_1, %c0_2] : memref<16x144xbf16, #tpu.memory_space<vmem>>, vector<16x144xbf16>
    %cst_3 = arith.constant dense<0.000000e+00> : vector<16x8xf32>
    %4 = tpu.matmul %3, %2, %cst_3 {dimension_numbers = #tpu.dot_dimension_numbers<[1], [0], [0], [1], [0, 0, 1, 1], [], []>} : vector<16x144xbf16>, vector<144x8xbf16>, vector<16x8xf32> -> vector<16x8xf32>
    %c0_4 = arith.constant 0 : index
    %c0_5 = arith.constant 0 : index
    %5 = vector.load %arg3[%c0_4, %c0_5] : memref<16x1xf32, #tpu.memory_space<vmem>>, vector<16x1xf32>
    %6 = vector.broadcast %5 : vector<16x1xf32> to vector<16x8xf32>
    %7 = arith.addf %4, %6 : vector<16x8xf32>
    %8 = arith.truncf %7 : vector<16x8xf32> to vector<16x8xbf16>
    %c0_6 = arith.constant 0 : index
    %c0_7 = arith.constant 0 : index
    %9 = vector.load %arg4[%c0_6, %c0_7] : memref<16x8xbf16, #tpu.memory_space<vmem>>, vector<16x8xbf16>
    tpu.vector_store %arg4[%c0_6, %c0_7], %8 {strides = array<i32>} : memref<16x8xbf16, #tpu.memory_space<vmem>>, vector<16x8xbf16>,
    return
  }
  func.func @transform_0(%arg0: i32) -> (i32, i32) {
    %c0_i32 = arith.constant 0 : i32
    %c0_i32_0 = arith.constant 0 : i32
    return %c0_i32, %arg0 : i32, i32
  }
  func.func @transform_1(%arg0: i32) -> (i32, i32) {
    %c0_i32 = arith.constant 0 : i32
    %c0_i32_0 = arith.constant 0 : i32
    %c0_i32_1 = arith.constant 0 : i32
    return %c0_i32, %c0_i32_0 : i32, i32
  }
  func.func @transform_2(%arg0: i32) -> (i32, i32) {
    %c0_i32 = arith.constant 0 : i32
    %c0_i32_0 = arith.constant 0 : i32
    %c0_i32_1 = arith.constant 0 : i32
    return %c0_i32, %c0_i32_0 : i32, i32
  }
  func.func @transform_3(%arg0: i32) -> (i32, i32) {
    %c0_i32 = arith.constant 0 : i32
    %c0_i32_0 = arith.constant 0 : i32
    return %c0_i32, %arg0 : i32, i32
  }
}

module attributes {stable_mosaic.version = 11 : i64} {
  func.func @_gemm_kernel(%arg0: i32, %arg1: memref<64x8xbf16, #tpu.memory_space<vmem>>, %arg2: memref<64x64xbf16, #tpu.memory_space<vmem>>, %arg3: memref<64x1xf32, #tpu.memory_space<vmem>>, %arg4: memref<64x8xbf16, #tpu.memory_space<vmem>>) attributes {dimension_semantics = [#tpu.dimension_semantics<parallel>], iteration_bounds = array<i64: 1>, scalar_prefetch = 0 : i64, scratch_operands = 0 : i64, tpu.core_type = #tpu.core_type<tc>, window_params = [{transform_indices = @transform_0, window_bounds = array<i64: 64, 8>}, {pipeline_mode = #tpu.pipeline_mode<synchronous>, transform_indices = @transform_1, window_bounds = array<i64: 64, 64>}, {pipeline_mode = #tpu.pipeline_mode<synchronous>, transform_indices = @transform_2, window_bounds = array<i64: 64, 1>}, {transform_indices = @transform_3, window_bounds = array<i64: 64, 8>}]} {
    %c0 = arith.constant 0 : index
    %c0_0 = arith.constant 0 : index
    %0 = vector.load %arg1[%c0, %c0_0] : memref<64x8xbf16, #tpu.memory_space<vmem>>, vector<64x8xbf16>
    %cst = arith.constant 0.000000e+00 : bf16
    %1 = vector.broadcast %cst : bf16 to vector<64x8xbf16>
    %2 = arith.maximumf %0, %1 : vector<64x8xbf16>
    %c0_1 = arith.constant 0 : index
    %c0_2 = arith.constant 0 : index
    %3 = vector.load %arg2[%c0_1, %c0_2] : memref<64x64xbf16, #tpu.memory_space<vmem>>, vector<64x64xbf16>
    %cst_3 = arith.constant dense<0.000000e+00> : vector<64x8xf32>
    %4 = tpu.matmul %3, %2, %cst_3 {dimension_numbers = #tpu.dot_dimension_numbers<[1], [0], [0], [1], [0, 0, 1, 1], [], []>} : vector<64x64xbf16>, vector<64x8xbf16>, vector<64x8xf32> -> vector<64x8xf32>
    %c0_4 = arith.constant 0 : index
    %c0_5 = arith.constant 0 : index
    %5 = vector.load %arg3[%c0_4, %c0_5] : memref<64x1xf32, #tpu.memory_space<vmem>>, vector<64x1xf32>
    %6 = vector.broadcast %5 : vector<64x1xf32> to vector<64x8xf32>
    %7 = arith.addf %4, %6 : vector<64x8xf32>
    %8 = arith.truncf %7 : vector<64x8xf32> to vector<64x8xbf16>
    %c0_6 = arith.constant 0 : index
    %c0_7 = arith.constant 0 : index
    %9 = vector.load %arg4[%c0_6, %c0_7] : memref<64x8xbf16, #tpu.memory_space<vmem>>, vector<64x8xbf16>
    tpu.vector_store %arg4[%c0_6, %c0_7], %8 {strides = array<i32>} : memref<64x8xbf16, #tpu.memory_space<vmem>>, vector<64x8xbf16>,
    return
  }
  func.func @transform_0(%arg0: i32) -> (i32, i32) {
    %c0_i32 = arith.constant 0 : i32
    %c0_i32_0 = arith.constant 0 : i32
    return %c0_i32, %arg0 : i32, i32
  }
  func.func @transform_1(%arg0: i32) -> (i32, i32) {
    %c0_i32 = arith.constant 0 : i32
    %c0_i32_0 = arith.constant 0 : i32
    %c0_i32_1 = arith.constant 0 : i32
    return %c0_i32, %c0_i32_0 : i32, i32
  }
  func.func @transform_2(%arg0: i32) -> (i32, i32) {
    %c0_i32 = arith.constant 0 : i32
    %c0_i32_0 = arith.constant 0 : i32
    %c0_i32_1 = arith.constant 0 : i32
    return %c0_i32, %c0_i32_0 : i32, i32
  }
  func.func @transform_3(%arg0: i32) -> (i32, i32) {
    %c0_i32 = arith.constant 0 : i32
    %c0_i32_0 = arith.constant 0 : i32
    return %c0_i32, %arg0 : i32, i32
  }
}

module attributes {stable_mosaic.version = 11 : i64} {
  func.func @_gemm_kernel(%arg0: i32, %arg1: memref<144x32xbf16, #tpu.memory_space<vmem>>, %arg2: memref<144x32xbf16, #tpu.memory_space<vmem>>, %arg3: memref<16x144xbf16, #tpu.memory_space<vmem>>, %arg4: memref<16x144xbf16, #tpu.memory_space<vmem>>, %arg5: memref<16x1xf32, #tpu.memory_space<vmem>>, %arg6: memref<16x32xbf16, #tpu.memory_space<vmem>>) attributes {dimension_semantics = [#tpu.dimension_semantics<parallel>], iteration_bounds = array<i64: 1>, scalar_prefetch = 0 : i64, scratch_operands = 0 : i64, tpu.core_type = #tpu.core_type<tc>, window_params = [{transform_indices = @transform_0, window_bounds = array<i64: 144, 32>}, {transform_indices = @transform_1, window_bounds = array<i64: 144, 32>}, {pipeline_mode = #tpu.pipeline_mode<synchronous>, transform_indices = @transform_2, window_bounds = array<i64: 16, 144>}, {pipeline_mode = #tpu.pipeline_mode<synchronous>, transform_indices = @transform_3, window_bounds = array<i64: 16, 144>}, {pipeline_mode = #tpu.pipeline_mode<synchronous>, transform_indices = @transform_4, window_bounds = array<i64: 16, 1>}, {transform_indices = @transform_5, window_bounds = array<i64: 16, 32>}]} {
    %c0 = arith.constant 0 : index
    %c0_0 = arith.constant 0 : index
    %0 = vector.load %arg1[%c0, %c0_0] : memref<144x32xbf16, #tpu.memory_space<vmem>>, vector<144x32xbf16>
    %cst = arith.constant 0.000000e+00 : bf16
    %1 = vector.broadcast %cst : bf16 to vector<144x32xbf16>
    %2 = arith.maximumf %0, %1 : vector<144x32xbf16>
    %c0_1 = arith.constant 0 : index
    %c0_2 = arith.constant 0 : index
    %3 = vector.load %arg3[%c0_1, %c0_2] : memref<16x144xbf16, #tpu.memory_space<vmem>>, vector<16x144xbf16>
    %cst_3 = arith.constant dense<0.000000e+00> : vector<16x32xf32>
    %4 = tpu.matmul %3, %2, %cst_3 {dimension_numbers = #tpu.dot_dimension_numbers<[1], [0], [0], [1], [0, 0, 1, 1], [], []>} : vector<16x144xbf16>, vector<144x32xbf16>, vector<16x32xf32> -> vector<16x32xf32>
    %c0_4 = arith.constant 0 : index
    %c0_5 = arith.constant 0 : index
    %5 = vector.load %arg2[%c0_4, %c0_5] : memref<144x32xbf16, #tpu.memory_space<vmem>>, vector<144x32xbf16>
    %cst_6 = arith.constant 0.000000e+00 : bf16
    %6 = vector.broadcast %cst_6 : bf16 to vector<144x32xbf16>
    %7 = arith.maximumf %5, %6 : vector<144x32xbf16>
    %c0_7 = arith.constant 0 : index
    %c0_8 = arith.constant 0 : index
    %8 = vector.load %arg4[%c0_7, %c0_8] : memref<16x144xbf16, #tpu.memory_space<vmem>>, vector<16x144xbf16>
    %cst_9 = arith.constant dense<0.000000e+00> : vector<16x32xf32>
    %9 = tpu.matmul %8, %7, %cst_9 {dimension_numbers = #tpu.dot_dimension_numbers<[1], [0], [0], [1], [0, 0, 1, 1], [], []>} : vector<16x144xbf16>, vector<144x32xbf16>, vector<16x32xf32> -> vector<16x32xf32>
    %10 = arith.addf %4, %9 : vector<16x32xf32>
    %c0_10 = arith.constant 0 : index
    %c0_11 = arith.constant 0 : index
    %11 = vector.load %arg5[%c0_10, %c0_11] : memref<16x1xf32, #tpu.memory_space<vmem>>, vector<16x1xf32>
    %12 = vector.broadcast %11 : vector<16x1xf32> to vector<16x32xf32>
    %13 = arith.addf %10, %12 : vector<16x32xf32>
    %14 = arith.truncf %13 : vector<16x32xf32> to vector<16x32xbf16>
    %c0_12 = arith.constant 0 : index
    %c0_13 = arith.constant 0 : index
    %15 = vector.load %arg6[%c0_12, %c0_13] : memref<16x32xbf16, #tpu.memory_space<vmem>>, vector<16x32xbf16>
    tpu.vector_store %arg6[%c0_12, %c0_13], %14 {strides = array<i32>} : memref<16x32xbf16, #tpu.memory_space<vmem>>, vector<16x32xbf16>,
    return
  }
  func.func @transform_0(%arg0: i32) -> (i32, i32) {
    %c0_i32 = arith.constant 0 : i32
    %c0_i32_0 = arith.constant 0 : i32
    return %c0_i32, %arg0 : i32, i32
  }
  func.func @transform_1(%arg0: i32) -> (i32, i32) {
    %c0_i32 = arith.constant 0 : i32
    %c0_i32_0 = arith.constant 0 : i32
    return %c0_i32, %arg0 : i32, i32
  }
  func.func @transform_2(%arg0: i32) -> (i32, i32) {
    %c0_i32 = arith.constant 0 : i32
    %c0_i32_0 = arith.constant 0 : i32
    %c0_i32_1 = arith.constant 0 : i32
    return %c0_i32, %c0_i32_0 : i32, i32
  }
  func.func @transform_3(%arg0: i32) -> (i32, i32) {
    %c0_i32 = arith.constant 0 : i32
    %c0_i32_0 = arith.constant 0 : i32
    %c0_i32_1 = arith.constant 0 : i32
    return %c0_i32, %c0_i32_0 : i32, i32
  }
  func.func @transform_4(%arg0: i32) -> (i32, i32) {
    %c0_i32 = arith.constant 0 : i32
    %c0_i32_0 = arith.constant 0 : i32
    %c0_i32_1 = arith.constant 0 : i32
    return %c0_i32, %c0_i32_0 : i32, i32
  }
  func.func @transform_5(%arg0: i32) -> (i32, i32) {
    %c0_i32 = arith.constant 0 : i32
    %c0_i32_0 = arith.constant 0 : i32
    return %c0_i32, %arg0 : i32, i32
  }
}

module attributes {stable_mosaic.version = 11 : i64} {
  func.func @_gemm_kernel(%arg0: i32, %arg1: memref<64x32xbf16, #tpu.memory_space<vmem>>, %arg2: memref<64x64xbf16, #tpu.memory_space<vmem>>, %arg3: memref<64x1xf32, #tpu.memory_space<vmem>>, %arg4: memref<64x32xbf16, #tpu.memory_space<vmem>>) attributes {dimension_semantics = [#tpu.dimension_semantics<parallel>], iteration_bounds = array<i64: 1>, scalar_prefetch = 0 : i64, scratch_operands = 0 : i64, tpu.core_type = #tpu.core_type<tc>, window_params = [{transform_indices = @transform_0, window_bounds = array<i64: 64, 32>}, {pipeline_mode = #tpu.pipeline_mode<synchronous>, transform_indices = @transform_1, window_bounds = array<i64: 64, 64>}, {pipeline_mode = #tpu.pipeline_mode<synchronous>, transform_indices = @transform_2, window_bounds = array<i64: 64, 1>}, {transform_indices = @transform_3, window_bounds = array<i64: 64, 32>}]} {
    %c0 = arith.constant 0 : index
    %c0_0 = arith.constant 0 : index
    %0 = vector.load %arg1[%c0, %c0_0] : memref<64x32xbf16, #tpu.memory_space<vmem>>, vector<64x32xbf16>
    %cst = arith.constant 0.000000e+00 : bf16
    %1 = vector.broadcast %cst : bf16 to vector<64x32xbf16>
    %2 = arith.maximumf %0, %1 : vector<64x32xbf16>
    %c0_1 = arith.constant 0 : index
    %c0_2 = arith.constant 0 : index
    %3 = vector.load %arg2[%c0_1, %c0_2] : memref<64x64xbf16, #tpu.memory_space<vmem>>, vector<64x64xbf16>
    %cst_3 = arith.constant dense<0.000000e+00> : vector<64x32xf32>
    %4 = tpu.matmul %3, %2, %cst_3 {dimension_numbers = #tpu.dot_dimension_numbers<[1], [0], [0], [1], [0, 0, 1, 1], [], []>} : vector<64x64xbf16>, vector<64x32xbf16>, vector<64x32xf32> -> vector<64x32xf32>
    %c0_4 = arith.constant 0 : index
    %c0_5 = arith.constant 0 : index
    %5 = vector.load %arg3[%c0_4, %c0_5] : memref<64x1xf32, #tpu.memory_space<vmem>>, vector<64x1xf32>
    %6 = vector.broadcast %5 : vector<64x1xf32> to vector<64x32xf32>
    %7 = arith.addf %4, %6 : vector<64x32xf32>
    %8 = arith.truncf %7 : vector<64x32xf32> to vector<64x32xbf16>
    %c0_6 = arith.constant 0 : index
    %c0_7 = arith.constant 0 : index
    %9 = vector.load %arg4[%c0_6, %c0_7] : memref<64x32xbf16, #tpu.memory_space<vmem>>, vector<64x32xbf16>
    tpu.vector_store %arg4[%c0_6, %c0_7], %8 {strides = array<i32>} : memref<64x32xbf16, #tpu.memory_space<vmem>>, vector<64x32xbf16>,
    return
  }
  func.func @transform_0(%arg0: i32) -> (i32, i32) {
    %c0_i32 = arith.constant 0 : i32
    %c0_i32_0 = arith.constant 0 : i32
    return %c0_i32, %arg0 : i32, i32
  }
  func.func @transform_1(%arg0: i32) -> (i32, i32) {
    %c0_i32 = arith.constant 0 : i32
    %c0_i32_0 = arith.constant 0 : i32
    %c0_i32_1 = arith.constant 0 : i32
    return %c0_i32, %c0_i32_0 : i32, i32
  }
  func.func @transform_2(%arg0: i32) -> (i32, i32) {
    %c0_i32 = arith.constant 0 : i32
    %c0_i32_0 = arith.constant 0 : i32
    %c0_i32_1 = arith.constant 0 : i32
    return %c0_i32, %c0_i32_0 : i32, i32
  }
  func.func @transform_3(%arg0: i32) -> (i32, i32) {
    %c0_i32 = arith.constant 0 : i32
    %c0_i32_0 = arith.constant 0 : i32
    return %c0_i32, %arg0 : i32, i32
  }
}

module attributes {stable_mosaic.version = 11 : i64} {
  func.func @_gemm_kernel(%arg0: i32, %arg1: memref<144x128xbf16, #tpu.memory_space<vmem>>, %arg2: memref<144x128xbf16, #tpu.memory_space<vmem>>, %arg3: memref<16x144xbf16, #tpu.memory_space<vmem>>, %arg4: memref<16x144xbf16, #tpu.memory_space<vmem>>, %arg5: memref<16x1xf32, #tpu.memory_space<vmem>>, %arg6: memref<16x128xbf16, #tpu.memory_space<vmem>>) attributes {dimension_semantics = [#tpu.dimension_semantics<parallel>], iteration_bounds = array<i64: 1>, scalar_prefetch = 0 : i64, scratch_operands = 0 : i64, tpu.core_type = #tpu.core_type<tc>, window_params = [{transform_indices = @transform_0, window_bounds = array<i64: 144, 128>}, {transform_indices = @transform_1, window_bounds = array<i64: 144, 128>}, {pipeline_mode = #tpu.pipeline_mode<synchronous>, transform_indices = @transform_2, window_bounds = array<i64: 16, 144>}, {pipeline_mode = #tpu.pipeline_mode<synchronous>, transform_indices = @transform_3, window_bounds = array<i64: 16, 144>}, {pipeline_mode = #tpu.pipeline_mode<synchronous>, transform_indices = @transform_4, window_bounds = array<i64: 16, 1>}, {transform_indices = @transform_5, window_bounds = array<i64: 16, 128>}]} {
    %c0 = arith.constant 0 : index
    %c0_0 = arith.constant 0 : index
    %0 = vector.load %arg1[%c0, %c0_0] : memref<144x128xbf16, #tpu.memory_space<vmem>>, vector<144x128xbf16>
    %cst = arith.constant 0.000000e+00 : bf16
    %1 = vector.broadcast %cst : bf16 to vector<144x128xbf16>
    %2 = arith.maximumf %0, %1 : vector<144x128xbf16>
    %c0_1 = arith.constant 0 : index
    %c0_2 = arith.constant 0 : index
    %3 = vector.load %arg3[%c0_1, %c0_2] : memref<16x144xbf16, #tpu.memory_space<vmem>>, vector<16x144xbf16>
    %cst_3 = arith.constant dense<0.000000e+00> : vector<16x128xf32>
    %4 = tpu.matmul %3, %2, %cst_3 {dimension_numbers = #tpu.dot_dimension_numbers<[1], [0], [0], [1], [0, 0, 1, 1], [], []>} : vector<16x144xbf16>, vector<144x128xbf16>, vector<16x128xf32> -> vector<16x128xf32>
    %c0_4 = arith.constant 0 : index
    %c0_5 = arith.constant 0 : index
    %5 = vector.load %arg2[%c0_4, %c0_5] : memref<144x128xbf16, #tpu.memory_space<vmem>>, vector<144x128xbf16>
    %cst_6 = arith.constant 0.000000e+00 : bf16
    %6 = vector.broadcast %cst_6 : bf16 to vector<144x128xbf16>
    %7 = arith.maximumf %5, %6 : vector<144x128xbf16>
    %c0_7 = arith.constant 0 : index
    %c0_8 = arith.constant 0 : index
    %8 = vector.load %arg4[%c0_7, %c0_8] : memref<16x144xbf16, #tpu.memory_space<vmem>>, vector<16x144xbf16>
    %cst_9 = arith.constant dense<0.000000e+00> : vector<16x128xf32>
    %9 = tpu.matmul %8, %7, %cst_9 {dimension_numbers = #tpu.dot_dimension_numbers<[1], [0], [0], [1], [0, 0, 1, 1], [], []>} : vector<16x144xbf16>, vector<144x128xbf16>, vector<16x128xf32> -> vector<16x128xf32>
    %10 = arith.addf %4, %9 : vector<16x128xf32>
    %c0_10 = arith.constant 0 : index
    %c0_11 = arith.constant 0 : index
    %11 = vector.load %arg5[%c0_10, %c0_11] : memref<16x1xf32, #tpu.memory_space<vmem>>, vector<16x1xf32>
    %12 = vector.broadcast %11 : vector<16x1xf32> to vector<16x128xf32>
    %13 = arith.addf %10, %12 : vector<16x128xf32>
    %14 = arith.truncf %13 : vector<16x128xf32> to vector<16x128xbf16>
    %c0_12 = arith.constant 0 : index
    %c0_13 = arith.constant 0 : index
    %15 = vector.load %arg6[%c0_12, %c0_13] : memref<16x128xbf16, #tpu.memory_space<vmem>>, vector<16x128xbf16>
    tpu.vector_store %arg6[%c0_12, %c0_13], %14 {strides = array<i32>} : memref<16x128xbf16, #tpu.memory_space<vmem>>, vector<16x128xbf16>,
    return
  }
  func.func @transform_0(%arg0: i32) -> (i32, i32) {
    %c0_i32 = arith.constant 0 : i32
    %c0_i32_0 = arith.constant 0 : i32
    return %c0_i32, %arg0 : i32, i32
  }
  func.func @transform_1(%arg0: i32) -> (i32, i32) {
    %c0_i32 = arith.constant 0 : i32
    %c0_i32_0 = arith.constant 0 : i32
    return %c0_i32, %arg0 : i32, i32
  }
  func.func @transform_2(%arg0: i32) -> (i32, i32) {
    %c0_i32 = arith.constant 0 : i32
    %c0_i32_0 = arith.constant 0 : i32
    %c0_i32_1 = arith.constant 0 : i32
    return %c0_i32, %c0_i32_0 : i32, i32
  }
  func.func @transform_3(%arg0: i32) -> (i32, i32) {
    %c0_i32 = arith.constant 0 : i32
    %c0_i32_0 = arith.constant 0 : i32
    %c0_i32_1 = arith.constant 0 : i32
    return %c0_i32, %c0_i32_0 : i32, i32
  }
  func.func @transform_4(%arg0: i32) -> (i32, i32) {
    %c0_i32 = arith.constant 0 : i32
    %c0_i32_0 = arith.constant 0 : i32
    %c0_i32_1 = arith.constant 0 : i32
    return %c0_i32, %c0_i32_0 : i32, i32
  }
  func.func @transform_5(%arg0: i32) -> (i32, i32) {
    %c0_i32 = arith.constant 0 : i32
    %c0_i32_0 = arith.constant 0 : i32
    return %c0_i32, %arg0 : i32, i32
  }
}

module attributes {stable_mosaic.version = 11 : i64} {
  func.func @_gemm_kernel(%arg0: i32, %arg1: memref<64x128xbf16, #tpu.memory_space<vmem>>, %arg2: memref<64x64xbf16, #tpu.memory_space<vmem>>, %arg3: memref<64x1xf32, #tpu.memory_space<vmem>>, %arg4: memref<64x128xbf16, #tpu.memory_space<vmem>>) attributes {dimension_semantics = [#tpu.dimension_semantics<parallel>], iteration_bounds = array<i64: 1>, scalar_prefetch = 0 : i64, scratch_operands = 0 : i64, tpu.core_type = #tpu.core_type<tc>, window_params = [{transform_indices = @transform_0, window_bounds = array<i64: 64, 128>}, {pipeline_mode = #tpu.pipeline_mode<synchronous>, transform_indices = @transform_1, window_bounds = array<i64: 64, 64>}, {pipeline_mode = #tpu.pipeline_mode<synchronous>, transform_indices = @transform_2, window_bounds = array<i64: 64, 1>}, {transform_indices = @transform_3, window_bounds = array<i64: 64, 128>}]} {
    %c0 = arith.constant 0 : index
    %c0_0 = arith.constant 0 : index
    %0 = vector.load %arg1[%c0, %c0_0] : memref<64x128xbf16, #tpu.memory_space<vmem>>, vector<64x128xbf16>
    %cst = arith.constant 0.000000e+00 : bf16
    %1 = vector.broadcast %cst : bf16 to vector<64x128xbf16>
    %2 = arith.maximumf %0, %1 : vector<64x128xbf16>
    %c0_1 = arith.constant 0 : index
    %c0_2 = arith.constant 0 : index
    %3 = vector.load %arg2[%c0_1, %c0_2] : memref<64x64xbf16, #tpu.memory_space<vmem>>, vector<64x64xbf16>
    %cst_3 = arith.constant dense<0.000000e+00> : vector<64x128xf32>
    %4 = tpu.matmul %3, %2, %cst_3 {dimension_numbers = #tpu.dot_dimension_numbers<[1], [0], [0], [1], [0, 0, 1, 1], [], []>} : vector<64x64xbf16>, vector<64x128xbf16>, vector<64x128xf32> -> vector<64x128xf32>
    %c0_4 = arith.constant 0 : index
    %c0_5 = arith.constant 0 : index
    %5 = vector.load %arg3[%c0_4, %c0_5] : memref<64x1xf32, #tpu.memory_space<vmem>>, vector<64x1xf32>
    %6 = vector.broadcast %5 : vector<64x1xf32> to vector<64x128xf32>
    %7 = arith.addf %4, %6 : vector<64x128xf32>
    %8 = arith.truncf %7 : vector<64x128xf32> to vector<64x128xbf16>
    %c0_6 = arith.constant 0 : index
    %c0_7 = arith.constant 0 : index
    %9 = vector.load %arg4[%c0_6, %c0_7] : memref<64x128xbf16, #tpu.memory_space<vmem>>, vector<64x128xbf16>
    tpu.vector_store %arg4[%c0_6, %c0_7], %8 {strides = array<i32>} : memref<64x128xbf16, #tpu.memory_space<vmem>>, vector<64x128xbf16>,
    return
  }
  func.func @transform_0(%arg0: i32) -> (i32, i32) {
    %c0_i32 = arith.constant 0 : i32
    %c0_i32_0 = arith.constant 0 : i32
    return %c0_i32, %arg0 : i32, i32
  }
  func.func @transform_1(%arg0: i32) -> (i32, i32) {
    %c0_i32 = arith.constant 0 : i32
    %c0_i32_0 = arith.constant 0 : i32
    %c0_i32_1 = arith.constant 0 : i32
    return %c0_i32, %c0_i32_0 : i32, i32
  }
  func.func @transform_2(%arg0: i32) -> (i32, i32) {
    %c0_i32 = arith.constant 0 : i32
    %c0_i32_0 = arith.constant 0 : i32
    %c0_i32_1 = arith.constant 0 : i32
    return %c0_i32, %c0_i32_0 : i32, i32
  }
  func.func @transform_3(%arg0: i32) -> (i32, i32) {
    %c0_i32 = arith.constant 0 : i32
    %c0_i32_0 = arith.constant 0 : i32
    return %c0_i32, %arg0 : i32, i32
  }
}

module attributes {stable_mosaic.version = 11 : i64} {
  func.func @_gemm_kernel(%arg0: i32, %arg1: memref<144x128xbf16, #tpu.memory_space<vmem>>, %arg2: memref<144x128xbf16, #tpu.memory_space<vmem>>, %arg3: memref<144x128xbf16, #tpu.memory_space<vmem>>, %arg4: memref<16x144xbf16, #tpu.memory_space<vmem>>, %arg5: memref<16x144xbf16, #tpu.memory_space<vmem>>, %arg6: memref<16x144xbf16, #tpu.memory_space<vmem>>, %arg7: memref<16x1xf32, #tpu.memory_space<vmem>>, %arg8: memref<16x128xbf16, #tpu.memory_space<vmem>>) attributes {dimension_semantics = [#tpu.dimension_semantics<parallel>], iteration_bounds = array<i64: 1>, scalar_prefetch = 0 : i64, scratch_operands = 0 : i64, tpu.core_type = #tpu.core_type<tc>, window_params = [{transform_indices = @transform_0, window_bounds = array<i64: 144, 128>}, {transform_indices = @transform_1, window_bounds = array<i64: 144, 128>}, {transform_indices = @transform_2, window_bounds = array<i64: 144, 128>}, {pipeline_mode = #tpu.pipeline_mode<synchronous>, transform_indices = @transform_3, window_bounds = array<i64: 16, 144>}, {pipeline_mode = #tpu.pipeline_mode<synchronous>, transform_indices = @transform_4, window_bounds = array<i64: 16, 144>}, {pipeline_mode = #tpu.pipeline_mode<synchronous>, transform_indices = @transform_5, window_bounds = array<i64: 16, 144>}, {pipeline_mode = #tpu.pipeline_mode<synchronous>, transform_indices = @transform_6, window_bounds = array<i64: 16, 1>}, {transform_indices = @transform_7, window_bounds = array<i64: 16, 128>}]} {
    %c0 = arith.constant 0 : index
    %c0_0 = arith.constant 0 : index
    %0 = vector.load %arg1[%c0, %c0_0] : memref<144x128xbf16, #tpu.memory_space<vmem>>, vector<144x128xbf16>
    %cst = arith.constant 0.000000e+00 : bf16
    %1 = vector.broadcast %cst : bf16 to vector<144x128xbf16>
    %2 = arith.maximumf %0, %1 : vector<144x128xbf16>
    %c0_1 = arith.constant 0 : index
    %c0_2 = arith.constant 0 : index
    %3 = vector.load %arg4[%c0_1, %c0_2] : memref<16x144xbf16, #tpu.memory_space<vmem>>, vector<16x144xbf16>
    %cst_3 = arith.constant dense<0.000000e+00> : vector<16x128xf32>
    %4 = tpu.matmul %3, %2, %cst_3 {dimension_numbers = #tpu.dot_dimension_numbers<[1], [0], [0], [1], [0, 0, 1, 1], [], []>} : vector<16x144xbf16>, vector<144x128xbf16>, vector<16x128xf32> -> vector<16x128xf32>
    %c0_4 = arith.constant 0 : index
    %c0_5 = arith.constant 0 : index
    %5 = vector.load %arg2[%c0_4, %c0_5] : memref<144x128xbf16, #tpu.memory_space<vmem>>, vector<144x128xbf16>
    %cst_6 = arith.constant 0.000000e+00 : bf16
    %6 = vector.broadcast %cst_6 : bf16 to vector<144x128xbf16>
    %7 = arith.maximumf %5, %6 : vector<144x128xbf16>
    %c0_7 = arith.constant 0 : index
    %c0_8 = arith.constant 0 : index
    %8 = vector.load %arg5[%c0_7, %c0_8] : memref<16x144xbf16, #tpu.memory_space<vmem>>, vector<16x144xbf16>
    %cst_9 = arith.constant dense<0.000000e+00> : vector<16x128xf32>
    %9 = tpu.matmul %8, %7, %cst_9 {dimension_numbers = #tpu.dot_dimension_numbers<[1], [0], [0], [1], [0, 0, 1, 1], [], []>} : vector<16x144xbf16>, vector<144x128xbf16>, vector<16x128xf32> -> vector<16x128xf32>
    %10 = arith.addf %4, %9 : vector<16x128xf32>
    %c0_10 = arith.constant 0 : index
    %c0_11 = arith.constant 0 : index
    %11 = vector.load %arg3[%c0_10, %c0_11] : memref<144x128xbf16, #tpu.memory_space<vmem>>, vector<144x128xbf16>
    %cst_12 = arith.constant 0.000000e+00 : bf16
    %12 = vector.broadcast %cst_12 : bf16 to vector<144x128xbf16>
    %13 = arith.maximumf %11, %12 : vector<144x128xbf16>
    %c0_13 = arith.constant 0 : index
    %c0_14 = arith.constant 0 : index
    %14 = vector.load %arg6[%c0_13, %c0_14] : memref<16x144xbf16, #tpu.memory_space<vmem>>, vector<16x144xbf16>
    %cst_15 = arith.constant dense<0.000000e+00> : vector<16x128xf32>
    %15 = tpu.matmul %14, %13, %cst_15 {dimension_numbers = #tpu.dot_dimension_numbers<[1], [0], [0], [1], [0, 0, 1, 1], [], []>} : vector<16x144xbf16>, vector<144x128xbf16>, vector<16x128xf32> -> vector<16x128xf32>
    %16 = arith.addf %10, %15 : vector<16x128xf32>
    %c0_16 = arith.constant 0 : index
    %c0_17 = arith.constant 0 : index
    %17 = vector.load %arg7[%c0_16, %c0_17] : memref<16x1xf32, #tpu.memory_space<vmem>>, vector<16x1xf32>
    %18 = vector.broadcast %17 : vector<16x1xf32> to vector<16x128xf32>
    %19 = arith.addf %16, %18 : vector<16x128xf32>
    %20 = arith.truncf %19 : vector<16x128xf32> to vector<16x128xbf16>
    %c0_18 = arith.constant 0 : index
    %c0_19 = arith.constant 0 : index
    %21 = vector.load %arg8[%c0_18, %c0_19] : memref<16x128xbf16, #tpu.memory_space<vmem>>, vector<16x128xbf16>
    tpu.vector_store %arg8[%c0_18, %c0_19], %20 {strides = array<i32>} : memref<16x128xbf16, #tpu.memory_space<vmem>>, vector<16x128xbf16>,
    return
  }
  func.func @transform_0(%arg0: i32) -> (i32, i32) {
    %c0_i32 = arith.constant 0 : i32
    %c0_i32_0 = arith.constant 0 : i32
    return %c0_i32, %arg0 : i32, i32
  }
  func.func @transform_1(%arg0: i32) -> (i32, i32) {
    %c0_i32 = arith.constant 0 : i32
    %c0_i32_0 = arith.constant 0 : i32
    return %c0_i32, %arg0 : i32, i32
  }
  func.func @transform_2(%arg0: i32) -> (i32, i32) {
    %c0_i32 = arith.constant 0 : i32
    %c0_i32_0 = arith.constant 0 : i32
    return %c0_i32, %arg0 : i32, i32
  }
  func.func @transform_3(%arg0: i32) -> (i32, i32) {
    %c0_i32 = arith.constant 0 : i32
    %c0_i32_0 = arith.constant 0 : i32
    %c0_i32_1 = arith.constant 0 : i32
    return %c0_i32, %c0_i32_0 : i32, i32
  }
  func.func @transform_4(%arg0: i32) -> (i32, i32) {
    %c0_i32 = arith.constant 0 : i32
    %c0_i32_0 = arith.constant 0 : i32
    %c0_i32_1 = arith.constant 0 : i32
    return %c0_i32, %c0_i32_0 : i32, i32
  }
  func.func @transform_5(%arg0: i32) -> (i32, i32) {
    %c0_i32 = arith.constant 0 : i32
    %c0_i32_0 = arith.constant 0 : i32
    %c0_i32_1 = arith.constant 0 : i32
    return %c0_i32, %c0_i32_0 : i32, i32
  }
  func.func @transform_6(%arg0: i32) -> (i32, i32) {
    %c0_i32 = arith.constant 0 : i32
    %c0_i32_0 = arith.constant 0 : i32
    %c0_i32_1 = arith.constant 0 : i32
    return %c0_i32, %c0_i32_0 : i32, i32
  }
  func.func @transform_7(%arg0: i32) -> (i32, i32) {
    %c0_i32 = arith.constant 0 : i32
    %c0_i32_0 = arith.constant 0 : i32
    return %c0_i32, %arg0 : i32, i32
  }
}

module attributes {stable_mosaic.version = 11 : i64} {
  func.func @_gemm_kernel(%arg0: i32, %arg1: memref<144x512xbf16, #tpu.memory_space<vmem>>, %arg2: memref<144x512xbf16, #tpu.memory_space<vmem>>, %arg3: memref<16x144xbf16, #tpu.memory_space<vmem>>, %arg4: memref<16x144xbf16, #tpu.memory_space<vmem>>, %arg5: memref<16x1xf32, #tpu.memory_space<vmem>>, %arg6: memref<16x512xbf16, #tpu.memory_space<vmem>>) attributes {dimension_semantics = [#tpu.dimension_semantics<parallel>], iteration_bounds = array<i64: 1>, scalar_prefetch = 0 : i64, scratch_operands = 0 : i64, tpu.core_type = #tpu.core_type<tc>, window_params = [{transform_indices = @transform_0, window_bounds = array<i64: 144, 512>}, {transform_indices = @transform_1, window_bounds = array<i64: 144, 512>}, {pipeline_mode = #tpu.pipeline_mode<synchronous>, transform_indices = @transform_2, window_bounds = array<i64: 16, 144>}, {pipeline_mode = #tpu.pipeline_mode<synchronous>, transform_indices = @transform_3, window_bounds = array<i64: 16, 144>}, {pipeline_mode = #tpu.pipeline_mode<synchronous>, transform_indices = @transform_4, window_bounds = array<i64: 16, 1>}, {transform_indices = @transform_5, window_bounds = array<i64: 16, 512>}]} {
    %c0 = arith.constant 0 : index
    %c0_0 = arith.constant 0 : index
    %0 = vector.load %arg1[%c0, %c0_0] : memref<144x512xbf16, #tpu.memory_space<vmem>>, vector<144x512xbf16>
    %cst = arith.constant 0.000000e+00 : bf16
    %1 = vector.broadcast %cst : bf16 to vector<144x512xbf16>
    %2 = arith.maximumf %0, %1 : vector<144x512xbf16>
    %c0_1 = arith.constant 0 : index
    %c0_2 = arith.constant 0 : index
    %3 = vector.load %arg3[%c0_1, %c0_2] : memref<16x144xbf16, #tpu.memory_space<vmem>>, vector<16x144xbf16>
    %cst_3 = arith.constant dense<0.000000e+00> : vector<16x512xf32>
    %4 = tpu.matmul %3, %2, %cst_3 {dimension_numbers = #tpu.dot_dimension_numbers<[1], [0], [0], [1], [0, 0, 1, 1], [], []>} : vector<16x144xbf16>, vector<144x512xbf16>, vector<16x512xf32> -> vector<16x512xf32>
    %c0_4 = arith.constant 0 : index
    %c0_5 = arith.constant 0 : index
    %5 = vector.load %arg2[%c0_4, %c0_5] : memref<144x512xbf16, #tpu.memory_space<vmem>>, vector<144x512xbf16>
    %cst_6 = arith.constant 0.000000e+00 : bf16
    %6 = vector.broadcast %cst_6 : bf16 to vector<144x512xbf16>
    %7 = arith.maximumf %5, %6 : vector<144x512xbf16>
    %c0_7 = arith.constant 0 : index
    %c0_8 = arith.constant 0 : index
    %8 = vector.load %arg4[%c0_7, %c0_8] : memref<16x144xbf16, #tpu.memory_space<vmem>>, vector<16x144xbf16>
    %cst_9 = arith.constant dense<0.000000e+00> : vector<16x512xf32>
    %9 = tpu.matmul %8, %7, %cst_9 {dimension_numbers = #tpu.dot_dimension_numbers<[1], [0], [0], [1], [0, 0, 1, 1], [], []>} : vector<16x144xbf16>, vector<144x512xbf16>, vector<16x512xf32> -> vector<16x512xf32>
    %10 = arith.addf %4, %9 : vector<16x512xf32>
    %c0_10 = arith.constant 0 : index
    %c0_11 = arith.constant 0 : index
    %11 = vector.load %arg5[%c0_10, %c0_11] : memref<16x1xf32, #tpu.memory_space<vmem>>, vector<16x1xf32>
    %12 = vector.broadcast %11 : vector<16x1xf32> to vector<16x512xf32>
    %13 = arith.addf %10, %12 : vector<16x512xf32>
    %14 = arith.truncf %13 : vector<16x512xf32> to vector<16x512xbf16>
    %c0_12 = arith.constant 0 : index
    %c0_13 = arith.constant 0 : index
    %15 = vector.load %arg6[%c0_12, %c0_13] : memref<16x512xbf16, #tpu.memory_space<vmem>>, vector<16x512xbf16>
    tpu.vector_store %arg6[%c0_12, %c0_13], %14 {strides = array<i32>} : memref<16x512xbf16, #tpu.memory_space<vmem>>, vector<16x512xbf16>,
    return
  }
  func.func @transform_0(%arg0: i32) -> (i32, i32) {
    %c0_i32 = arith.constant 0 : i32
    %c0_i32_0 = arith.constant 0 : i32
    return %c0_i32, %arg0 : i32, i32
  }
  func.func @transform_1(%arg0: i32) -> (i32, i32) {
    %c0_i32 = arith.constant 0 : i32
    %c0_i32_0 = arith.constant 0 : i32
    return %c0_i32, %arg0 : i32, i32
  }
  func.func @transform_2(%arg0: i32) -> (i32, i32) {
    %c0_i32 = arith.constant 0 : i32
    %c0_i32_0 = arith.constant 0 : i32
    %c0_i32_1 = arith.constant 0 : i32
    return %c0_i32, %c0_i32_0 : i32, i32
  }
  func.func @transform_3(%arg0: i32) -> (i32, i32) {
    %c0_i32 = arith.constant 0 : i32
    %c0_i32_0 = arith.constant 0 : i32
    %c0_i32_1 = arith.constant 0 : i32
    return %c0_i32, %c0_i32_0 : i32, i32
  }
  func.func @transform_4(%arg0: i32) -> (i32, i32) {
    %c0_i32 = arith.constant 0 : i32
    %c0_i32_0 = arith.constant 0 : i32
    %c0_i32_1 = arith.constant 0 : i32
    return %c0_i32, %c0_i32_0 : i32, i32
  }
  func.func @transform_5(%arg0: i32) -> (i32, i32) {
    %c0_i32 = arith.constant 0 : i32
    %c0_i32_0 = arith.constant 0 : i32
    return %c0_i32, %arg0 : i32, i32
  }
}

module attributes {stable_mosaic.version = 11 : i64} {
  func.func @_gemm_kernel(%arg0: i32, %arg1: memref<144x512xbf16, #tpu.memory_space<vmem>>, %arg2: memref<144x512xbf16, #tpu.memory_space<vmem>>, %arg3: memref<144x512xbf16, #tpu.memory_space<vmem>>, %arg4: memref<16x144xbf16, #tpu.memory_space<vmem>>, %arg5: memref<16x144xbf16, #tpu.memory_space<vmem>>, %arg6: memref<16x144xbf16, #tpu.memory_space<vmem>>, %arg7: memref<16x1xf32, #tpu.memory_space<vmem>>, %arg8: memref<16x512xbf16, #tpu.memory_space<vmem>>) attributes {dimension_semantics = [#tpu.dimension_semantics<parallel>], iteration_bounds = array<i64: 1>, scalar_prefetch = 0 : i64, scratch_operands = 0 : i64, tpu.core_type = #tpu.core_type<tc>, window_params = [{transform_indices = @transform_0, window_bounds = array<i64: 144, 512>}, {transform_indices = @transform_1, window_bounds = array<i64: 144, 512>}, {transform_indices = @transform_2, window_bounds = array<i64: 144, 512>}, {pipeline_mode = #tpu.pipeline_mode<synchronous>, transform_indices = @transform_3, window_bounds = array<i64: 16, 144>}, {pipeline_mode = #tpu.pipeline_mode<synchronous>, transform_indices = @transform_4, window_bounds = array<i64: 16, 144>}, {pipeline_mode = #tpu.pipeline_mode<synchronous>, transform_indices = @transform_5, window_bounds = array<i64: 16, 144>}, {pipeline_mode = #tpu.pipeline_mode<synchronous>, transform_indices = @transform_6, window_bounds = array<i64: 16, 1>}, {transform_indices = @transform_7, window_bounds = array<i64: 16, 512>}]} {
    %c0 = arith.constant 0 : index
    %c0_0 = arith.constant 0 : index
    %0 = vector.load %arg1[%c0, %c0_0] : memref<144x512xbf16, #tpu.memory_space<vmem>>, vector<144x512xbf16>
    %cst = arith.constant 0.000000e+00 : bf16
    %1 = vector.broadcast %cst : bf16 to vector<144x512xbf16>
    %2 = arith.maximumf %0, %1 : vector<144x512xbf16>
    %c0_1 = arith.constant 0 : index
    %c0_2 = arith.constant 0 : index
    %3 = vector.load %arg4[%c0_1, %c0_2] : memref<16x144xbf16, #tpu.memory_space<vmem>>, vector<16x144xbf16>
    %cst_3 = arith.constant dense<0.000000e+00> : vector<16x512xf32>
    %4 = tpu.matmul %3, %2, %cst_3 {dimension_numbers = #tpu.dot_dimension_numbers<[1], [0], [0], [1], [0, 0, 1, 1], [], []>} : vector<16x144xbf16>, vector<144x512xbf16>, vector<16x512xf32> -> vector<16x512xf32>
    %c0_4 = arith.constant 0 : index
    %c0_5 = arith.constant 0 : index
    %5 = vector.load %arg2[%c0_4, %c0_5] : memref<144x512xbf16, #tpu.memory_space<vmem>>, vector<144x512xbf16>
    %cst_6 = arith.constant 0.000000e+00 : bf16
    %6 = vector.broadcast %cst_6 : bf16 to vector<144x512xbf16>
    %7 = arith.maximumf %5, %6 : vector<144x512xbf16>
    %c0_7 = arith.constant 0 : index
    %c0_8 = arith.constant 0 : index
    %8 = vector.load %arg5[%c0_7, %c0_8] : memref<16x144xbf16, #tpu.memory_space<vmem>>, vector<16x144xbf16>
    %cst_9 = arith.constant dense<0.000000e+00> : vector<16x512xf32>
    %9 = tpu.matmul %8, %7, %cst_9 {dimension_numbers = #tpu.dot_dimension_numbers<[1], [0], [0], [1], [0, 0, 1, 1], [], []>} : vector<16x144xbf16>, vector<144x512xbf16>, vector<16x512xf32> -> vector<16x512xf32>
    %10 = arith.addf %4, %9 : vector<16x512xf32>
    %c0_10 = arith.constant 0 : index
    %c0_11 = arith.constant 0 : index
    %11 = vector.load %arg3[%c0_10, %c0_11] : memref<144x512xbf16, #tpu.memory_space<vmem>>, vector<144x512xbf16>
    %cst_12 = arith.constant 0.000000e+00 : bf16
    %12 = vector.broadcast %cst_12 : bf16 to vector<144x512xbf16>
    %13 = arith.maximumf %11, %12 : vector<144x512xbf16>
    %c0_13 = arith.constant 0 : index
    %c0_14 = arith.constant 0 : index
    %14 = vector.load %arg6[%c0_13, %c0_14] : memref<16x144xbf16, #tpu.memory_space<vmem>>, vector<16x144xbf16>
    %cst_15 = arith.constant dense<0.000000e+00> : vector<16x512xf32>
    %15 = tpu.matmul %14, %13, %cst_15 {dimension_numbers = #tpu.dot_dimension_numbers<[1], [0], [0], [1], [0, 0, 1, 1], [], []>} : vector<16x144xbf16>, vector<144x512xbf16>, vector<16x512xf32> -> vector<16x512xf32>
    %16 = arith.addf %10, %15 : vector<16x512xf32>
    %c0_16 = arith.constant 0 : index
    %c0_17 = arith.constant 0 : index
    %17 = vector.load %arg7[%c0_16, %c0_17] : memref<16x1xf32, #tpu.memory_space<vmem>>, vector<16x1xf32>
    %18 = vector.broadcast %17 : vector<16x1xf32> to vector<16x512xf32>
    %19 = arith.addf %16, %18 : vector<16x512xf32>
    %20 = arith.truncf %19 : vector<16x512xf32> to vector<16x512xbf16>
    %c0_18 = arith.constant 0 : index
    %c0_19 = arith.constant 0 : index
    %21 = vector.load %arg8[%c0_18, %c0_19] : memref<16x512xbf16, #tpu.memory_space<vmem>>, vector<16x512xbf16>
    tpu.vector_store %arg8[%c0_18, %c0_19], %20 {strides = array<i32>} : memref<16x512xbf16, #tpu.memory_space<vmem>>, vector<16x512xbf16>,
    return
  }
  func.func @transform_0(%arg0: i32) -> (i32, i32) {
    %c0_i32 = arith.constant 0 : i32
    %c0_i32_0 = arith.constant 0 : i32
    return %c0_i32, %arg0 : i32, i32
  }
  func.func @transform_1(%arg0: i32) -> (i32, i32) {
    %c0_i32 = arith.constant 0 : i32
    %c0_i32_0 = arith.constant 0 : i32
    return %c0_i32, %arg0 : i32, i32
  }
  func.func @transform_2(%arg0: i32) -> (i32, i32) {
    %c0_i32 = arith.constant 0 : i32
    %c0_i32_0 = arith.constant 0 : i32
    return %c0_i32, %arg0 : i32, i32
  }
  func.func @transform_3(%arg0: i32) -> (i32, i32) {
    %c0_i32 = arith.constant 0 : i32
    %c0_i32_0 = arith.constant 0 : i32
    %c0_i32_1 = arith.constant 0 : i32
    return %c0_i32, %c0_i32_0 : i32, i32
  }
  func.func @transform_4(%arg0: i32) -> (i32, i32) {
    %c0_i32 = arith.constant 0 : i32
    %c0_i32_0 = arith.constant 0 : i32
    %c0_i32_1 = arith.constant 0 : i32
    return %c0_i32, %c0_i32_0 : i32, i32
  }
  func.func @transform_5(%arg0: i32) -> (i32, i32) {
    %c0_i32 = arith.constant 0 : i32
    %c0_i32_0 = arith.constant 0 : i32
    %c0_i32_1 = arith.constant 0 : i32
    return %c0_i32, %c0_i32_0 : i32, i32
  }
  func.func @transform_6(%arg0: i32) -> (i32, i32) {
    %c0_i32 = arith.constant 0 : i32
    %c0_i32_0 = arith.constant 0 : i32
    %c0_i32_1 = arith.constant 0 : i32
    return %c0_i32, %c0_i32_0 : i32, i32
  }
  func.func @transform_7(%arg0: i32) -> (i32, i32) {
    %c0_i32 = arith.constant 0 : i32
    %c0_i32_0 = arith.constant 0 : i32
    return %c0_i32, %arg0 : i32, i32
  }
}

module attributes {stable_mosaic.version = 11 : i64} {
  func.func @_gemm_kernel(%arg0: i32, %arg1: memref<144x512xbf16, #tpu.memory_space<vmem>>, %arg2: memref<144x512xbf16, #tpu.memory_space<vmem>>, %arg3: memref<144x512xbf16, #tpu.memory_space<vmem>>, %arg4: memref<144x512xbf16, #tpu.memory_space<vmem>>, %arg5: memref<16x144xbf16, #tpu.memory_space<vmem>>, %arg6: memref<16x144xbf16, #tpu.memory_space<vmem>>, %arg7: memref<16x144xbf16, #tpu.memory_space<vmem>>, %arg8: memref<16x144xbf16, #tpu.memory_space<vmem>>, %arg9: memref<16x1xf32, #tpu.memory_space<vmem>>, %arg10: memref<16x512xbf16, #tpu.memory_space<vmem>>) attributes {dimension_semantics = [#tpu.dimension_semantics<parallel>], iteration_bounds = array<i64: 1>, scalar_prefetch = 0 : i64, scratch_operands = 0 : i64, tpu.core_type = #tpu.core_type<tc>, window_params = [{transform_indices = @transform_0, window_bounds = array<i64: 144, 512>}, {transform_indices = @transform_1, window_bounds = array<i64: 144, 512>}, {transform_indices = @transform_2, window_bounds = array<i64: 144, 512>}, {transform_indices = @transform_3, window_bounds = array<i64: 144, 512>}, {pipeline_mode = #tpu.pipeline_mode<synchronous>, transform_indices = @transform_4, window_bounds = array<i64: 16, 144>}, {pipeline_mode = #tpu.pipeline_mode<synchronous>, transform_indices = @transform_5, window_bounds = array<i64: 16, 144>}, {pipeline_mode = #tpu.pipeline_mode<synchronous>, transform_indices = @transform_6, window_bounds = array<i64: 16, 144>}, {pipeline_mode = #tpu.pipeline_mode<synchronous>, transform_indices = @transform_7, window_bounds = array<i64: 16, 144>}, {pipeline_mode = #tpu.pipeline_mode<synchronous>, transform_indices = @transform_8, window_bounds = array<i64: 16, 1>}, {transform_indices = @transform_9, window_bounds = array<i64: 16, 512>}]} {
    %c0 = arith.constant 0 : index
    %c0_0 = arith.constant 0 : index
    %0 = vector.load %arg1[%c0, %c0_0] : memref<144x512xbf16, #tpu.memory_space<vmem>>, vector<144x512xbf16>
    %cst = arith.constant 0.000000e+00 : bf16
    %1 = vector.broadcast %cst : bf16 to vector<144x512xbf16>
    %2 = arith.maximumf %0, %1 : vector<144x512xbf16>
    %c0_1 = arith.constant 0 : index
    %c0_2 = arith.constant 0 : index
    %3 = vector.load %arg5[%c0_1, %c0_2] : memref<16x144xbf16, #tpu.memory_space<vmem>>, vector<16x144xbf16>
    %cst_3 = arith.constant dense<0.000000e+00> : vector<16x512xf32>
    %4 = tpu.matmul %3, %2, %cst_3 {dimension_numbers = #tpu.dot_dimension_numbers<[1], [0], [0], [1], [0, 0, 1, 1], [], []>} : vector<16x144xbf16>, vector<144x512xbf16>, vector<16x512xf32> -> vector<16x512xf32>
    %c0_4 = arith.constant 0 : index
    %c0_5 = arith.constant 0 : index
    %5 = vector.load %arg2[%c0_4, %c0_5] : memref<144x512xbf16, #tpu.memory_space<vmem>>, vector<144x512xbf16>
    %cst_6 = arith.constant 0.000000e+00 : bf16
    %6 = vector.broadcast %cst_6 : bf16 to vector<144x512xbf16>
    %7 = arith.maximumf %5, %6 : vector<144x512xbf16>
    %c0_7 = arith.constant 0 : index
    %c0_8 = arith.constant 0 : index
    %8 = vector.load %arg6[%c0_7, %c0_8] : memref<16x144xbf16, #tpu.memory_space<vmem>>, vector<16x144xbf16>
    %cst_9 = arith.constant dense<0.000000e+00> : vector<16x512xf32>
    %9 = tpu.matmul %8, %7, %cst_9 {dimension_numbers = #tpu.dot_dimension_numbers<[1], [0], [0], [1], [0, 0, 1, 1], [], []>} : vector<16x144xbf16>, vector<144x512xbf16>, vector<16x512xf32> -> vector<16x512xf32>
    %10 = arith.addf %4, %9 : vector<16x512xf32>
    %c0_10 = arith.constant 0 : index
    %c0_11 = arith.constant 0 : index
    %11 = vector.load %arg3[%c0_10, %c0_11] : memref<144x512xbf16, #tpu.memory_space<vmem>>, vector<144x512xbf16>
    %cst_12 = arith.constant 0.000000e+00 : bf16
    %12 = vector.broadcast %cst_12 : bf16 to vector<144x512xbf16>
    %13 = arith.maximumf %11, %12 : vector<144x512xbf16>
    %c0_13 = arith.constant 0 : index
    %c0_14 = arith.constant 0 : index
    %14 = vector.load %arg7[%c0_13, %c0_14] : memref<16x144xbf16, #tpu.memory_space<vmem>>, vector<16x144xbf16>
    %cst_15 = arith.constant dense<0.000000e+00> : vector<16x512xf32>
    %15 = tpu.matmul %14, %13, %cst_15 {dimension_numbers = #tpu.dot_dimension_numbers<[1], [0], [0], [1], [0, 0, 1, 1], [], []>} : vector<16x144xbf16>, vector<144x512xbf16>, vector<16x512xf32> -> vector<16x512xf32>
    %16 = arith.addf %10, %15 : vector<16x512xf32>
    %c0_16 = arith.constant 0 : index
    %c0_17 = arith.constant 0 : index
    %17 = vector.load %arg4[%c0_16, %c0_17] : memref<144x512xbf16, #tpu.memory_space<vmem>>, vector<144x512xbf16>
    %cst_18 = arith.constant 0.000000e+00 : bf16
    %18 = vector.broadcast %cst_18 : bf16 to vector<144x512xbf16>
    %19 = arith.maximumf %17, %18 : vector<144x512xbf16>
    %c0_19 = arith.constant 0 : index
    %c0_20 = arith.constant 0 : index
    %20 = vector.load %arg8[%c0_19, %c0_20] : memref<16x144xbf16, #tpu.memory_space<vmem>>, vector<16x144xbf16>
    %cst_21 = arith.constant dense<0.000000e+00> : vector<16x512xf32>
    %21 = tpu.matmul %20, %19, %cst_21 {dimension_numbers = #tpu.dot_dimension_numbers<[1], [0], [0], [1], [0, 0, 1, 1], [], []>} : vector<16x144xbf16>, vector<144x512xbf16>, vector<16x512xf32> -> vector<16x512xf32>
    %22 = arith.addf %16, %21 : vector<16x512xf32>
    %c0_22 = arith.constant 0 : index
    %c0_23 = arith.constant 0 : index
    %23 = vector.load %arg9[%c0_22, %c0_23] : memref<16x1xf32, #tpu.memory_space<vmem>>, vector<16x1xf32>
    %24 = vector.broadcast %23 : vector<16x1xf32> to vector<16x512xf32>
    %25 = arith.addf %22, %24 : vector<16x512xf32>
    %26 = arith.truncf %25 : vector<16x512xf32> to vector<16x512xbf16>
    %c0_24 = arith.constant 0 : index
    %c0_25 = arith.constant 0 : index
    %27 = vector.load %arg10[%c0_24, %c0_25] : memref<16x512xbf16, #tpu.memory_space<vmem>>, vector<16x512xbf16>
    tpu.vector_store %arg10[%c0_24, %c0_25], %26 {strides = array<i32>} : memref<16x512xbf16, #tpu.memory_space<vmem>>, vector<16x512xbf16>,
    return
  }
  func.func @transform_0(%arg0: i32) -> (i32, i32) {
    %c0_i32 = arith.constant 0 : i32
    %c0_i32_0 = arith.constant 0 : i32
    return %c0_i32, %arg0 : i32, i32
  }
  func.func @transform_1(%arg0: i32) -> (i32, i32) {
    %c0_i32 = arith.constant 0 : i32
    %c0_i32_0 = arith.constant 0 : i32
    return %c0_i32, %arg0 : i32, i32
  }
  func.func @transform_2(%arg0: i32) -> (i32, i32) {
    %c0_i32 = arith.constant 0 : i32
    %c0_i32_0 = arith.constant 0 : i32
    return %c0_i32, %arg0 : i32, i32
  }
  func.func @transform_3(%arg0: i32) -> (i32, i32) {
    %c0_i32 = arith.constant 0 : i32
    %c0_i32_0 = arith.constant 0 : i32
    return %c0_i32, %arg0 : i32, i32
  }
  func.func @transform_4(%arg0: i32) -> (i32, i32) {
    %c0_i32 = arith.constant 0 : i32
    %c0_i32_0 = arith.constant 0 : i32
    %c0_i32_1 = arith.constant 0 : i32
    return %c0_i32, %c0_i32_0 : i32, i32
  }
  func.func @transform_5(%arg0: i32) -> (i32, i32) {
    %c0_i32 = arith.constant 0 : i32
    %c0_i32_0 = arith.constant 0 : i32
    %c0_i32_1 = arith.constant 0 : i32
    return %c0_i32, %c0_i32_0 : i32, i32
  }
  func.func @transform_6(%arg0: i32) -> (i32, i32) {
    %c0_i32 = arith.constant 0 : i32
    %c0_i32_0 = arith.constant 0 : i32
    %c0_i32_1 = arith.constant 0 : i32
    return %c0_i32, %c0_i32_0 : i32, i32
  }
  func.func @transform_7(%arg0: i32) -> (i32, i32) {
    %c0_i32 = arith.constant 0 : i32
    %c0_i32_0 = arith.constant 0 : i32
    %c0_i32_1 = arith.constant 0 : i32
    return %c0_i32, %c0_i32_0 : i32, i32
  }
  func.func @transform_8(%arg0: i32) -> (i32, i32) {
    %c0_i32 = arith.constant 0 : i32
    %c0_i32_0 = arith.constant 0 : i32
    %c0_i32_1 = arith.constant 0 : i32
    return %c0_i32, %c0_i32_0 : i32, i32
  }
  func.func @transform_9(%arg0: i32) -> (i32, i32) {
    %c0_i32 = arith.constant 0 : i32
    %c0_i32_0 = arith.constant 0 : i32
    return %c0_i32, %arg0 : i32, i32
  }
}

module attributes {stable_mosaic.version = 11 : i64} {
  func.func @_gemm_kernel(%arg0: i32, %arg1: memref<144x512xbf16, #tpu.memory_space<vmem>>, %arg2: memref<3x144xbf16, #tpu.memory_space<vmem>>, %arg3: memref<3x1xf32, #tpu.memory_space<vmem>>, %arg4: memref<3x512xf32, #tpu.memory_space<vmem>>, %arg5: memref<3x512xf32, #tpu.memory_space<vmem>>) attributes {dimension_semantics = [#tpu.dimension_semantics<parallel>], iteration_bounds = array<i64: 1>, scalar_prefetch = 0 : i64, scratch_operands = 0 : i64, tpu.core_type = #tpu.core_type<tc>, window_params = [{transform_indices = @transform_0, window_bounds = array<i64: 144, 512>}, {pipeline_mode = #tpu.pipeline_mode<synchronous>, transform_indices = @transform_1, window_bounds = array<i64: 3, 144>}, {pipeline_mode = #tpu.pipeline_mode<synchronous>, transform_indices = @transform_2, window_bounds = array<i64: 3, 1>}, {transform_indices = @transform_3, window_bounds = array<i64: 3, 512>}, {transform_indices = @transform_4, window_bounds = array<i64: 3, 512>}]} {
    %c0 = arith.constant 0 : index
    %c0_0 = arith.constant 0 : index
    %0 = vector.load %arg1[%c0, %c0_0] : memref<144x512xbf16, #tpu.memory_space<vmem>>, vector<144x512xbf16>
    %cst = arith.constant 0.000000e+00 : bf16
    %1 = vector.broadcast %cst : bf16 to vector<144x512xbf16>
    %2 = arith.maximumf %0, %1 : vector<144x512xbf16>
    %c0_1 = arith.constant 0 : index
    %c0_2 = arith.constant 0 : index
    %3 = vector.load %arg2[%c0_1, %c0_2] : memref<3x144xbf16, #tpu.memory_space<vmem>>, vector<3x144xbf16>
    %cst_3 = arith.constant dense<0.000000e+00> : vector<3x512xf32>
    %4 = tpu.matmul %3, %2, %cst_3 {dimension_numbers = #tpu.dot_dimension_numbers<[1], [0], [0], [1], [0, 0, 1, 1], [], []>} : vector<3x144xbf16>, vector<144x512xbf16>, vector<3x512xf32> -> vector<3x512xf32>
    %c0_4 = arith.constant 0 : index
    %c0_5 = arith.constant 0 : index
    %5 = vector.load %arg3[%c0_4, %c0_5] : memref<3x1xf32, #tpu.memory_space<vmem>>, vector<3x1xf32>
    %6 = vector.broadcast %5 : vector<3x1xf32> to vector<3x512xf32>
    %7 = arith.addf %4, %6 : vector<3x512xf32>
    %c0_6 = arith.constant 0 : index
    %c0_7 = arith.constant 0 : index
    %8 = vector.load %arg4[%c0_6, %c0_7] : memref<3x512xf32, #tpu.memory_space<vmem>>, vector<3x512xf32>
    %9 = arith.addf %7, %8 : vector<3x512xf32>
    %c0_8 = arith.constant 0 : index
    %c0_9 = arith.constant 0 : index
    %10 = vector.load %arg5[%c0_8, %c0_9] : memref<3x512xf32, #tpu.memory_space<vmem>>, vector<3x512xf32>
    tpu.vector_store %arg5[%c0_8, %c0_9], %9 {strides = array<i32>} : memref<3x512xf32, #tpu.memory_space<vmem>>, vector<3x512xf32>,
    return
  }
  func.func @transform_0(%arg0: i32) -> (i32, i32) {
    %c0_i32 = arith.constant 0 : i32
    %c0_i32_0 = arith.constant 0 : i32
    return %c0_i32, %arg0 : i32, i32
  }
  func.func @transform_1(%arg0: i32) -> (i32, i32) {
    %c0_i32 = arith.constant 0 : i32
    %c0_i32_0 = arith.constant 0 : i32
    %c0_i32_1 = arith.constant 0 : i32
    return %c0_i32, %c0_i32_0 : i32, i32
  }
  func.func @transform_2(%arg0: i32) -> (i32, i32) {
    %c0_i32 = arith.constant 0 : i32
    %c0_i32_0 = arith.constant 0 : i32
    %c0_i32_1 = arith.constant 0 : i32
    return %c0_i32, %c0_i32_0 : i32, i32
  }
  func.func @transform_3(%arg0: i32) -> (i32, i32) {
    %c0_i32 = arith.constant 0 : i32
    %c0_i32_0 = arith.constant 0 : i32
    return %c0_i32, %arg0 : i32, i32
  }
  func.func @transform_4(%arg0: i32) -> (i32, i32) {
    %c0_i32 = arith.constant 0 : i32
    %c0_i32_0 = arith.constant 0 : i32
    return %c0_i32, %arg0 : i32, i32
  }
}

</mosaic_0001>

<bundles_post_ra>
// kernel: network_forward.32
= control target key start
LH: loop header
LB: loop body
LE: loop exit
PB: predicated region body
PF: predicated region fallthrough
CT: control target
= control target key end

     0   :  { %vm82_vm0 = vcmask 1044480   ;;  %vm83_vm1 = vcmask 1045504   ;;  %v251_v1 = vmov 65535   ;;  %v252_v3 = vmov 0   ;;  %s318_s0 = inlined_call_operand.vmem [shape: bf16[27,512], index: 0, kind: input, shape index: {}]   ;;  %s319_s2 = inlined_call_operand.vmem [shape: f32[16,1], index: 2, kind: input, shape index: {}]   ;;  %s320_s1 = inlined_call_operand.vmem [shape: bf16[16,27], index: 1, kind: input, shape index: {}]   ;;  %s321_s3 = inlined_call_operand.vmem [shape: bf16[16,512], index: 3, kind: output, shape index: {}]  }
   0x1   :  { %v238_v0 = vld [vmem:[%s318_s0 + $0x4] ss:$16 sps:$4 sm:$0xff]   ;;  %v84_v2 = vsel %vm82_vm0, 4294967295, %v251_v1  ;;  %130 = vmatprep.mubr.bf16.mxu0 %v252_v3  ;;  %173 = vmatprep.mubr.bf16.mxu1 %v252_v3  ;;  %v240_v4 = vld [vmem:[%s318_s0 + $0xc] ss:$16 sps:$4 sm:$0xff]   ;;  %vm78_vm2 = vcmask 220160  }
   0x2   :  { %237 = vset.pattern.permute.xlu0 %v252_v3  ;;  %98 = vmatprep.subr.bf16.mxu0 %v238_v0  ;;  %v242_v5 = vld [vmem:[%s318_s0] ss:$16 sps:$4 sm:$0xff]   ;;  %v243_v6 = vld [vmem:[%s318_s0 + $0x8] ss:$16 sps:$4 sm:$0xff]   ;;  %v85_v7 = vsel %vm83_vm1, %v84_v2, 0 }
   0x3   :  { %141 = vmatprep.subr.bf16.mxu1 %v240_v4  ;;  %v244_v8 = vld [vmem:[%s318_s0 + $0x24] ss:$16 sps:$4 sm:$0x3f]   ;;  %99 = vmatpush1.bf16.msra.mxu0 %v242_v5  ;;  %v246_v9 = vld [vmem:[%s318_s0 + $0x2c] ss:$16 sps:$4 sm:$0x3f]  }
   0x4   :  { %142 = vmatpush1.bf16.msra.mxu1 %v243_v6  ;;  %v90_v10 = vand.u32 %v244_v8, %v85_v7  ;;  %v248_v11 = vld [vmem:[%s318_s0 + $0x20] ss:$16 sps:$4 sm:$0x3f]   ;;  %v249_v12 = vld [vmem:[%s318_s0 + $0x28] ss:$16 sps:$4 sm:$0x3f]   ;;  %v96_v13 = vand.u32 %v246_v9, %v85_v7 }
   0x5   :  { %v25_v14 = vld [vmem:[%s319_s2] sm:$0xff]  ;;  %v87_v15 = vand.u32 %v248_v11, %v85_v7  ;;  %v93_v16 = vand.u32 %v249_v12, %v85_v7  ;;  %v26_v18 = vld [vmem:[%s319_s2 + $0x8] sm:$0xff] }
   0x6   :  { %100 = vmatprep.subr.bf16.mxu0 %v90_v10  ;;  %29 = vperm.xlu0 %237, %v25_v14   ;;  %v250_v17 = vld [vmem:[%s320_s1] sm:$0xff]  }
   0x7   :  { %143 = vmatprep.subr.bf16.mxu1 %v96_v13  ;;  %101 = vmatpush1.bf16.msra.mxu0 %v87_v15 }
   0x8   :  { %144 = vmatpush1.bf16.msra.mxu1 %v93_v16 }
   0xa   :  { %34 = vperm.xlu0 %237, %v26_v18   ;;  %225 = vmatmul.mubr.msk.bf16.vlgmr.msra.gmra.mrb[0].mxu0 %vm78_vm2, %v250_v17 }
   0xb   :  { %226 = vmatmul.mubr.msk.bf16.vlgmr.msra.gmra.mrb[0].mxu1 %vm78_vm2, %v250_v17 }
  0x85   :  { %v30_v19 = vpop.permute.xlu0 %29 }
  0x89   :  { %v35_v20 = vpop.permute.xlu0 %34 }
  0xdd   :  { %v132_v21 = vpop.f32.mrb[0].mxu0 }
  0xde   :  { %v175_v22 = vpop.f32.mrb[0].mxu1  ;;  %v133_v23 = vadd.f32 %v132_v21, %v30_v19  ;;  %v134_v25 = vpop.f32.mrb[1].mxu0 }
  0xdf   :  { %v176_v24 = vadd.f32 %v175_v22, %v30_v19  ;;  %v177_v26 = vpop.f32.mrb[1].mxu1  ;;  %v135_v27 = vadd.f32 %v134_v25, %v30_v19  ;;  %v136_v29 = vpop.f32.mrb[2].mxu0 }
  0xe0   :  { %v178_v28 = vadd.f32 %v177_v26, %v30_v19  ;;  %v179_v30 = vpop.f32.mrb[2].mxu1  ;;  %v137_v31 = vadd.f32 %v136_v29, %v35_v20  ;;  %v138_v33 = vpop.f32.mrb[3].mxu0 }
  0xe1   :  { %v180_v32 = vadd.f32 %v179_v30, %v35_v20  ;;  %v181_v34 = vpop.f32.mrb[3].mxu1  ;;  %v231_v35 = vpack.c.bf16 %v135_v27, %v133_v23  ;;  %v139_v37 = vadd.f32 %v138_v33, %v35_v20 }
  0xe2   :  { %v232_v36 = vpack.c.bf16 %v178_v28, %v176_v24  ;;  %v182_v38 = vadd.f32 %v181_v34, %v35_v20 }
  0xe3   :  { %208 = vst [vmem:[%s321_s3] sm:$0xff] %v231_v35  ;;  %v233_v39 = vpack.c.bf16 %v139_v37, %v137_v31 }
  0xe4   :  { %209 = vst [vmem:[%s321_s3 + $0x8] sm:$0xff] %v232_v36  ;;  %v234_v40 = vpack.c.bf16 %v182_v38, %v180_v32 }
  0xe5   :  { %210 = vst [vmem:[%s321_s3 + $0x10] sm:$0xff] %v233_v39 }
  0xe6   :  { %211 = vst [vmem:[%s321_s3 + $0x18] sm:$0xff] %v234_v40 }

// kernel: network_forward.33
= control target key start
LH: loop header
LB: loop body
LE: loop exit
PB: predicated region body
PF: predicated region fallthrough
CT: control target
= control target key end

     0   :  { %v465_v3 = vmov 0   ;;  %vm290_vm0 = vcmask 130048   ;;  %s657_s0 = inlined_call_operand.vmem [shape: bf16[144,512], index: 0, kind: input, shape index: {}]   ;;  %s658_s1 = inlined_call_operand.vmem [shape: bf16[16,144], index: 1, kind: input, shape index: {}]   ;;  %s659_s2 = inlined_call_operand.vmem [shape: f32[16,1], index: 2, kind: input, shape index: {}]   ;;  %s660_s3 = inlined_call_operand.vmem [shape: bf16[16,512], index: 3, kind: output, shape index: {}]  }
   0x1   :  { %v15_v0 = vld [vmem:[%s657_s0] sm:$0xff]  ;;  %v17_v1 = vld [vmem:[%s657_s0 + $0x10] sm:$0xff]  ;;  %v16_v2 = vld [vmem:[%s657_s0 + $0x8] sm:$0xff]  ;;  %461 = vset.pattern.permute.xlu0 %v465_v3 }
   0x2   :  { %v51_v4 = vmax.bf16 %v465_v3, %v15_v0  ;;  %v53_v5 = vmax.bf16 %v465_v3, %v17_v1  ;;  %v18_v6 = vld [vmem:[%s657_s0 + $0x18] sm:$0xff]  ;;  %v52_v7 = vmax.bf16 %v465_v3, %v16_v2  ;;  %v19_v8 = vld [vmem:[%s657_s0 + $0x20] sm:$0xff]  ;;  %v21_v9 = vld [vmem:[%s657_s0 + $0x30] sm:$0xff] }
   0x3   :  { %v54_v10 = vmax.bf16 %v465_v3, %v18_v6  ;;  %v55_v11 = vmax.bf16 %v465_v3, %v19_v8  ;;  %v57_v12 = vmax.bf16 %v465_v3, %v21_v9  ;;  %v20_v13 = vld [vmem:[%s657_s0 + $0x28] sm:$0xff]  ;;  %v22_v14 = vld [vmem:[%s657_s0 + $0x38] sm:$0xff]  ;;  %v23_v15 = vld [vmem:[%s657_s0 + $0x40] sm:$0xff] }
   0x4   :  { %v415_v16 = vcombine.high %v51_v4, %v53_v5  ;;  %v414_v17 = vcombine.low %v51_v4, %v53_v5  ;;  %v56_v18 = vmax.bf16 %v465_v3, %v20_v13  ;;  %v58_v19 = vmax.bf16 %v465_v3, %v22_v14  ;;  %v25_v20 = vld [vmem:[%s657_s0 + $0x50] sm:$0xff]  ;;  %v24_v21 = vld [vmem:[%s657_s0 + $0x48] sm:$0xff]  ;;  %v26_v22 = vld [vmem:[%s657_s0 + $0x58] sm:$0xff] }
   0x5   :  { %v417_v23 = vcombine.high %v52_v7, %v54_v10  ;;  %v416_v24 = vcombine.low %v52_v7, %v54_v10  ;;  %v419_v25 = vcombine.high %v55_v11, %v57_v12  ;;  %v27_v26 = vld [vmem:[%s657_s0 + $0x60] sm:$0xff]  ;;  %v29_v27 = vld [vmem:[%s657_s0 + $0x70] sm:$0xff]  ;;  %v418_v29 = vcombine.low %v55_v11, %v57_v12  ;;  %v28_v32 = vld [vmem:[%s657_s0 + $0x68] sm:$0xff] }
   0x6   :  { %294 = vmatprep.subr.bf16.mxu0 %v415_v16  ;;  %v421_v28 = vcombine.high %v56_v18, %v58_v19  ;;  %v59_v30 = vmax.bf16 %v465_v3, %v23_v15  ;;  %v61_v31 = vmax.bf16 %v465_v3, %v25_v20  ;;  %v30_v33 = vld [vmem:[%s657_s0 + $0x78] sm:$0xff]  ;;  %v420_v34 = vcombine.low %v56_v18, %v58_v19  ;;  %v31_v43 = vld [vmem:[%s657_s0 + $0x80] sm:$0xff]  ;;  %v33_v44 = vld [vmem:[%s657_s0 + $0x90] sm:$0xff] }
   0x7   :  { %337 = vmatprep.subr.bf16.mxu1 %v417_v23  ;;  %295 = vmatpush1.bf16.msra.mxu0 %v414_v17  ;;  %v60_v35 = vmax.bf16 %v465_v3, %v24_v21  ;;  %v62_v36 = vmax.bf16 %v465_v3, %v26_v22  ;;  %v63_v38 = vmax.bf16 %v465_v3, %v27_v26  ;;  %v32_v45 = vld [vmem:[%s657_s0 + $0x88] sm:$0xff]  ;;  %v34_v46 = vld [vmem:[%s657_s0 + $0x98] sm:$0xff]  ;;  %v35_v52 = vld [vmem:[%s657_s0 + $0xa0] sm:$0xff] }
   0x8   :  { %338 = vmatpush1.bf16.msra.mxu1 %v416_v24  ;;  %296 = vmatprep.subr.bf16.mxu0 %v419_v25  ;;  %v423_v37 = vcombine.high %v59_v30, %v61_v31  ;;  %v65_v39 = vmax.bf16 %v465_v3, %v29_v27  ;;  %v64_v41 = vmax.bf16 %v465_v3, %v28_v32  ;;  %v37_v56 = vld [vmem:[%s657_s0 + $0xb0] sm:$0xff]  ;;  %v36_v57 = vld [vmem:[%s657_s0 + $0xa8] sm:$0xff]  ;;  %v38_v58 = vld [vmem:[%s657_s0 + $0xb8] sm:$0xff] }
   0x9   :  { %339 = vmatprep.subr.bf16.mxu1 %v421_v28  ;;  %v425_v40 = vcombine.high %v60_v35, %v62_v36  ;;  %v66_v42 = vmax.bf16 %v465_v3, %v30_v33  ;;  %v422_v47 = vcombine.low %v59_v30, %v61_v31  ;;  %v424_v48 = vcombine.low %v60_v35, %v62_v36  ;;  %v464_v59 = vld [vmem:[%s658_s1 + $0x4] ss:$8 sps:$4 sm:$0xff]   ;;  %v41_v6 = vld [vmem:[%s657_s0 + $0xd0] sm:$0xff]  ;;  %v42_v8 = vld [vmem:[%s657_s0 + $0xd8] sm:$0xff] }
   0xa   :  { %v427_v49 = vcombine.high %v63_v38, %v65_v39  ;;  %v67_v50 = vmax.bf16 %v465_v3, %v31_v43  ;;  %v69_v51 = vmax.bf16 %v465_v3, %v33_v44  ;;  %v68_v54 = vmax.bf16 %v465_v3, %v32_v45  ;;  %v39_v5 = vld [vmem:[%s657_s0 + $0xc0] sm:$0xff]  ;;  %v40_v7 = vld [vmem:[%s657_s0 + $0xc8] sm:$0xff]  ;;  %450 = vmatprep.mubr.msk.bf16.mxu0 %vm290_vm0, %v464_v59  ;;  %v45_v19 = vld [vmem:[%s657_s0 + $0xf0] sm:$0xff] }
   0xb   :  { %297 = vmatpush1.bf16.msra.mxu0 %v418_v29  ;;  %v429_v53 = vcombine.high %v64_v41, %v66_v42  ;;  %v70_v55 = vmax.bf16 %v465_v3, %v34_v46  ;;  %v426_v60 = vcombine.low %v63_v38, %v65_v39  ;;  %v428_v61 = vcombine.low %v64_v41, %v66_v42  ;;  %v89_v11 = vld [vmem:[%s659_s2] sm:$0xff]  ;;  %v44_v20 = vld [vmem:[%s657_s0 + $0xe8] sm:$0xff]  ;;  %v46_v21 = vld [vmem:[%s657_s0 + $0xf8] sm:$0xff] }
   0xc   :  { %340 = vmatpush1.bf16.msra.mxu1 %v420_v34  ;;  %298 = vmatprep.subr.bf16.mxu0 %v423_v37  ;;  %v431_v62 = vcombine.high %v67_v50, %v69_v51  ;;  %v71_v63 = vmax.bf16 %v465_v3, %v35_v52  ;;  %v73_v0 = vmax.bf16 %v465_v3, %v37_v56  ;;  %v43_v15 = vld [vmem:[%s657_s0 + $0xe0] sm:$0xff]  ;;  %v90_v24 = vld [vmem:[%s659_s2 + $0x8] sm:$0xff]  ;;  %v49_v32 = vld [vmem:[%s657_s0 + $0x110] sm:$0xff] }
   0xd   :  { %341 = vmatprep.subr.bf16.mxu1 %v425_v40  ;;  %v433_v1 = vcombine.high %v68_v54, %v70_v55  ;;  %v72_v2 = vmax.bf16 %v465_v3, %v36_v57  ;;  %v74_v4 = vmax.bf16 %v465_v3, %v38_v58  ;;  %v430_v9 = vcombine.low %v67_v50, %v69_v51  ;;  %v47_v31 = vld [vmem:[%s657_s0 + $0x100] sm:$0xff]  ;;  %v48_v33 = vld [vmem:[%s657_s0 + $0x108] sm:$0xff]  ;;  %v50_v34 = vld [vmem:[%s657_s0 + $0x118] sm:$0xff] }
   0xe   :  { %v432_v10 = vcombine.low %v68_v54, %v70_v55  ;;  %v435_v12 = vcombine.high %v71_v63, %v73_v0  ;;  %v75_v13 = vmax.bf16 %v465_v3, %v39_v5  ;;  %v77_v14 = vmax.bf16 %v465_v3, %v41_v6  ;;  %451 = vmatprep.mubr.msk.bf16.mxu1 %vm290_vm0, %v464_v59 }
   0xf   :  { %299 = vmatpush1.bf16.msra.mxu0 %v422_v47  ;;  %v437_v16 = vcombine.high %v72_v2, %v74_v4  ;;  %v76_v17 = vmax.bf16 %v465_v3, %v40_v7  ;;  %v78_v18 = vmax.bf16 %v465_v3, %v42_v8  ;;  %93 = vperm.xlu0 %461, %v89_v11  }
  0x10   :  { %342 = vmatpush1.bf16.msra.mxu1 %v424_v48  ;;  %300 = vmatprep.subr.bf16.mxu0 %v427_v49  ;;  %v434_v22 = vcombine.low %v71_v63, %v73_v0  ;;  %v79_v23 = vmax.bf16 %v465_v3, %v43_v15  ;;  %v436_v25 = vcombine.low %v72_v2, %v74_v4  ;;  %v462_v49 = vld [vmem:[%s658_s1] ss:$8 sps:$4 sm:$0xff]  }
  0x11   :  { %343 = vmatprep.subr.bf16.mxu1 %v429_v53  ;;  %v439_v26 = vcombine.high %v75_v13, %v77_v14  ;;  %v81_v27 = vmax.bf16 %v465_v3, %v45_v19  ;;  %v441_v28 = vcombine.high %v76_v17, %v78_v18  ;;  %v80_v29 = vmax.bf16 %v465_v3, %v44_v20 }
  0x12   :  { %v82_v30 = vmax.bf16 %v465_v3, %v46_v21  ;;  %v438_v35 = vcombine.low %v75_v13, %v77_v14  ;;  %v440_v36 = vcombine.low %v76_v17, %v78_v18  ;;  %v83_v38 = vmax.bf16 %v465_v3, %v47_v31 }
  0x13   :  { %301 = vmatpush1.bf16.msra.mxu0 %v426_v60  ;;  %98 = vperm.xlu0 %461, %v90_v24   ;;  %v443_v37 = vcombine.high %v79_v23, %v81_v27  ;;  %v85_v39 = vmax.bf16 %v465_v3, %v49_v32  ;;  %v84_v41 = vmax.bf16 %v465_v3, %v48_v33 }
  0x14   :  { %344 = vmatpush1.bf16.msra.mxu1 %v428_v61  ;;  %302 = vmatprep.subr.bf16.mxu0 %v431_v62  ;;  %v445_v40 = vcombine.high %v80_v29, %v82_v30  ;;  %v86_v42 = vmax.bf16 %v465_v3, %v50_v34  ;;  %v442_v43 = vcombine.low %v79_v23, %v81_v27 }
  0x15   :  { %345 = vmatprep.subr.bf16.mxu1 %v433_v1  ;;  %v444_v44 = vcombine.low %v80_v29, %v82_v30  ;;  %v447_v45 = vcombine.high %v83_v38, %v85_v39  ;;  %v446_v47 = vcombine.low %v83_v38, %v85_v39 }
  0x16   :  { %v449_v46 = vcombine.high %v84_v41, %v86_v42  ;;  %v448_v48 = vcombine.low %v84_v41, %v86_v42 }
  0x17   :  { %303 = vmatpush1.bf16.msra.mxu0 %v430_v9 }
  0x18   :  { %346 = vmatpush1.bf16.msra.mxu1 %v432_v10  ;;  %304 = vmatprep.subr.bf16.mxu0 %v435_v12 }
  0x19   :  { %347 = vmatprep.subr.bf16.mxu1 %v437_v16 }
  0x1b   :  { %305 = vmatpush1.bf16.msra.mxu0 %v434_v22 }
  0x1c   :  { %348 = vmatpush1.bf16.msra.mxu1 %v436_v25  ;;  %306 = vmatprep.subr.bf16.mxu0 %v439_v26 }
  0x1d   :  { %349 = vmatprep.subr.bf16.mxu1 %v441_v28 }
  0x1f   :  { %307 = vmatpush1.bf16.msra.mxu0 %v438_v35 }
  0x20   :  { %350 = vmatpush1.bf16.msra.mxu1 %v440_v36  ;;  %308 = vmatprep.subr.bf16.mxu0 %v443_v37 }
  0x21   :  { %351 = vmatprep.subr.bf16.mxu1 %v445_v40 }
  0x23   :  { %309 = vmatpush1.bf16.msra.mxu0 %v442_v43 }
  0x24   :  { %352 = vmatpush1.bf16.msra.mxu1 %v444_v44  ;;  %310 = vmatprep.subr.bf16.mxu0 %v447_v45 }
  0x25   :  { %353 = vmatprep.subr.bf16.mxu1 %v449_v46 }
  0x27   :  { %311 = vmatpush1.bf16.msra.mxu0 %v446_v47 }
  0x28   :  { %354 = vmatpush1.bf16.msra.mxu1 %v448_v48 }
  0x2a   :  { %327 = vmatmul.mubr.bf16.vlgmr.msra.gmra.mrb[0].mxu0 %v462_v49 }
  0x2b   :  { %370 = vmatmul.mubr.bf16.vlgmr.msra.gmra.mrb[0].mxu1 %v462_v49 }
  0x8e   :  { %v94_v3 = vpop.permute.xlu0 %93 }
  0x92   :  { %v99_v50 = vpop.permute.xlu0 %98 }
  0xfd   :  { %v328_v51 = vpop.f32.mrb[0].mxu0 }
  0xfe   :  { %v329_v52 = vadd.f32 %v328_v51, %v94_v3  ;;  %v371_v53 = vpop.f32.mrb[0].mxu1  ;;  %v330_v54 = vpop.f32.mrb[1].mxu0 }
  0xff   :  { %v372_v55 = vadd.f32 %v371_v53, %v94_v3  ;;  %v331_v56 = vadd.f32 %v330_v54, %v94_v3  ;;  %v373_v57 = vpop.f32.mrb[1].mxu1  ;;  %v332_v58 = vpop.f32.mrb[2].mxu0 }
 0x100   :  { %v374_v59 = vadd.f32 %v373_v57, %v94_v3  ;;  %v333_v60 = vadd.f32 %v332_v58, %v99_v50  ;;  %v375_v61 = vpop.f32.mrb[2].mxu1  ;;  %v334_v62 = vpop.f32.mrb[3].mxu0 }
 0x101   :  { %v456_v63 = vpack.c.bf16 %v331_v56, %v329_v52  ;;  %v376_v0 = vadd.f32 %v375_v61, %v99_v50  ;;  %v335_v1 = vadd.f32 %v334_v62, %v99_v50  ;;  %v377_v2 = vpop.f32.mrb[3].mxu1 }
 0x102   :  { %v457_v4 = vpack.c.bf16 %v374_v59, %v372_v55  ;;  %v378_v5 = vadd.f32 %v377_v2, %v99_v50 }
 0x103   :  { %404 = vst [vmem:[%s660_s3] sm:$0xff] %v456_v63  ;;  %v458_v6 = vpack.c.bf16 %v335_v1, %v333_v60 }
 0x104   :  { %405 = vst [vmem:[%s660_s3 + $0x8] sm:$0xff] %v457_v4  ;;  %v459_v7 = vpack.c.bf16 %v378_v5, %v376_v0 }
 0x105   :  { %406 = vst [vmem:[%s660_s3 + $0x10] sm:$0xff] %v458_v6 }
 0x106   :  { %407 = vst [vmem:[%s660_s3 + $0x18] sm:$0xff] %v459_v7 }

// kernel: network_forward.35
= control target key start
LH: loop header
LB: loop body
LE: loop exit
PB: predicated region body
PF: predicated region fallthrough
CT: control target
= control target key end

     0   :  { %v213_v0 = vmov 0   ;;  %vm128_vm0 = vcmask 130048   ;;  %s331_s0 = inlined_call_operand.vmem [shape: bf16[144,128], index: 0, kind: input, shape index: {}]   ;;  %s332_s1 = inlined_call_operand.vmem [shape: bf16[16,144], index: 1, kind: input, shape index: {}]   ;;  %s333_s2 = inlined_call_operand.vmem [shape: f32[16,1], index: 2, kind: input, shape index: {}]   ;;  %s334_s3 = inlined_call_operand.vmem [shape: bf16[16,128], index: 3, kind: output, shape index: {}]  }
   0x1   :  { %132 = vmatprep.subr.bf16.mxu0 %v213_v0  ;;  %v15_v1 = vld [vmem:[%s331_s0] sm:$0xf]  ;;  %v16_v2 = vld [vmem:[%s331_s0 + $0x4] sm:$0xf]  ;;  %v17_v3 = vld [vmem:[%s331_s0 + $0x8] sm:$0xf]  ;;  %209 = vset.pattern.permute.xlu0 %v213_v0 }
   0x2   :  { %v33_v4 = vmax.bf16 %v213_v0, %v15_v1  ;;  %v34_v5 = vmax.bf16 %v213_v0, %v16_v2  ;;  %v18_v6 = vld [vmem:[%s331_s0 + $0xc] sm:$0xf]  ;;  %v35_v7 = vmax.bf16 %v213_v0, %v17_v3  ;;  %v19_v9 = vld [vmem:[%s331_s0 + $0x10] sm:$0xf]  ;;  %v20_v10 = vld [vmem:[%s331_s0 + $0x14] sm:$0xf] }
   0x3   :  { %v36_v8 = vmax.bf16 %v213_v0, %v18_v6  ;;  %v37_v13 = vmax.bf16 %v213_v0, %v19_v9  ;;  %v38_v14 = vmax.bf16 %v213_v0, %v20_v10  ;;  %v21_v15 = vld [vmem:[%s331_s0 + $0x18] sm:$0xf]  ;;  %v22_v16 = vld [vmem:[%s331_s0 + $0x1c] sm:$0xf]  ;;  %v212_v17 = vld [vmem:[%s332_s1 + $0x4] ss:$8 sps:$4 sm:$0xff]  }
   0x4   :  { %v189_v11 = vcombine.low %v33_v4, %v34_v5  ;;  %v53_v18 = vld [vmem:[%s333_s2] sm:$0xff]  ;;  %v39_v20 = vmax.bf16 %v213_v0, %v21_v15  ;;  %v40_v21 = vmax.bf16 %v213_v0, %v22_v16  ;;  %198 = vmatprep.mubr.msk.bf16.mxu0 %vm128_vm0, %v212_v17  ;;  %v54_v22 = vld [vmem:[%s333_s2 + $0x8] sm:$0xff]  ;;  %v27_v33 = vld [vmem:[%s331_s0 + $0x30] sm:$0xf] }
   0x5   :  { %v190_v12 = vcombine.low %v35_v7, %v36_v8  ;;  %57 = vperm.xlu0 %209, %v53_v18   ;;  %v191_v19 = vcombine.low %v37_v13, %v38_v14  ;;  %v23_v23 = vld [vmem:[%s331_s0 + $0x20] sm:$0xf]  ;;  %v24_v24 = vld [vmem:[%s331_s0 + $0x24] sm:$0xf]  ;;  %v25_v28 = vld [vmem:[%s331_s0 + $0x28] sm:$0xf]  ;;  %v45_v36 = vmax.bf16 %v213_v0, %v27_v33 }
   0x6   :  { %133 = vmatpush1.bf16.msra.mxu0 %v189_v11  ;;  %v192_v25 = vcombine.low %v39_v20, %v40_v21  ;;  %v41_v26 = vmax.bf16 %v213_v0, %v23_v23  ;;  %v42_v27 = vmax.bf16 %v213_v0, %v24_v24  ;;  %v26_v29 = vld [vmem:[%s331_s0 + $0x2c] sm:$0xf]  ;;  %v43_v31 = vmax.bf16 %v213_v0, %v25_v28  ;;  %v28_v34 = vld [vmem:[%s331_s0 + $0x34] sm:$0xf]  ;;  %v29_v38 = vld [vmem:[%s331_s0 + $0x38] sm:$0xf] }
   0x7   :  { %134 = vmatprep.subr.bf16.mxu0 %v213_v0  ;;  %v44_v32 = vmax.bf16 %v213_v0, %v26_v29  ;;  %v46_v37 = vmax.bf16 %v213_v0, %v28_v34  ;;  %v30_v39 = vld [vmem:[%s331_s0 + $0x3c] sm:$0xf]  ;;  %v47_v41 = vmax.bf16 %v213_v0, %v29_v38  ;;  %v31_v43 = vld [vmem:[%s331_s0 + $0x40] sm:$0xf]  ;;  %v32_v44 = vld [vmem:[%s331_s0 + $0x44] sm:$0xf] }
   0x8   :  { %v193_v30 = vcombine.low %v41_v26, %v42_v27  ;;  %v48_v42 = vmax.bf16 %v213_v0, %v30_v39  ;;  %v49_v46 = vmax.bf16 %v213_v0, %v31_v43  ;;  %v50_v47 = vmax.bf16 %v213_v0, %v32_v44  ;;  %v210_v49 = vld [vmem:[%s332_s1] ss:$8 sps:$4 sm:$0xff]  }
   0x9   :  { %62 = vperm.xlu0 %209, %v54_v22   ;;  %v194_v35 = vcombine.low %v43_v31, %v44_v32  ;;  %v195_v40 = vcombine.low %v45_v36, %v46_v37 }
   0xa   :  { %135 = vmatpush1.bf16.msra.mxu0 %v190_v12  ;;  %v196_v45 = vcombine.low %v47_v41, %v48_v42  ;;  %v197_v48 = vcombine.low %v49_v46, %v50_v47 }
   0xb   :  { %136 = vmatprep.subr.bf16.mxu0 %v213_v0 }
   0xe   :  { %137 = vmatpush1.bf16.msra.mxu0 %v191_v19 }
   0xf   :  { %138 = vmatprep.subr.bf16.mxu0 %v213_v0 }
  0x12   :  { %139 = vmatpush1.bf16.msra.mxu0 %v192_v25 }
  0x13   :  { %140 = vmatprep.subr.bf16.mxu0 %v213_v0 }
  0x16   :  { %141 = vmatpush1.bf16.msra.mxu0 %v193_v30 }
  0x17   :  { %142 = vmatprep.subr.bf16.mxu0 %v213_v0 }
  0x1a   :  { %143 = vmatpush1.bf16.msra.mxu0 %v194_v35 }
  0x1b   :  { %144 = vmatprep.subr.bf16.mxu0 %v213_v0 }
  0x1e   :  { %145 = vmatpush1.bf16.msra.mxu0 %v195_v40 }
  0x1f   :  { %146 = vmatprep.subr.bf16.mxu0 %v213_v0 }
  0x22   :  { %147 = vmatpush1.bf16.msra.mxu0 %v196_v45 }
  0x23   :  { %148 = vmatprep.subr.bf16.mxu0 %v213_v0 }
  0x26   :  { %149 = vmatpush1.bf16.msra.mxu0 %v197_v48 }
  0x29   :  { %165 = vmatmul.mubr.bf16.vlgmr.msra.gmra.mrb[0].mxu0 %v210_v49 }
  0x84   :  { %v58_v50 = vpop.permute.xlu0 %57 }
  0x88   :  { %v63_v53 = vpop.permute.xlu0 %62 }
  0xfc   :  { %v166_v51 = vpop.f32.mrb[0].mxu0 }
  0xfd   :  { %v168_v52 = vpop.f32.mrb[1].mxu0  ;;  %v167_v55 = vadd.f32 %v166_v51, %v58_v50 }
  0xfe   :  { %v169_v54 = vpop.f32.mrb[2].mxu0 }
  0xff   :  { %v170_v56 = vadd.f32 %v169_v54, %v63_v53  ;;  %v171_v57 = vpop.f32.mrb[3].mxu0 }
 0x101   :  { %v206_v58 = vpack.c.bf16 %v170_v56, %v167_v55 }
 0x103   :  { %207 = vst [vmem:[%s334_s3] sm:$0xff] %v206_v58  }

// kernel: network_forward.42
= control target key start
LH: loop header
LB: loop body
LE: loop exit
PB: predicated region body
PF: predicated region fallthrough
CT: control target
= control target key end

     0   :  { %v209_v0 = vmov 0   ;;  %vm128_vm0 = vcmask 130048   ;;  %vm181_vm1 = vcmask 257024   ;;  %s330_s0 = inlined_call_operand.vmem [shape: bf16[144,32], index: 0, kind: input, shape index: {}]   ;;  %s331_s1 = inlined_call_operand.vmem [shape: bf16[16,144], index: 1, kind: input, shape index: {}]   ;;  %s332_s2 = inlined_call_operand.vmem [shape: f32[16,1], index: 2, kind: input, shape index: {}]   ;;  %s333_s3 = inlined_call_operand.vmem [shape: bf16[16,32], index: 3, kind: output, shape index: {}]  }
   0x1   :  { %132 = vmatprep.subr.bf16.mxu0 %v209_v0  ;;  %v15_v1 = vld [vmem:[%s330_s0] sm:$0xf]  ;;  %v16_v2 = vld [vmem:[%s330_s0 + $0x4] sm:$0xf]  ;;  %v17_v3 = vld [vmem:[%s330_s0 + $0x8] sm:$0xf]  ;;  %205 = vset.pattern.permute.xlu0 %v209_v0 }
   0x2   :  { %v33_v4 = vmax.bf16 %v209_v0, %v15_v1  ;;  %v34_v5 = vmax.bf16 %v209_v0, %v16_v2  ;;  %v18_v6 = vld [vmem:[%s330_s0 + $0xc] sm:$0xf]  ;;  %v35_v7 = vmax.bf16 %v209_v0, %v17_v3  ;;  %v19_v9 = vld [vmem:[%s330_s0 + $0x10] sm:$0xf]  ;;  %v20_v10 = vld [vmem:[%s330_s0 + $0x14] sm:$0xf] }
   0x3   :  { %v36_v8 = vmax.bf16 %v209_v0, %v18_v6  ;;  %v37_v13 = vmax.bf16 %v209_v0, %v19_v9  ;;  %v38_v14 = vmax.bf16 %v209_v0, %v20_v10  ;;  %v21_v15 = vld [vmem:[%s330_s0 + $0x18] sm:$0xf]  ;;  %v22_v16 = vld [vmem:[%s330_s0 + $0x1c] sm:$0xf]  ;;  %v208_v17 = vld [vmem:[%s331_s1 + $0x4] ss:$8 sps:$4 sm:$0xff]  }
   0x4   :  { %v190_v11 = vcombine.low %v33_v4, %v34_v5  ;;  %v53_v18 = vld [vmem:[%s332_s2] sm:$0xff]  ;;  %v39_v20 = vmax.bf16 %v209_v0, %v21_v15  ;;  %v40_v21 = vmax.bf16 %v209_v0, %v22_v16  ;;  %199 = vmatprep.mubr.msk.bf16.mxu0 %vm128_vm0, %v208_v17  ;;  %v54_v22 = vld [vmem:[%s332_s2 + $0x8] sm:$0xff]  ;;  %v27_v33 = vld [vmem:[%s330_s0 + $0x30] sm:$0xf] }
   0x5   :  { %v191_v12 = vcombine.low %v35_v7, %v36_v8  ;;  %57 = vperm.xlu0 %205, %v53_v18   ;;  %v192_v19 = vcombine.low %v37_v13, %v38_v14  ;;  %v23_v23 = vld [vmem:[%s330_s0 + $0x20] sm:$0xf]  ;;  %v24_v24 = vld [vmem:[%s330_s0 + $0x24] sm:$0xf]  ;;  %v25_v28 = vld [vmem:[%s330_s0 + $0x28] sm:$0xf]  ;;  %v45_v36 = vmax.bf16 %v209_v0, %v27_v33 }
   0x6   :  { %133 = vmatpush1.bf16.msra.mxu0 %v190_v11  ;;  %v193_v25 = vcombine.low %v39_v20, %v40_v21  ;;  %v41_v26 = vmax.bf16 %v209_v0, %v23_v23  ;;  %v42_v27 = vmax.bf16 %v209_v0, %v24_v24  ;;  %v26_v29 = vld [vmem:[%s330_s0 + $0x2c] sm:$0xf]  ;;  %v43_v31 = vmax.bf16 %v209_v0, %v25_v28  ;;  %v28_v34 = vld [vmem:[%s330_s0 + $0x34] sm:$0xf]  ;;  %v29_v38 = vld [vmem:[%s330_s0 + $0x38] sm:$0xf] }
   0x7   :  { %134 = vmatprep.subr.bf16.mxu0 %v209_v0  ;;  %v44_v32 = vmax.bf16 %v209_v0, %v26_v29  ;;  %v46_v37 = vmax.bf16 %v209_v0, %v28_v34  ;;  %v30_v39 = vld [vmem:[%s330_s0 + $0x3c] sm:$0xf]  ;;  %v47_v41 = vmax.bf16 %v209_v0, %v29_v38  ;;  %v31_v43 = vld [vmem:[%s330_s0 + $0x40] sm:$0xf]  ;;  %v32_v44 = vld [vmem:[%s330_s0 + $0x44] sm:$0xf] }
   0x8   :  { %v194_v30 = vcombine.low %v41_v26, %v42_v27  ;;  %v48_v42 = vmax.bf16 %v209_v0, %v30_v39  ;;  %v49_v46 = vmax.bf16 %v209_v0, %v31_v43  ;;  %v50_v47 = vmax.bf16 %v209_v0, %v32_v44  ;;  %v206_v49 = vld [vmem:[%s331_s1] ss:$8 sps:$4 sm:$0xff]  }
   0x9   :  { %62 = vperm.xlu0 %205, %v54_v22   ;;  %v195_v35 = vcombine.low %v43_v31, %v44_v32  ;;  %v196_v40 = vcombine.low %v45_v36, %v46_v37 }
   0xa   :  { %135 = vmatpush1.bf16.msra.mxu0 %v191_v12  ;;  %v197_v45 = vcombine.low %v47_v41, %v48_v42  ;;  %v198_v48 = vcombine.low %v49_v46, %v50_v47 }
   0xb   :  { %136 = vmatprep.subr.bf16.mxu0 %v209_v0 }
   0xe   :  { %137 = vmatpush1.bf16.msra.mxu0 %v192_v19 }
   0xf   :  { %138 = vmatprep.subr.bf16.mxu0 %v209_v0 }
  0x12   :  { %139 = vmatpush1.bf16.msra.mxu0 %v193_v25 }
  0x13   :  { %140 = vmatprep.subr.bf16.mxu0 %v209_v0 }
  0x16   :  { %141 = vmatpush1.bf16.msra.mxu0 %v194_v30 }
  0x17   :  { %142 = vmatprep.subr.bf16.mxu0 %v209_v0 }
  0x1a   :  { %143 = vmatpush1.bf16.msra.mxu0 %v195_v35 }
  0x1b   :  { %144 = vmatprep.subr.bf16.mxu0 %v209_v0 }
  0x1e   :  { %145 = vmatpush1.bf16.msra.mxu0 %v196_v40 }
  0x1f   :  { %146 = vmatprep.subr.bf16.mxu0 %v209_v0 }
  0x22   :  { %147 = vmatpush1.bf16.msra.mxu0 %v197_v45 }
  0x23   :  { %148 = vmatprep.subr.bf16.mxu0 %v209_v0 }
  0x26   :  { %149 = vmatpush1.bf16.msra.mxu0 %v198_v48 }
  0x29   :  { %165 = vmatmul.mubr.bf16.vlgmr.msra.gmra.mrb[0].mxu0 %v206_v49 }
  0x84   :  { %v58_v50 = vpop.permute.xlu0 %57 }
  0x88   :  { %v63_v54 = vpop.permute.xlu0 %62 }
  0xfc   :  { %v166_v51 = vpop.f32.mrb[0].mxu0 }
  0xfd   :  { %v167_v52 = vadd.f32 %v166_v51, %v58_v50  ;;  %v168_v53 = vpop.f32.mrb[1].mxu0 }
  0xfe   :  { %v169_v55 = vpop.f32.mrb[2].mxu0 }
  0xff   :  { %v202_v56 = vpack.c.bf16 %v167_v52, %v167_v52  ;;  %v170_v57 = vadd.f32 %v169_v55, %v63_v54  ;;  %v171_v58 = vpop.f32.mrb[3].mxu0 }
 0x101   :  { %182 = vst.msk [vmem:[%s333_s3] sm:$0xf] %vm181_vm1, %v202_v56  ;;  %v203_v59 = vpack.c.bf16 %v170_v57, %v170_v57 }
 0x103   :  { %183 = vst.msk [vmem:[%s333_s3 + $0x4] sm:$0xf] %vm181_vm1, %v203_v59 }

// kernel: network_forward.52
= control target key start
LH: loop header
LB: loop body
LE: loop exit
PB: predicated region body
PF: predicated region fallthrough
CT: control target
= control target key end

     0   :  { %v209_v0 = vmov 0   ;;  %vm128_vm0 = vcmask 130048   ;;  %vm181_vm1 = vcmask 60416   ;;  %s330_s0 = inlined_call_operand.vmem [shape: bf16[144,8], index: 0, kind: input, shape index: {}]   ;;  %s331_s1 = inlined_call_operand.vmem [shape: bf16[16,144], index: 1, kind: input, shape index: {}]   ;;  %s332_s2 = inlined_call_operand.vmem [shape: f32[16,1], index: 2, kind: input, shape index: {}]   ;;  %s333_s3 = inlined_call_operand.vmem [shape: bf16[16,8], index: 3, kind: output, shape index: {}]  }
   0x1   :  { %132 = vmatprep.subr.bf16.mxu0 %v209_v0  ;;  %v15_v1 = vld [vmem:[%s330_s0] sm:$0xf]  ;;  %v16_v2 = vld [vmem:[%s330_s0 + $0x4] sm:$0xf]  ;;  %v17_v3 = vld [vmem:[%s330_s0 + $0x8] sm:$0xf]  ;;  %205 = vset.pattern.permute.xlu0 %v209_v0 }
   0x2   :  { %v33_v4 = vmax.bf16 %v209_v0, %v15_v1  ;;  %v34_v5 = vmax.bf16 %v209_v0, %v16_v2  ;;  %v18_v6 = vld [vmem:[%s330_s0 + $0xc] sm:$0xf]  ;;  %v35_v7 = vmax.bf16 %v209_v0, %v17_v3  ;;  %v19_v9 = vld [vmem:[%s330_s0 + $0x10] sm:$0xf]  ;;  %v20_v10 = vld [vmem:[%s330_s0 + $0x14] sm:$0xf] }
   0x3   :  { %v36_v8 = vmax.bf16 %v209_v0, %v18_v6  ;;  %v37_v13 = vmax.bf16 %v209_v0, %v19_v9  ;;  %v38_v14 = vmax.bf16 %v209_v0, %v20_v10  ;;  %v21_v15 = vld [vmem:[%s330_s0 + $0x18] sm:$0xf]  ;;  %v22_v16 = vld [vmem:[%s330_s0 + $0x1c] sm:$0xf]  ;;  %v208_v17 = vld [vmem:[%s331_s1 + $0x4] ss:$8 sps:$4 sm:$0xff]  }
   0x4   :  { %v190_v11 = vcombine.low %v33_v4, %v34_v5  ;;  %v53_v18 = vld [vmem:[%s332_s2] sm:$0xff]  ;;  %v39_v20 = vmax.bf16 %v209_v0, %v21_v15  ;;  %v40_v21 = vmax.bf16 %v209_v0, %v22_v16  ;;  %199 = vmatprep.mubr.msk.bf16.mxu0 %vm128_vm0, %v208_v17  ;;  %v54_v22 = vld [vmem:[%s332_s2 + $0x8] sm:$0xff]  ;;  %v27_v33 = vld [vmem:[%s330_s0 + $0x30] sm:$0xf] }
   0x5   :  { %v191_v12 = vcombine.low %v35_v7, %v36_v8  ;;  %57 = vperm.xlu0 %205, %v53_v18   ;;  %v192_v19 = vcombine.low %v37_v13, %v38_v14  ;;  %v23_v23 = vld [vmem:[%s330_s0 + $0x20] sm:$0xf]  ;;  %v24_v24 = vld [vmem:[%s330_s0 + $0x24] sm:$0xf]  ;;  %v25_v28 = vld [vmem:[%s330_s0 + $0x28] sm:$0xf]  ;;  %v45_v36 = vmax.bf16 %v209_v0, %v27_v33 }
   0x6   :  { %133 = vmatpush1.bf16.msra.mxu0 %v190_v11  ;;  %v193_v25 = vcombine.low %v39_v20, %v40_v21  ;;  %v41_v26 = vmax.bf16 %v209_v0, %v23_v23  ;;  %v42_v27 = vmax.bf16 %v209_v0, %v24_v24  ;;  %v26_v29 = vld [vmem:[%s330_s0 + $0x2c] sm:$0xf]  ;;  %v43_v31 = vmax.bf16 %v209_v0, %v25_v28  ;;  %v28_v34 = vld [vmem:[%s330_s0 + $0x34] sm:$0xf]  ;;  %v29_v38 = vld [vmem:[%s330_s0 + $0x38] sm:$0xf] }
   0x7   :  { %134 = vmatprep.subr.bf16.mxu0 %v209_v0  ;;  %v44_v32 = vmax.bf16 %v209_v0, %v26_v29  ;;  %v46_v37 = vmax.bf16 %v209_v0, %v28_v34  ;;  %v30_v39 = vld [vmem:[%s330_s0 + $0x3c] sm:$0xf]  ;;  %v47_v41 = vmax.bf16 %v209_v0, %v29_v38  ;;  %v31_v43 = vld [vmem:[%s330_s0 + $0x40] sm:$0xf]  ;;  %v32_v44 = vld [vmem:[%s330_s0 + $0x44] sm:$0xf] }
   0x8   :  { %v194_v30 = vcombine.low %v41_v26, %v42_v27  ;;  %v48_v42 = vmax.bf16 %v209_v0, %v30_v39  ;;  %v49_v46 = vmax.bf16 %v209_v0, %v31_v43  ;;  %v50_v47 = vmax.bf16 %v209_v0, %v32_v44  ;;  %v206_v49 = vld [vmem:[%s331_s1] ss:$8 sps:$4 sm:$0xff]  }
   0x9   :  { %62 = vperm.xlu0 %205, %v54_v22   ;;  %v195_v35 = vcombine.low %v43_v31, %v44_v32  ;;  %v196_v40 = vcombine.low %v45_v36, %v46_v37 }
   0xa   :  { %135 = vmatpush1.bf16.msra.mxu0 %v191_v12  ;;  %v197_v45 = vcombine.low %v47_v41, %v48_v42  ;;  %v198_v48 = vcombine.low %v49_v46, %v50_v47 }
   0xb   :  { %136 = vmatprep.subr.bf16.mxu0 %v209_v0 }
   0xe   :  { %137 = vmatpush1.bf16.msra.mxu0 %v192_v19 }
   0xf   :  { %138 = vmatprep.subr.bf16.mxu0 %v209_v0 }
  0x12   :  { %139 = vmatpush1.bf16.msra.mxu0 %v193_v25 }
  0x13   :  { %140 = vmatprep.subr.bf16.mxu0 %v209_v0 }
  0x16   :  { %141 = vmatpush1.bf16.msra.mxu0 %v194_v30 }
  0x17   :  { %142 = vmatprep.subr.bf16.mxu0 %v209_v0 }
  0x1a   :  { %143 = vmatpush1.bf16.msra.mxu0 %v195_v35 }
  0x1b   :  { %144 = vmatprep.subr.bf16.mxu0 %v209_v0 }
  0x1e   :  { %145 = vmatpush1.bf16.msra.mxu0 %v196_v40 }
  0x1f   :  { %146 = vmatprep.subr.bf16.mxu0 %v209_v0 }
  0x22   :  { %147 = vmatpush1.bf16.msra.mxu0 %v197_v45 }
  0x23   :  { %148 = vmatprep.subr.bf16.mxu0 %v209_v0 }
  0x26   :  { %149 = vmatpush1.bf16.msra.mxu0 %v198_v48 }
  0x29   :  { %165 = vmatmul.mubr.bf16.vlgmr.msra.gmra.mrb[0].mxu0 %v206_v49 }
  0x84   :  { %v58_v50 = vpop.permute.xlu0 %57 }
  0x88   :  { %v63_v54 = vpop.permute.xlu0 %62 }
  0xfc   :  { %v166_v51 = vpop.f32.mrb[0].mxu0 }
  0xfd   :  { %v167_v52 = vadd.f32 %v166_v51, %v58_v50  ;;  %v168_v53 = vpop.f32.mrb[1].mxu0 }
  0xfe   :  { %v169_v55 = vpop.f32.mrb[2].mxu0 }
  0xff   :  { %v202_v56 = vpack.c.bf16 %v167_v52, %v167_v52  ;;  %v170_v57 = vadd.f32 %v169_v55, %v63_v54  ;;  %v171_v58 = vpop.f32.mrb[3].mxu0 }
 0x101   :  { %182 = vst.msk [vmem:[%s333_s3] sm:$0xf] %vm181_vm1, %v202_v56  ;;  %v203_v59 = vpack.c.bf16 %v170_v57, %v170_v57 }
 0x103   :  { %183 = vst.msk [vmem:[%s333_s3 + $0x4] sm:$0xf] %vm181_vm1, %v203_v59 }

// kernel: network_forward.54
= control target key start
LH: loop header
LB: loop body
LE: loop exit
PB: predicated region body
PF: predicated region fallthrough
CT: control target
= control target key end

     0   :  { %v321_v3 = vmov 0   ;;  %vm131_vm0 = vcmask 523264   ;;  %vm241_vm1 = vcmask 60416   ;;  %s438_s0 = inlined_call_operand.vmem [shape: bf16[64,8], index: 0, kind: input, shape index: {}]   ;;  %s439_s1 = inlined_call_operand.vmem [shape: bf16[64,64], index: 1, kind: input, shape index: {}]   ;;  %s440_s2 = inlined_call_operand.vmem [shape: f32[64,1], index: 2, kind: input, shape index: {}]   ;;  %s441_s3 = inlined_call_operand.vmem [shape: bf16[64,8], index: 3, kind: output, shape index: {}]  }
   0x1   :  { %v15_v0 = vld [vmem:[%s438_s0] sm:$0xf]  ;;  %v16_v1 = vld [vmem:[%s438_s0 + $0x4] sm:$0xf]  ;;  %v17_v2 = vld [vmem:[%s438_s0 + $0x8] sm:$0xf]  ;;  %316 = vset.pattern.permute.xlu1 %v321_v3  ;;  %315 = vset.pattern.permute.xlu0 %v321_v3 }
   0x2   :  { %v23_v4 = vmax.bf16 %v321_v3, %v15_v0  ;;  %v24_v5 = vmax.bf16 %v321_v3, %v16_v1  ;;  %v18_v6 = vld [vmem:[%s438_s0 + $0xc] sm:$0xf]  ;;  %v25_v7 = vmax.bf16 %v321_v3, %v17_v2  ;;  %v19_v8 = vld [vmem:[%s438_s0 + $0x10] sm:$0xf]  ;;  %v20_v9 = vld [vmem:[%s438_s0 + $0x14] sm:$0xf] }
   0x3   :  { %v26_v10 = vmax.bf16 %v321_v3, %v18_v6  ;;  %v21_v11 = vld [vmem:[%s438_s0 + $0x18] sm:$0xf]  ;;  %v22_v12 = vld [vmem:[%s438_s0 + $0x1c] sm:$0xf]  ;;  %v27_v14 = vmax.bf16 %v321_v3, %v19_v8  ;;  %v28_v15 = vmax.bf16 %v321_v3, %v20_v9  ;;  %v317_v16 = vld [vmem:[%s439_s1] sm:$0xff]  }
   0x4   :  { %v258_v13 = vcombine.low %v23_v4, %v24_v5  ;;  %v318_v18 = vld [vmem:[%s439_s1 + $0x10] sm:$0xff]   ;;  %v29_v21 = vmax.bf16 %v321_v3, %v21_v11  ;;  %v30_v22 = vmax.bf16 %v321_v3, %v22_v12  ;;  %v39_v23 = vld [vmem:[%s440_s2] sm:$0xff]  ;;  %298 = vmatprep.mubr.msk.bf16.mxu0 %vm131_vm0, %v317_v16  ;;  %v42_v24 = vld [vmem:[%s440_s2 + $0x18] sm:$0xff] }
   0x5   :  { %v259_v17 = vcombine.low %v25_v7, %v26_v10  ;;  %v41_v19 = vld [vmem:[%s440_s2 + $0x10] sm:$0xff]  ;;  %v260_v20 = vcombine.low %v27_v14, %v28_v15  ;;  %302 = vmatprep.mubr.msk.bf16.mxu1 %vm131_vm0, %v318_v18  ;;  %49 = vperm.xlu0 %315, %v39_v23   ;;  %v40_v25 = vld [vmem:[%s440_s2 + $0x8] sm:$0xff]  ;;  %v43_v28 = vld [vmem:[%s440_s2 + $0x20] sm:$0xff] }
   0x6   :  { %290 = vmatprep.subr.bf16.mxu0 %v258_v13  ;;  %306 = vmatprep.subr.bf16.mxu1 %v258_v13  ;;  %v261_v26 = vcombine.low %v29_v21, %v30_v22  ;;  %v44_v27 = vld [vmem:[%s440_s2 + $0x28] sm:$0xff]  ;;  %v320_v30 = vld [vmem:[%s439_s1 + $0x18] sm:$0xff]   ;;  %v45_v32 = vld [vmem:[%s440_s2 + $0x30] sm:$0xff] }
   0x7   :  { %291 = vmatpush3.bf16.msra.mxu0 %v258_v13  ;;  %310 = vmatpush3.bf16.msra.mxu1 %v258_v13  ;;  %v319_v29 = vld [vmem:[%s439_s1 + $0x8] sm:$0xff]   ;;  %v46_v31 = vld [vmem:[%s440_s2 + $0x38] sm:$0xff] }
   0x8   :  { %292 = vmatprep.subr.bf16.mxu0 %v259_v17  ;;  %307 = vmatprep.subr.bf16.mxu1 %v259_v17 }
   0x9   :  { %59 = vperm.xlu1 %316, %v41_v19   ;;  %54 = vperm.xlu0 %315, %v40_v25  }
   0xb   :  { %293 = vmatpush3.bf16.msra.mxu0 %v259_v17  ;;  %311 = vmatpush3.bf16.msra.mxu1 %v259_v17 }
   0xc   :  { %294 = vmatprep.subr.bf16.mxu0 %v260_v20  ;;  %308 = vmatprep.subr.bf16.mxu1 %v260_v20 }
   0xd   :  { %64 = vperm.xlu1 %316, %v42_v24   ;;  %69 = vperm.xlu0 %315, %v43_v28  }
   0xf   :  { %295 = vmatpush3.bf16.msra.mxu0 %v260_v20  ;;  %312 = vmatpush3.bf16.msra.mxu1 %v260_v20 }
  0x10   :  { %296 = vmatprep.subr.bf16.mxu0 %v261_v26  ;;  %309 = vmatprep.subr.bf16.mxu1 %v261_v26 }
  0x11   :  { %74 = vperm.xlu1 %316, %v44_v27   ;;  %79 = vperm.xlu0 %315, %v45_v32  }
  0x13   :  { %297 = vmatpush3.bf16.msra.mxu0 %v261_v26  ;;  %313 = vmatpush3.bf16.msra.mxu1 %v261_v26 }
  0x15   :  { %84 = vperm.xlu1 %316, %v46_v31  }
  0x16   :  { %299 = vmatmul.mubr.msk.bf16.vlgmr.msra.gmra.mrb[0].mxu0 %vm131_vm0, %v319_v29  ;;  %303 = vmatmul.mubr.msk.bf16.vlgmr.msra.gmra.mrb[0].mxu1 %vm131_vm0, %v320_v30 }
  0x84   :  { %v50_v34 = vpop.permute.xlu0 %49 }
  0x88   :  { %v60_v33 = vpop.permute.xlu1 %59  ;;  %v55_v36 = vpop.permute.xlu0 %54 }
  0x8c   :  { %v65_v35 = vpop.permute.xlu1 %64  ;;  %v70_v38 = vpop.permute.xlu0 %69 }
  0x90   :  { %v75_v37 = vpop.permute.xlu1 %74  ;;  %v80_v40 = vpop.permute.xlu0 %79 }
  0x94   :  { %v85_v39 = vpop.permute.xlu1 %84 }
  0xe9   :  { %v300_v41 = vpop.f32.mrb[0].mxu0  ;;  %v304_v42 = vpop.f32.mrb[0].mxu1 }
  0xea   :  { %v187_v43 = vadd.f32 %v300_v41, %v60_v33  ;;  %v203_v44 = vadd.f32 %v304_v42, %v80_v40  ;;  %v178_v45 = vpop.f32.mrb[1].mxu0  ;;  %v194_v46 = vpop.f32.mrb[1].mxu1 }
  0xeb   :  { %v179_v47 = vadd.f32 %v178_v45, %v50_v34  ;;  %v195_v48 = vadd.f32 %v194_v46, %v70_v38  ;;  %v301_v49 = vpop.f32.mrb[2].mxu0  ;;  %v305_v50 = vpop.f32.mrb[2].mxu1 }
  0xec   :  { %v276_v51 = vpack.c.bf16 %v187_v43, %v187_v43  ;;  %v280_v52 = vpack.c.bf16 %v203_v44, %v203_v44  ;;  %v190_v53 = vadd.f32 %v301_v49, %v65_v35  ;;  %v206_v54 = vadd.f32 %v305_v50, %v85_v39  ;;  %v181_v55 = vpop.f32.mrb[3].mxu0  ;;  %v197_v56 = vpop.f32.mrb[3].mxu1 }
  0xed   :  { %v274_v57 = vpack.c.bf16 %v179_v47, %v179_v47  ;;  %v278_v58 = vpack.c.bf16 %v195_v48, %v195_v48  ;;  %v182_v59 = vadd.f32 %v181_v55, %v55_v36  ;;  %v198_v60 = vadd.f32 %v197_v56, %v75_v37 }
  0xee   :  { %244 = vst.msk [vmem:[%s441_s3 + $0x8] sm:$0xf] %vm241_vm1, %v276_v51  ;;  %248 = vst.msk [vmem:[%s441_s3 + $0x18] sm:$0xf] %vm241_vm1, %v280_v52  ;;  %v277_v61 = vpack.c.bf16 %v190_v53, %v190_v53  ;;  %v281_v62 = vpack.c.bf16 %v206_v54, %v206_v54 }
  0xef   :  { %242 = vst.msk [vmem:[%s441_s3] sm:$0xf] %vm241_vm1, %v274_v57  ;;  %246 = vst.msk [vmem:[%s441_s3 + $0x10] sm:$0xf] %vm241_vm1, %v278_v58  ;;  %v275_v63 = vpack.c.bf16 %v182_v59, %v182_v59  ;;  %v279_v0 = vpack.c.bf16 %v198_v60, %v198_v60 }
  0xf0   :  { %245 = vst.msk [vmem:[%s441_s3 + $0xc] sm:$0xf] %vm241_vm1, %v277_v61  ;;  %249 = vst.msk [vmem:[%s441_s3 + $0x1c] sm:$0xf] %vm241_vm1, %v281_v62 }
  0xf1   :  { %243 = vst.msk [vmem:[%s441_s3 + $0x4] sm:$0xf] %vm241_vm1, %v275_v63  ;;  %247 = vst.msk [vmem:[%s441_s3 + $0x14] sm:$0xf] %vm241_vm1, %v279_v0 }

// kernel: network_forward.55
= control target key start
LH: loop header
LB: loop body
LE: loop exit
PB: predicated region body
PF: predicated region fallthrough
CT: control target
= control target key end

     0   :  { %v377_v0 = vmov 0   ;;  %vm160_vm0 = vcmask 130048   ;;  %vm334_vm1 = vcmask 257024   ;;  %s597_s1 = inlined_call_operand.vmem [shape: bf16[144,32], index: 1, kind: input, shape index: {}]   ;;  %s598_s0 = inlined_call_operand.vmem [shape: bf16[144,32], index: 0, kind: input, shape index: {}]   ;;  %s599_s3 = inlined_call_operand.vmem [shape: bf16[16,144], index: 3, kind: input, shape index: {}]   ;;  %s600_s2 = inlined_call_operand.vmem [shape: bf16[16,144], index: 2, kind: input, shape index: {}]   ;;  %s601_s4 = inlined_call_operand.vmem [shape: f32[16,1], index: 4, kind: input, shape index: {}]   ;;  %s602_s5 = inlined_call_operand.vmem [shape: bf16[16,32], index: 5, kind: output, shape index: {}]  }
   0x1   :  { %164 = vmatprep.subr.bf16.mxu0 %v377_v0  ;;  %271 = vmatprep.subr.bf16.mxu1 %v377_v0  ;;  %v59_v1 = vld [vmem:[%s597_s1] sm:$0xf]  ;;  %v60_v2 = vld [vmem:[%s597_s1 + $0x4] sm:$0xf]  ;;  %v61_v8 = vld [vmem:[%s597_s1 + $0x8] sm:$0xf] }
   0x2   :  { %v21_v3 = vld [vmem:[%s598_s0] sm:$0xf]  ;;  %v77_v4 = vmax.bf16 %v377_v0, %v59_v1  ;;  %v78_v5 = vmax.bf16 %v377_v0, %v60_v2  ;;  %v22_v6 = vld [vmem:[%s598_s0 + $0x4] sm:$0xf]  ;;  %v62_v9 = vld [vmem:[%s597_s1 + $0xc] sm:$0xf]  ;;  %370 = vset.pattern.permute.xlu0 %v377_v0  ;;  %v79_v11 = vmax.bf16 %v377_v0, %v61_v8 }
   0x3   :  { %v39_v7 = vmax.bf16 %v377_v0, %v21_v3  ;;  %v40_v10 = vmax.bf16 %v377_v0, %v22_v6  ;;  %v80_v12 = vmax.bf16 %v377_v0, %v62_v9  ;;  %v23_v13 = vld [vmem:[%s598_s0 + $0x8] sm:$0xf]  ;;  %v24_v14 = vld [vmem:[%s598_s0 + $0xc] sm:$0xf]  ;;  %v63_v15 = vld [vmem:[%s597_s1 + $0x10] sm:$0xf] }
   0x4   :  { %v343_v16 = vcombine.low %v77_v4, %v78_v5  ;;  %v41_v17 = vmax.bf16 %v377_v0, %v23_v13  ;;  %v42_v18 = vmax.bf16 %v377_v0, %v24_v14  ;;  %v64_v19 = vld [vmem:[%s597_s1 + $0x14] sm:$0xf]  ;;  %v25_v20 = vld [vmem:[%s598_s0 + $0x10] sm:$0xf]  ;;  %v81_v24 = vmax.bf16 %v377_v0, %v63_v15  ;;  %v65_v29 = vld [vmem:[%s597_s1 + $0x18] sm:$0xf] }
   0x5   :  { %v26_v21 = vld [vmem:[%s598_s0 + $0x14] sm:$0xf]  ;;  %v355_v22 = vcombine.low %v39_v7, %v40_v10  ;;  %v344_v23 = vcombine.low %v79_v11, %v80_v12  ;;  %v82_v25 = vmax.bf16 %v377_v0, %v64_v19  ;;  %v43_v27 = vmax.bf16 %v377_v0, %v25_v20  ;;  %v66_v30 = vld [vmem:[%s597_s1 + $0x1c] sm:$0xf]  ;;  %v27_v31 = vld [vmem:[%s598_s0 + $0x18] sm:$0xf] }
   0x6   :  { %165 = vmatpush1.bf16.msra.mxu0 %v343_v16  ;;  %v356_v26 = vcombine.low %v41_v17, %v42_v18  ;;  %v44_v28 = vmax.bf16 %v377_v0, %v26_v21  ;;  %v28_v32 = vld [vmem:[%s598_s0 + $0x1c] sm:$0xf]  ;;  %v83_v34 = vmax.bf16 %v377_v0, %v65_v29  ;;  %v84_v35 = vmax.bf16 %v377_v0, %v66_v30  ;;  %v67_v39 = vld [vmem:[%s597_s1 + $0x20] sm:$0xf]  ;;  %v68_v40 = vld [vmem:[%s597_s1 + $0x24] sm:$0xf] }
   0x7   :  { %272 = vmatpush1.bf16.msra.mxu1 %v355_v22  ;;  %166 = vmatprep.subr.bf16.mxu0 %v377_v0  ;;  %v345_v33 = vcombine.low %v81_v24, %v82_v25  ;;  %v45_v37 = vmax.bf16 %v377_v0, %v27_v31  ;;  %v46_v38 = vmax.bf16 %v377_v0, %v28_v32  ;;  %v29_v41 = vld [vmem:[%s598_s0 + $0x20] sm:$0xf]  ;;  %v30_v42 = vld [vmem:[%s598_s0 + $0x24] sm:$0xf]  ;;  %v69_v43 = vld [vmem:[%s597_s1 + $0x28] sm:$0xf] }
   0x8   :  { %273 = vmatprep.subr.bf16.mxu1 %v377_v0  ;;  %v357_v36 = vcombine.low %v43_v27, %v44_v28  ;;  %v346_v44 = vcombine.low %v83_v34, %v84_v35  ;;  %v85_v45 = vmax.bf16 %v377_v0, %v67_v39  ;;  %v86_v46 = vmax.bf16 %v377_v0, %v68_v40  ;;  %v373_v47 = vld [vmem:[%s599_s3 + $0x4] ss:$8 sps:$4 sm:$0xff]   ;;  %v31_v54 = vld [vmem:[%s598_s0 + $0x28] sm:$0xf]  ;;  %v71_v63 = vld [vmem:[%s597_s1 + $0x30] sm:$0xf] }
   0x9   :  { %v358_v48 = vcombine.low %v45_v37, %v46_v38  ;;  %v47_v49 = vmax.bf16 %v377_v0, %v29_v41  ;;  %v48_v50 = vmax.bf16 %v377_v0, %v30_v42  ;;  %v70_v51 = vld [vmem:[%s597_s1 + $0x2c] sm:$0xf]  ;;  %v312_v53 = vld [vmem:[%s601_s4] sm:$0xff]  ;;  %352 = vmatprep.mubr.msk.bf16.mxu0 %vm160_vm0, %v373_v47  ;;  %v87_v57 = vmax.bf16 %v377_v0, %v69_v43  ;;  %v72_v1 = vld [vmem:[%s597_s1 + $0x34] sm:$0xf] }
   0xa   :  { %167 = vmatpush1.bf16.msra.mxu0 %v344_v23  ;;  %v376_v52 = vld [vmem:[%s600_s2 + $0x4] ss:$8 sps:$4 sm:$0xff]   ;;  %316 = vperm.xlu0 %370, %v312_v53   ;;  %v347_v56 = vcombine.low %v85_v45, %v86_v46  ;;  %v88_v58 = vmax.bf16 %v377_v0, %v70_v51  ;;  %v49_v61 = vmax.bf16 %v377_v0, %v31_v54  ;;  %v33_v2 = vld [vmem:[%s598_s0 + $0x30] sm:$0xf]  ;;  %v34_v3 = vld [vmem:[%s598_s0 + $0x34] sm:$0xf] }
   0xb   :  { %274 = vmatpush1.bf16.msra.mxu1 %v356_v26  ;;  %168 = vmatprep.subr.bf16.mxu0 %v377_v0  ;;  %v32_v55 = vld [vmem:[%s598_s0 + $0x2c] sm:$0xf]  ;;  %v359_v60 = vcombine.low %v47_v49, %v48_v50  ;;  %v89_v5 = vmax.bf16 %v377_v0, %v71_v63  ;;  %v90_v6 = vmax.bf16 %v377_v0, %v72_v1  ;;  %v73_v10 = vld [vmem:[%s597_s1 + $0x38] sm:$0xf]  ;;  %v74_v11 = vld [vmem:[%s597_s1 + $0x3c] sm:$0xf] }
   0xc   :  { %275 = vmatprep.subr.bf16.mxu1 %v377_v0  ;;  %364 = vmatprep.mubr.msk.bf16.mxu1 %vm160_vm0, %v376_v52  ;;  %v313_v59 = vld [vmem:[%s601_s4 + $0x8] sm:$0xff]  ;;  %v50_v62 = vmax.bf16 %v377_v0, %v32_v55  ;;  %v348_v4 = vcombine.low %v87_v57, %v88_v58  ;;  %v51_v8 = vmax.bf16 %v377_v0, %v33_v2  ;;  %v35_v12 = vld [vmem:[%s598_s0 + $0x38] sm:$0xf]  ;;  %v36_v13 = vld [vmem:[%s598_s0 + $0x3c] sm:$0xf] }
   0xd   :  { %v52_v9 = vmax.bf16 %v377_v0, %v34_v3  ;;  %v349_v14 = vcombine.low %v89_v5, %v90_v6  ;;  %v91_v15 = vmax.bf16 %v377_v0, %v73_v10  ;;  %v92_v16 = vmax.bf16 %v377_v0, %v74_v11  ;;  %v75_v20 = vld [vmem:[%s597_s1 + $0x40] sm:$0xf]  ;;  %v76_v21 = vld [vmem:[%s597_s1 + $0x44] sm:$0xf] }
   0xe   :  { %169 = vmatpush1.bf16.msra.mxu0 %v345_v33  ;;  %321 = vperm.xlu0 %370, %v313_v59   ;;  %v360_v7 = vcombine.low %v49_v61, %v50_v62  ;;  %v53_v18 = vmax.bf16 %v377_v0, %v35_v12  ;;  %v54_v19 = vmax.bf16 %v377_v0, %v36_v13  ;;  %v37_v22 = vld [vmem:[%s598_s0 + $0x40] sm:$0xf]  ;;  %v38_v23 = vld [vmem:[%s598_s0 + $0x44] sm:$0xf] }
   0xf   :  { %276 = vmatpush1.bf16.msra.mxu1 %v357_v36  ;;  %170 = vmatprep.subr.bf16.mxu0 %v377_v0  ;;  %v361_v17 = vcombine.low %v51_v8, %v52_v9  ;;  %v350_v24 = vcombine.low %v91_v15, %v92_v16  ;;  %v93_v25 = vmax.bf16 %v377_v0, %v75_v20  ;;  %v371_v32 = vld [vmem:[%s599_s3] ss:$8 sps:$4 sm:$0xff]  }
  0x10   :  { %277 = vmatprep.subr.bf16.mxu1 %v377_v0  ;;  %v94_v26 = vmax.bf16 %v377_v0, %v76_v21  ;;  %v362_v27 = vcombine.low %v53_v18, %v54_v19  ;;  %v55_v28 = vmax.bf16 %v377_v0, %v37_v22  ;;  %v56_v29 = vmax.bf16 %v377_v0, %v38_v23  ;;  %v374_v33 = vld [vmem:[%s600_s2] ss:$8 sps:$4 sm:$0xff]  }
  0x12   :  { %171 = vmatpush1.bf16.msra.mxu0 %v346_v44  ;;  %v351_v30 = vcombine.low %v93_v25, %v94_v26  ;;  %v363_v31 = vcombine.low %v55_v28, %v56_v29 }
  0x13   :  { %278 = vmatpush1.bf16.msra.mxu1 %v358_v48  ;;  %172 = vmatprep.subr.bf16.mxu0 %v377_v0 }
  0x14   :  { %279 = vmatprep.subr.bf16.mxu1 %v377_v0 }
  0x16   :  { %173 = vmatpush1.bf16.msra.mxu0 %v347_v56 }
  0x17   :  { %280 = vmatpush1.bf16.msra.mxu1 %v359_v60  ;;  %174 = vmatprep.subr.bf16.mxu0 %v377_v0 }
  0x18   :  { %281 = vmatprep.subr.bf16.mxu1 %v377_v0 }
  0x1a   :  { %175 = vmatpush1.bf16.msra.mxu0 %v348_v4 }
  0x1b   :  { %282 = vmatpush1.bf16.msra.mxu1 %v360_v7  ;;  %176 = vmatprep.subr.bf16.mxu0 %v377_v0 }
  0x1c   :  { %283 = vmatprep.subr.bf16.mxu1 %v377_v0 }
  0x1e   :  { %177 = vmatpush1.bf16.msra.mxu0 %v349_v14 }
  0x1f   :  { %284 = vmatpush1.bf16.msra.mxu1 %v361_v17  ;;  %178 = vmatprep.subr.bf16.mxu0 %v377_v0 }
  0x20   :  { %285 = vmatprep.subr.bf16.mxu1 %v377_v0 }
  0x22   :  { %179 = vmatpush1.bf16.msra.mxu0 %v350_v24 }
  0x23   :  { %286 = vmatpush1.bf16.msra.mxu1 %v362_v27  ;;  %180 = vmatprep.subr.bf16.mxu0 %v377_v0 }
  0x24   :  { %287 = vmatprep.subr.bf16.mxu1 %v377_v0 }
  0x26   :  { %181 = vmatpush1.bf16.msra.mxu0 %v351_v30 }
  0x27   :  { %288 = vmatpush1.bf16.msra.mxu1 %v363_v31 }
  0x29   :  { %197 = vmatmul.mubr.bf16.vlgmr.msra.gmra.mrb[0].mxu0 %v371_v32 }
  0x2a   :  { %304 = vmatmul.mubr.bf16.vlgmr.msra.gmra.mrb[0].mxu1 %v374_v33 }
  0x89   :  { %v317_v34 = vpop.permute.xlu0 %316 }
  0x8d   :  { %v322_v45 = vpop.permute.xlu0 %321 }
  0xfc   :  { %v198_v35 = vpop.f32.mrb[0].mxu0 }
  0xfd   :  { %v305_v36 = vpop.f32.mrb[0].mxu1  ;;  %v200_v37 = vpop.f32.mrb[1].mxu0 }
  0xfe   :  { %v306_v38 = vadd.f32 %v305_v36, %v198_v35  ;;  %v307_v39 = vpop.f32.mrb[1].mxu1  ;;  %v201_v40 = vpop.f32.mrb[2].mxu0 }
  0xff   :  { %v308_v0 = vpop.f32.mrb[2].mxu1  ;;  %v203_v41 = vpop.f32.mrb[3].mxu0 }
 0x100   :  { %v324_v42 = vadd.f32 %v317_v34, %v306_v38  ;;  %v309_v43 = vadd.f32 %v308_v0, %v201_v40  ;;  %v310_v44 = vpop.f32.mrb[3].mxu1 }
 0x102   :  { %v367_v46 = vpack.c.bf16 %v324_v42, %v324_v42  ;;  %v325_v47 = vadd.f32 %v322_v45, %v309_v43 }
 0x104   :  { %335 = vst.msk [vmem:[%s602_s5] sm:$0xf] %vm334_vm1, %v367_v46  ;;  %v368_v48 = vpack.c.bf16 %v325_v47, %v325_v47 }
 0x106   :  { %336 = vst.msk [vmem:[%s602_s5 + $0x4] sm:$0xf] %vm334_vm1, %v368_v48 }

// kernel: network_forward.57
= control target key start
LH: loop header
LB: loop body
LE: loop exit
PB: predicated region body
PF: predicated region fallthrough
CT: control target
= control target key end

     0   :  { %v321_v3 = vmov 0   ;;  %vm131_vm0 = vcmask 523264   ;;  %vm241_vm1 = vcmask 257024   ;;  %s438_s0 = inlined_call_operand.vmem [shape: bf16[64,32], index: 0, kind: input, shape index: {}]   ;;  %s439_s1 = inlined_call_operand.vmem [shape: bf16[64,64], index: 1, kind: input, shape index: {}]   ;;  %s440_s2 = inlined_call_operand.vmem [shape: f32[64,1], index: 2, kind: input, shape index: {}]   ;;  %s441_s3 = inlined_call_operand.vmem [shape: bf16[64,32], index: 3, kind: output, shape index: {}]  }
   0x1   :  { %v15_v0 = vld [vmem:[%s438_s0] sm:$0xf]  ;;  %v16_v1 = vld [vmem:[%s438_s0 + $0x4] sm:$0xf]  ;;  %v17_v2 = vld [vmem:[%s438_s0 + $0x8] sm:$0xf]  ;;  %316 = vset.pattern.permute.xlu1 %v321_v3  ;;  %315 = vset.pattern.permute.xlu0 %v321_v3 }
   0x2   :  { %v23_v4 = vmax.bf16 %v321_v3, %v15_v0  ;;  %v24_v5 = vmax.bf16 %v321_v3, %v16_v1  ;;  %v18_v6 = vld [vmem:[%s438_s0 + $0xc] sm:$0xf]  ;;  %v25_v7 = vmax.bf16 %v321_v3, %v17_v2  ;;  %v19_v8 = vld [vmem:[%s438_s0 + $0x10] sm:$0xf]  ;;  %v20_v9 = vld [vmem:[%s438_s0 + $0x14] sm:$0xf] }
   0x3   :  { %v26_v10 = vmax.bf16 %v321_v3, %v18_v6  ;;  %v21_v11 = vld [vmem:[%s438_s0 + $0x18] sm:$0xf]  ;;  %v22_v12 = vld [vmem:[%s438_s0 + $0x1c] sm:$0xf]  ;;  %v27_v14 = vmax.bf16 %v321_v3, %v19_v8  ;;  %v28_v15 = vmax.bf16 %v321_v3, %v20_v9  ;;  %v317_v16 = vld [vmem:[%s439_s1] sm:$0xff]  }
   0x4   :  { %v258_v13 = vcombine.low %v23_v4, %v24_v5  ;;  %v318_v18 = vld [vmem:[%s439_s1 + $0x10] sm:$0xff]   ;;  %v29_v21 = vmax.bf16 %v321_v3, %v21_v11  ;;  %v30_v22 = vmax.bf16 %v321_v3, %v22_v12  ;;  %v39_v23 = vld [vmem:[%s440_s2] sm:$0xff]  ;;  %298 = vmatprep.mubr.msk.bf16.mxu0 %vm131_vm0, %v317_v16  ;;  %v42_v24 = vld [vmem:[%s440_s2 + $0x18] sm:$0xff] }
   0x5   :  { %v259_v17 = vcombine.low %v25_v7, %v26_v10  ;;  %v41_v19 = vld [vmem:[%s440_s2 + $0x10] sm:$0xff]  ;;  %v260_v20 = vcombine.low %v27_v14, %v28_v15  ;;  %302 = vmatprep.mubr.msk.bf16.mxu1 %vm131_vm0, %v318_v18  ;;  %49 = vperm.xlu0 %315, %v39_v23   ;;  %v40_v25 = vld [vmem:[%s440_s2 + $0x8] sm:$0xff]  ;;  %v43_v28 = vld [vmem:[%s440_s2 + $0x20] sm:$0xff] }
   0x6   :  { %290 = vmatprep.subr.bf16.mxu0 %v258_v13  ;;  %306 = vmatprep.subr.bf16.mxu1 %v258_v13  ;;  %v261_v26 = vcombine.low %v29_v21, %v30_v22  ;;  %v44_v27 = vld [vmem:[%s440_s2 + $0x28] sm:$0xff]  ;;  %v320_v30 = vld [vmem:[%s439_s1 + $0x18] sm:$0xff]   ;;  %v45_v32 = vld [vmem:[%s440_s2 + $0x30] sm:$0xff] }
   0x7   :  { %291 = vmatpush3.bf16.msra.mxu0 %v258_v13  ;;  %310 = vmatpush3.bf16.msra.mxu1 %v258_v13  ;;  %v319_v29 = vld [vmem:[%s439_s1 + $0x8] sm:$0xff]   ;;  %v46_v31 = vld [vmem:[%s440_s2 + $0x38] sm:$0xff] }
   0x8   :  { %292 = vmatprep.subr.bf16.mxu0 %v259_v17  ;;  %307 = vmatprep.subr.bf16.mxu1 %v259_v17 }
   0x9   :  { %59 = vperm.xlu1 %316, %v41_v19   ;;  %54 = vperm.xlu0 %315, %v40_v25  }
   0xb   :  { %293 = vmatpush3.bf16.msra.mxu0 %v259_v17  ;;  %311 = vmatpush3.bf16.msra.mxu1 %v259_v17 }
   0xc   :  { %294 = vmatprep.subr.bf16.mxu0 %v260_v20  ;;  %308 = vmatprep.subr.bf16.mxu1 %v260_v20 }
   0xd   :  { %64 = vperm.xlu1 %316, %v42_v24   ;;  %69 = vperm.xlu0 %315, %v43_v28  }
   0xf   :  { %295 = vmatpush3.bf16.msra.mxu0 %v260_v20  ;;  %312 = vmatpush3.bf16.msra.mxu1 %v260_v20 }
  0x10   :  { %296 = vmatprep.subr.bf16.mxu0 %v261_v26  ;;  %309 = vmatprep.subr.bf16.mxu1 %v261_v26 }
  0x11   :  { %74 = vperm.xlu1 %316, %v44_v27   ;;  %79 = vperm.xlu0 %315, %v45_v32  }
  0x13   :  { %297 = vmatpush3.bf16.msra.mxu0 %v261_v26  ;;  %313 = vmatpush3.bf16.msra.mxu1 %v261_v26 }
  0x15   :  { %84 = vperm.xlu1 %316, %v46_v31  }
  0x16   :  { %299 = vmatmul.mubr.msk.bf16.vlgmr.msra.gmra.mrb[0].mxu0 %vm131_vm0, %v319_v29  ;;  %303 = vmatmul.mubr.msk.bf16.vlgmr.msra.gmra.mrb[0].mxu1 %vm131_vm0, %v320_v30 }
  0x84   :  { %v50_v34 = vpop.permute.xlu0 %49 }
  0x88   :  { %v60_v33 = vpop.permute.xlu1 %59  ;;  %v55_v36 = vpop.permute.xlu0 %54 }
  0x8c   :  { %v65_v35 = vpop.permute.xlu1 %64  ;;  %v70_v38 = vpop.permute.xlu0 %69 }
  0x90   :  { %v75_v37 = vpop.permute.xlu1 %74  ;;  %v80_v40 = vpop.permute.xlu0 %79 }
  0x94   :  { %v85_v39 = vpop.permute.xlu1 %84 }
  0xe9   :  { %v300_v41 = vpop.f32.mrb[0].mxu0  ;;  %v304_v42 = vpop.f32.mrb[0].mxu1 }
  0xea   :  { %v187_v43 = vadd.f32 %v300_v41, %v60_v33  ;;  %v203_v44 = vadd.f32 %v304_v42, %v80_v40  ;;  %v178_v45 = vpop.f32.mrb[1].mxu0  ;;  %v194_v46 = vpop.f32.mrb[1].mxu1 }
  0xeb   :  { %v179_v47 = vadd.f32 %v178_v45, %v50_v34  ;;  %v195_v48 = vadd.f32 %v194_v46, %v70_v38  ;;  %v301_v49 = vpop.f32.mrb[2].mxu0  ;;  %v305_v50 = vpop.f32.mrb[2].mxu1 }
  0xec   :  { %v276_v51 = vpack.c.bf16 %v187_v43, %v187_v43  ;;  %v280_v52 = vpack.c.bf16 %v203_v44, %v203_v44  ;;  %v190_v53 = vadd.f32 %v301_v49, %v65_v35  ;;  %v206_v54 = vadd.f32 %v305_v50, %v85_v39  ;;  %v181_v55 = vpop.f32.mrb[3].mxu0  ;;  %v197_v56 = vpop.f32.mrb[3].mxu1 }
  0xed   :  { %v274_v57 = vpack.c.bf16 %v179_v47, %v179_v47  ;;  %v278_v58 = vpack.c.bf16 %v195_v48, %v195_v48  ;;  %v182_v59 = vadd.f32 %v181_v55, %v55_v36  ;;  %v198_v60 = vadd.f32 %v197_v56, %v75_v37 }
  0xee   :  { %244 = vst.msk [vmem:[%s441_s3 + $0x8] sm:$0xf] %vm241_vm1, %v276_v51  ;;  %248 = vst.msk [vmem:[%s441_s3 + $0x18] sm:$0xf] %vm241_vm1, %v280_v52  ;;  %v277_v61 = vpack.c.bf16 %v190_v53, %v190_v53  ;;  %v281_v62 = vpack.c.bf16 %v206_v54, %v206_v54 }
  0xef   :  { %242 = vst.msk [vmem:[%s441_s3] sm:$0xf] %vm241_vm1, %v274_v57  ;;  %246 = vst.msk [vmem:[%s441_s3 + $0x10] sm:$0xf] %vm241_vm1, %v278_v58  ;;  %v275_v63 = vpack.c.bf16 %v182_v59, %v182_v59  ;;  %v279_v0 = vpack.c.bf16 %v198_v60, %v198_v60 }
  0xf0   :  { %245 = vst.msk [vmem:[%s441_s3 + $0xc] sm:$0xf] %vm241_vm1, %v277_v61  ;;  %249 = vst.msk [vmem:[%s441_s3 + $0x1c] sm:$0xf] %vm241_vm1, %v281_v62 }
  0xf1   :  { %243 = vst.msk [vmem:[%s441_s3 + $0x4] sm:$0xf] %vm241_vm1, %v275_v63  ;;  %247 = vst.msk [vmem:[%s441_s3 + $0x14] sm:$0xf] %vm241_vm1, %v279_v0 }

// kernel: network_forward.45
= control target key start
LH: loop header
LB: loop body
LE: loop exit
PB: predicated region body
PF: predicated region fallthrough
CT: control target
= control target key end

     0   :  { %v381_v0 = vmov 0   ;;  %vm160_vm0 = vcmask 130048   ;;  %s598_s1 = inlined_call_operand.vmem [shape: bf16[144,128], index: 1, kind: input, shape index: {}]   ;;  %s599_s0 = inlined_call_operand.vmem [shape: bf16[144,128], index: 0, kind: input, shape index: {}]   ;;  %s600_s3 = inlined_call_operand.vmem [shape: bf16[16,144], index: 3, kind: input, shape index: {}]   ;;  %s601_s2 = inlined_call_operand.vmem [shape: bf16[16,144], index: 2, kind: input, shape index: {}]   ;;  %s602_s4 = inlined_call_operand.vmem [shape: f32[16,1], index: 4, kind: input, shape index: {}]   ;;  %s603_s5 = inlined_call_operand.vmem [shape: bf16[16,128], index: 5, kind: output, shape index: {}]  }
   0x1   :  { %164 = vmatprep.subr.bf16.mxu0 %v381_v0  ;;  %271 = vmatprep.subr.bf16.mxu1 %v381_v0  ;;  %v59_v1 = vld [vmem:[%s598_s1] sm:$0xf]  ;;  %v60_v2 = vld [vmem:[%s598_s1 + $0x4] sm:$0xf]  ;;  %v61_v8 = vld [vmem:[%s598_s1 + $0x8] sm:$0xf] }
   0x2   :  { %v21_v3 = vld [vmem:[%s599_s0] sm:$0xf]  ;;  %v77_v4 = vmax.bf16 %v381_v0, %v59_v1  ;;  %v78_v5 = vmax.bf16 %v381_v0, %v60_v2  ;;  %v22_v6 = vld [vmem:[%s599_s0 + $0x4] sm:$0xf]  ;;  %v62_v9 = vld [vmem:[%s598_s1 + $0xc] sm:$0xf]  ;;  %374 = vset.pattern.permute.xlu0 %v381_v0  ;;  %v79_v11 = vmax.bf16 %v381_v0, %v61_v8 }
   0x3   :  { %v39_v7 = vmax.bf16 %v381_v0, %v21_v3  ;;  %v40_v10 = vmax.bf16 %v381_v0, %v22_v6  ;;  %v80_v12 = vmax.bf16 %v381_v0, %v62_v9  ;;  %v23_v13 = vld [vmem:[%s599_s0 + $0x8] sm:$0xf]  ;;  %v24_v14 = vld [vmem:[%s599_s0 + $0xc] sm:$0xf]  ;;  %v63_v15 = vld [vmem:[%s598_s1 + $0x10] sm:$0xf] }
   0x4   :  { %v342_v16 = vcombine.low %v77_v4, %v78_v5  ;;  %v41_v17 = vmax.bf16 %v381_v0, %v23_v13  ;;  %v42_v18 = vmax.bf16 %v381_v0, %v24_v14  ;;  %v64_v19 = vld [vmem:[%s598_s1 + $0x14] sm:$0xf]  ;;  %v25_v20 = vld [vmem:[%s599_s0 + $0x10] sm:$0xf]  ;;  %v81_v24 = vmax.bf16 %v381_v0, %v63_v15  ;;  %v65_v29 = vld [vmem:[%s598_s1 + $0x18] sm:$0xf] }
   0x5   :  { %v26_v21 = vld [vmem:[%s599_s0 + $0x14] sm:$0xf]  ;;  %v354_v22 = vcombine.low %v39_v7, %v40_v10  ;;  %v343_v23 = vcombine.low %v79_v11, %v80_v12  ;;  %v82_v25 = vmax.bf16 %v381_v0, %v64_v19  ;;  %v43_v27 = vmax.bf16 %v381_v0, %v25_v20  ;;  %v66_v30 = vld [vmem:[%s598_s1 + $0x1c] sm:$0xf]  ;;  %v27_v31 = vld [vmem:[%s599_s0 + $0x18] sm:$0xf] }
   0x6   :  { %165 = vmatpush1.bf16.msra.mxu0 %v342_v16  ;;  %v355_v26 = vcombine.low %v41_v17, %v42_v18  ;;  %v44_v28 = vmax.bf16 %v381_v0, %v26_v21  ;;  %v28_v32 = vld [vmem:[%s599_s0 + $0x1c] sm:$0xf]  ;;  %v83_v34 = vmax.bf16 %v381_v0, %v65_v29  ;;  %v84_v35 = vmax.bf16 %v381_v0, %v66_v30  ;;  %v67_v39 = vld [vmem:[%s598_s1 + $0x20] sm:$0xf]  ;;  %v68_v40 = vld [vmem:[%s598_s1 + $0x24] sm:$0xf] }
   0x7   :  { %272 = vmatpush1.bf16.msra.mxu1 %v354_v22  ;;  %166 = vmatprep.subr.bf16.mxu0 %v381_v0  ;;  %v344_v33 = vcombine.low %v81_v24, %v82_v25  ;;  %v45_v37 = vmax.bf16 %v381_v0, %v27_v31  ;;  %v46_v38 = vmax.bf16 %v381_v0, %v28_v32  ;;  %v29_v41 = vld [vmem:[%s599_s0 + $0x20] sm:$0xf]  ;;  %v30_v42 = vld [vmem:[%s599_s0 + $0x24] sm:$0xf]  ;;  %v69_v43 = vld [vmem:[%s598_s1 + $0x28] sm:$0xf] }
   0x8   :  { %273 = vmatprep.subr.bf16.mxu1 %v381_v0  ;;  %v356_v36 = vcombine.low %v43_v27, %v44_v28  ;;  %v345_v44 = vcombine.low %v83_v34, %v84_v35  ;;  %v85_v45 = vmax.bf16 %v381_v0, %v67_v39  ;;  %v86_v46 = vmax.bf16 %v381_v0, %v68_v40  ;;  %v377_v47 = vld [vmem:[%s600_s3 + $0x4] ss:$8 sps:$4 sm:$0xff]   ;;  %v31_v54 = vld [vmem:[%s599_s0 + $0x28] sm:$0xf]  ;;  %v71_v63 = vld [vmem:[%s598_s1 + $0x30] sm:$0xf] }
   0x9   :  { %v357_v48 = vcombine.low %v45_v37, %v46_v38  ;;  %v47_v49 = vmax.bf16 %v381_v0, %v29_v41  ;;  %v48_v50 = vmax.bf16 %v381_v0, %v30_v42  ;;  %v70_v51 = vld [vmem:[%s598_s1 + $0x2c] sm:$0xf]  ;;  %v312_v53 = vld [vmem:[%s602_s4] sm:$0xff]  ;;  %351 = vmatprep.mubr.msk.bf16.mxu0 %vm160_vm0, %v377_v47  ;;  %v87_v57 = vmax.bf16 %v381_v0, %v69_v43  ;;  %v72_v1 = vld [vmem:[%s598_s1 + $0x34] sm:$0xf] }
   0xa   :  { %167 = vmatpush1.bf16.msra.mxu0 %v343_v23  ;;  %v380_v52 = vld [vmem:[%s601_s2 + $0x4] ss:$8 sps:$4 sm:$0xff]   ;;  %316 = vperm.xlu0 %374, %v312_v53   ;;  %v346_v56 = vcombine.low %v85_v45, %v86_v46  ;;  %v88_v58 = vmax.bf16 %v381_v0, %v70_v51  ;;  %v49_v61 = vmax.bf16 %v381_v0, %v31_v54  ;;  %v33_v2 = vld [vmem:[%s599_s0 + $0x30] sm:$0xf]  ;;  %v34_v3 = vld [vmem:[%s599_s0 + $0x34] sm:$0xf] }
   0xb   :  { %274 = vmatpush1.bf16.msra.mxu1 %v355_v26  ;;  %168 = vmatprep.subr.bf16.mxu0 %v381_v0  ;;  %v32_v55 = vld [vmem:[%s599_s0 + $0x2c] sm:$0xf]  ;;  %v358_v60 = vcombine.low %v47_v49, %v48_v50  ;;  %v89_v5 = vmax.bf16 %v381_v0, %v71_v63  ;;  %v90_v6 = vmax.bf16 %v381_v0, %v72_v1  ;;  %v73_v10 = vld [vmem:[%s598_s1 + $0x38] sm:$0xf]  ;;  %v74_v11 = vld [vmem:[%s598_s1 + $0x3c] sm:$0xf] }
   0xc   :  { %275 = vmatprep.subr.bf16.mxu1 %v381_v0  ;;  %363 = vmatprep.mubr.msk.bf16.mxu1 %vm160_vm0, %v380_v52  ;;  %v313_v59 = vld [vmem:[%s602_s4 + $0x8] sm:$0xff]  ;;  %v50_v62 = vmax.bf16 %v381_v0, %v32_v55  ;;  %v347_v4 = vcombine.low %v87_v57, %v88_v58  ;;  %v51_v8 = vmax.bf16 %v381_v0, %v33_v2  ;;  %v35_v12 = vld [vmem:[%s599_s0 + $0x38] sm:$0xf]  ;;  %v36_v13 = vld [vmem:[%s599_s0 + $0x3c] sm:$0xf] }
   0xd   :  { %v52_v9 = vmax.bf16 %v381_v0, %v34_v3  ;;  %v348_v14 = vcombine.low %v89_v5, %v90_v6  ;;  %v91_v15 = vmax.bf16 %v381_v0, %v73_v10  ;;  %v92_v16 = vmax.bf16 %v381_v0, %v74_v11  ;;  %v75_v20 = vld [vmem:[%s598_s1 + $0x40] sm:$0xf]  ;;  %v76_v21 = vld [vmem:[%s598_s1 + $0x44] sm:$0xf] }
   0xe   :  { %169 = vmatpush1.bf16.msra.mxu0 %v344_v33  ;;  %321 = vperm.xlu0 %374, %v313_v59   ;;  %v359_v7 = vcombine.low %v49_v61, %v50_v62  ;;  %v53_v18 = vmax.bf16 %v381_v0, %v35_v12  ;;  %v54_v19 = vmax.bf16 %v381_v0, %v36_v13  ;;  %v37_v22 = vld [vmem:[%s599_s0 + $0x40] sm:$0xf]  ;;  %v38_v23 = vld [vmem:[%s599_s0 + $0x44] sm:$0xf] }
   0xf   :  { %276 = vmatpush1.bf16.msra.mxu1 %v356_v36  ;;  %170 = vmatprep.subr.bf16.mxu0 %v381_v0  ;;  %v360_v17 = vcombine.low %v51_v8, %v52_v9  ;;  %v349_v24 = vcombine.low %v91_v15, %v92_v16  ;;  %v93_v25 = vmax.bf16 %v381_v0, %v75_v20  ;;  %v375_v32 = vld [vmem:[%s600_s3] ss:$8 sps:$4 sm:$0xff]  }
  0x10   :  { %277 = vmatprep.subr.bf16.mxu1 %v381_v0  ;;  %v94_v26 = vmax.bf16 %v381_v0, %v76_v21  ;;  %v361_v27 = vcombine.low %v53_v18, %v54_v19  ;;  %v55_v28 = vmax.bf16 %v381_v0, %v37_v22  ;;  %v56_v29 = vmax.bf16 %v381_v0, %v38_v23  ;;  %v378_v33 = vld [vmem:[%s601_s2] ss:$8 sps:$4 sm:$0xff]  }
  0x12   :  { %171 = vmatpush1.bf16.msra.mxu0 %v345_v44  ;;  %v350_v30 = vcombine.low %v93_v25, %v94_v26  ;;  %v362_v31 = vcombine.low %v55_v28, %v56_v29 }
  0x13   :  { %278 = vmatpush1.bf16.msra.mxu1 %v357_v48  ;;  %172 = vmatprep.subr.bf16.mxu0 %v381_v0 }
  0x14   :  { %279 = vmatprep.subr.bf16.mxu1 %v381_v0 }
  0x16   :  { %173 = vmatpush1.bf16.msra.mxu0 %v346_v56 }
  0x17   :  { %280 = vmatpush1.bf16.msra.mxu1 %v358_v60  ;;  %174 = vmatprep.subr.bf16.mxu0 %v381_v0 }
  0x18   :  { %281 = vmatprep.subr.bf16.mxu1 %v381_v0 }
  0x1a   :  { %175 = vmatpush1.bf16.msra.mxu0 %v347_v4 }
  0x1b   :  { %282 = vmatpush1.bf16.msra.mxu1 %v359_v7  ;;  %176 = vmatprep.subr.bf16.mxu0 %v381_v0 }
  0x1c   :  { %283 = vmatprep.subr.bf16.mxu1 %v381_v0 }
  0x1e   :  { %177 = vmatpush1.bf16.msra.mxu0 %v348_v14 }
  0x1f   :  { %284 = vmatpush1.bf16.msra.mxu1 %v360_v17  ;;  %178 = vmatprep.subr.bf16.mxu0 %v381_v0 }
  0x20   :  { %285 = vmatprep.subr.bf16.mxu1 %v381_v0 }
  0x22   :  { %179 = vmatpush1.bf16.msra.mxu0 %v349_v24 }
  0x23   :  { %286 = vmatpush1.bf16.msra.mxu1 %v361_v27  ;;  %180 = vmatprep.subr.bf16.mxu0 %v381_v0 }
  0x24   :  { %287 = vmatprep.subr.bf16.mxu1 %v381_v0 }
  0x26   :  { %181 = vmatpush1.bf16.msra.mxu0 %v350_v30 }
  0x27   :  { %288 = vmatpush1.bf16.msra.mxu1 %v362_v31 }
  0x29   :  { %197 = vmatmul.mubr.bf16.vlgmr.msra.gmra.mrb[0].mxu0 %v375_v32 }
  0x2a   :  { %304 = vmatmul.mubr.bf16.vlgmr.msra.gmra.mrb[0].mxu1 %v378_v33 }
  0x89   :  { %v317_v34 = vpop.permute.xlu0 %316 }
  0x8d   :  { %v322_v44 = vpop.permute.xlu0 %321 }
  0xfc   :  { %v198_v35 = vpop.f32.mrb[0].mxu0 }
  0xfd   :  { %v305_v36 = vpop.f32.mrb[0].mxu1  ;;  %v200_v37 = vpop.f32.mrb[1].mxu0 }
  0xfe   :  { %v306_v38 = vadd.f32 %v305_v36, %v198_v35  ;;  %v307_v39 = vpop.f32.mrb[1].mxu1  ;;  %v201_v40 = vpop.f32.mrb[2].mxu0 }
  0xff   :  { %v308_v0 = vpop.f32.mrb[2].mxu1  ;;  %v203_v41 = vpop.f32.mrb[3].mxu0 }
 0x100   :  { %v309_v42 = vadd.f32 %v308_v0, %v201_v40  ;;  %v310_v43 = vpop.f32.mrb[3].mxu1  ;;  %v324_v45 = vadd.f32 %v317_v34, %v306_v38 }
 0x102   :  { %v325_v46 = vadd.f32 %v322_v44, %v309_v42 }
 0x104   :  { %v371_v47 = vpack.c.bf16 %v325_v46, %v324_v45 }
 0x106   :  { %372 = vst [vmem:[%s603_s5] sm:$0xff] %v371_v47  }

// kernel: network_forward.60
= control target key start
LH: loop header
LB: loop body
LE: loop exit
PB: predicated region body
PF: predicated region fallthrough
CT: control target
= control target key end

     0   :  { %v343_v3 = vmov 0   ;;  %vm131_vm0 = vcmask 523264   ;;  %s440_s0 = inlined_call_operand.vmem [shape: bf16[64,128], index: 0, kind: input, shape index: {}]   ;;  %s441_s1 = inlined_call_operand.vmem [shape: bf16[64,64], index: 1, kind: input, shape index: {}]   ;;  %s442_s2 = inlined_call_operand.vmem [shape: f32[64,1], index: 2, kind: input, shape index: {}]   ;;  %s443_s3 = inlined_call_operand.vmem [shape: bf16[64,128], index: 3, kind: output, shape index: {}]  }
   0x1   :  { %v15_v0 = vld [vmem:[%s440_s0] sm:$0xf]  ;;  %v16_v1 = vld [vmem:[%s440_s0 + $0x4] sm:$0xf]  ;;  %v17_v2 = vld [vmem:[%s440_s0 + $0x8] sm:$0xf]  ;;  %338 = vset.pattern.permute.xlu1 %v343_v3  ;;  %337 = vset.pattern.permute.xlu0 %v343_v3 }
   0x2   :  { %v23_v4 = vmax.bf16 %v343_v3, %v15_v0  ;;  %v24_v5 = vmax.bf16 %v343_v3, %v16_v1  ;;  %v18_v6 = vld [vmem:[%s440_s0 + $0xc] sm:$0xf]  ;;  %v25_v7 = vmax.bf16 %v343_v3, %v17_v2  ;;  %v19_v8 = vld [vmem:[%s440_s0 + $0x10] sm:$0xf]  ;;  %v20_v9 = vld [vmem:[%s440_s0 + $0x14] sm:$0xf] }
   0x3   :  { %v26_v10 = vmax.bf16 %v343_v3, %v18_v6  ;;  %v21_v11 = vld [vmem:[%s440_s0 + $0x18] sm:$0xf]  ;;  %v22_v12 = vld [vmem:[%s440_s0 + $0x1c] sm:$0xf]  ;;  %v27_v14 = vmax.bf16 %v343_v3, %v19_v8  ;;  %v28_v15 = vmax.bf16 %v343_v3, %v20_v9  ;;  %v339_v16 = vld [vmem:[%s441_s1] sm:$0xff]  }
   0x4   :  { %v257_v13 = vcombine.low %v23_v4, %v24_v5  ;;  %v340_v18 = vld [vmem:[%s441_s1 + $0x10] sm:$0xff]   ;;  %v29_v21 = vmax.bf16 %v343_v3, %v21_v11  ;;  %v30_v22 = vmax.bf16 %v343_v3, %v22_v12  ;;  %v39_v23 = vld [vmem:[%s442_s2] sm:$0xff]  ;;  %320 = vmatprep.mubr.msk.bf16.mxu0 %vm131_vm0, %v339_v16  ;;  %v42_v24 = vld [vmem:[%s442_s2 + $0x18] sm:$0xff] }
   0x5   :  { %v258_v17 = vcombine.low %v25_v7, %v26_v10  ;;  %v41_v19 = vld [vmem:[%s442_s2 + $0x10] sm:$0xff]  ;;  %v259_v20 = vcombine.low %v27_v14, %v28_v15  ;;  %324 = vmatprep.mubr.msk.bf16.mxu1 %vm131_vm0, %v340_v18  ;;  %49 = vperm.xlu0 %337, %v39_v23   ;;  %v40_v25 = vld [vmem:[%s442_s2 + $0x8] sm:$0xff]  ;;  %v43_v28 = vld [vmem:[%s442_s2 + $0x20] sm:$0xff] }
   0x6   :  { %312 = vmatprep.subr.bf16.mxu0 %v257_v13  ;;  %328 = vmatprep.subr.bf16.mxu1 %v257_v13  ;;  %v260_v26 = vcombine.low %v29_v21, %v30_v22  ;;  %v44_v27 = vld [vmem:[%s442_s2 + $0x28] sm:$0xff]  ;;  %v342_v30 = vld [vmem:[%s441_s1 + $0x18] sm:$0xff]   ;;  %v45_v32 = vld [vmem:[%s442_s2 + $0x30] sm:$0xff] }
   0x7   :  { %313 = vmatpush3.bf16.msra.mxu0 %v257_v13  ;;  %332 = vmatpush3.bf16.msra.mxu1 %v257_v13  ;;  %v341_v29 = vld [vmem:[%s441_s1 + $0x8] sm:$0xff]   ;;  %v46_v31 = vld [vmem:[%s442_s2 + $0x38] sm:$0xff] }
   0x8   :  { %314 = vmatprep.subr.bf16.mxu0 %v258_v17  ;;  %329 = vmatprep.subr.bf16.mxu1 %v258_v17 }
   0x9   :  { %59 = vperm.xlu1 %338, %v41_v19   ;;  %54 = vperm.xlu0 %337, %v40_v25  }
   0xb   :  { %315 = vmatpush3.bf16.msra.mxu0 %v258_v17  ;;  %333 = vmatpush3.bf16.msra.mxu1 %v258_v17 }
   0xc   :  { %316 = vmatprep.subr.bf16.mxu0 %v259_v20  ;;  %330 = vmatprep.subr.bf16.mxu1 %v259_v20 }
   0xd   :  { %64 = vperm.xlu1 %338, %v42_v24   ;;  %69 = vperm.xlu0 %337, %v43_v28  }
   0xf   :  { %317 = vmatpush3.bf16.msra.mxu0 %v259_v20  ;;  %334 = vmatpush3.bf16.msra.mxu1 %v259_v20 }
  0x10   :  { %318 = vmatprep.subr.bf16.mxu0 %v260_v26  ;;  %331 = vmatprep.subr.bf16.mxu1 %v260_v26 }
  0x11   :  { %74 = vperm.xlu1 %338, %v44_v27   ;;  %79 = vperm.xlu0 %337, %v45_v32  }
  0x13   :  { %319 = vmatpush3.bf16.msra.mxu0 %v260_v26  ;;  %335 = vmatpush3.bf16.msra.mxu1 %v260_v26 }
  0x15   :  { %84 = vperm.xlu1 %338, %v46_v31  }
  0x16   :  { %321 = vmatmul.mubr.msk.bf16.vlgmr.msra.gmra.mrb[0].mxu0 %vm131_vm0, %v341_v29  ;;  %325 = vmatmul.mubr.msk.bf16.vlgmr.msra.gmra.mrb[0].mxu1 %vm131_vm0, %v342_v30 }
  0x84   :  { %v50_v34 = vpop.permute.xlu0 %49 }
  0x88   :  { %v60_v33 = vpop.permute.xlu1 %59  ;;  %v55_v36 = vpop.permute.xlu0 %54 }
  0x8c   :  { %v65_v35 = vpop.permute.xlu1 %64  ;;  %v70_v38 = vpop.permute.xlu0 %69 }
  0x90   :  { %v75_v37 = vpop.permute.xlu1 %74  ;;  %v80_v40 = vpop.permute.xlu0 %79 }
  0x94   :  { %v85_v39 = vpop.permute.xlu1 %84 }
  0xe9   :  { %v322_v41 = vpop.f32.mrb[0].mxu0  ;;  %v326_v42 = vpop.f32.mrb[0].mxu1 }
  0xea   :  { %v178_v43 = vpop.f32.mrb[1].mxu0  ;;  %v194_v44 = vpop.f32.mrb[1].mxu1  ;;  %v187_v47 = vadd.f32 %v322_v41, %v60_v33  ;;  %v203_v48 = vadd.f32 %v326_v42, %v80_v40 }
  0xeb   :  { %v323_v45 = vpop.f32.mrb[2].mxu0  ;;  %v327_v46 = vpop.f32.mrb[2].mxu1  ;;  %v179_v53 = vadd.f32 %v178_v43, %v50_v34  ;;  %v195_v54 = vadd.f32 %v194_v44, %v70_v38 }
  0xec   :  { %v190_v49 = vadd.f32 %v323_v45, %v65_v35  ;;  %v206_v50 = vadd.f32 %v327_v46, %v85_v39  ;;  %v181_v51 = vpop.f32.mrb[3].mxu0  ;;  %v197_v52 = vpop.f32.mrb[3].mxu1 }
  0xed   :  { %v182_v55 = vadd.f32 %v181_v51, %v55_v36  ;;  %v198_v56 = vadd.f32 %v197_v52, %v75_v37 }
  0xee   :  { %v289_v57 = vpack.c.bf16 %v190_v49, %v187_v47  ;;  %v299_v58 = vpack.c.bf16 %v206_v50, %v203_v48 }
  0xef   :  { %v284_v59 = vpack.c.bf16 %v182_v55, %v179_v53  ;;  %v294_v60 = vpack.c.bf16 %v198_v56, %v195_v54 }
  0xf0   :  { %301 = vst [vmem:[%s443_s3 + $0x8] sm:$0xff] %v289_v57   ;;  %303 = vst [vmem:[%s443_s3 + $0x18] sm:$0xff] %v299_v58  }
  0xf1   :  { %285 = vst [vmem:[%s443_s3] sm:$0xff] %v284_v59   ;;  %302 = vst [vmem:[%s443_s3 + $0x10] sm:$0xff] %v294_v60  }

// kernel: network_forward.58
= control target key start
LH: loop header
LB: loop body
LE: loop exit
PB: predicated region body
PF: predicated region fallthrough
CT: control target
= control target key end

     0   :  { %v549_v0 = vmov 0   ;;  %vm166_vm0 = vcmask 130048   ;;  %s864_s1 = inlined_call_operand.vmem [shape: bf16[144,128], index: 1, kind: input, shape index: {}]   ;;  %s865_s0 = inlined_call_operand.vmem [shape: bf16[144,128], index: 0, kind: input, shape index: {}]   ;;  %s866_s4 = inlined_call_operand.vmem [shape: bf16[16,144], index: 4, kind: input, shape index: {}]   ;;  %s867_s3 = inlined_call_operand.vmem [shape: bf16[16,144], index: 3, kind: input, shape index: {}]   ;;  %s868_s5 = inlined_call_operand.vmem [shape: bf16[16,144], index: 5, kind: input, shape index: {}]   ;;  %s869_s6 = inlined_call_operand.vmem [shape: f32[16,1], index: 6, kind: input, shape index: {}]   ;;  %s870_s2 = inlined_call_operand.vmem [shape: bf16[144,128], index: 2, kind: input, shape index: {}]   ;;  %s871_s7 = inlined_call_operand.vmem [shape: bf16[16,128], index: 7, kind: output, shape index: {}]  }
   0x1   :  { %170 = vmatprep.subr.bf16.mxu0 %v549_v0  ;;  %277 = vmatprep.subr.bf16.mxu1 %v549_v0  ;;  %v65_v1 = vld [vmem:[%s864_s1] sm:$0xf]  ;;  %v66_v2 = vld [vmem:[%s864_s1 + $0x4] sm:$0xf]  ;;  %v67_v8 = vld [vmem:[%s864_s1 + $0x8] sm:$0xf] }
   0x2   :  { %v27_v3 = vld [vmem:[%s865_s0] sm:$0xf]  ;;  %v83_v4 = vmax.bf16 %v549_v0, %v65_v1  ;;  %v84_v5 = vmax.bf16 %v549_v0, %v66_v2  ;;  %v28_v6 = vld [vmem:[%s865_s0 + $0x4] sm:$0xf]  ;;  %v68_v9 = vld [vmem:[%s864_s1 + $0xc] sm:$0xf]  ;;  %539 = vset.pattern.permute.xlu0 %v549_v0  ;;  %v85_v11 = vmax.bf16 %v549_v0, %v67_v8 }
   0x3   :  { %v45_v7 = vmax.bf16 %v549_v0, %v27_v3  ;;  %v46_v10 = vmax.bf16 %v549_v0, %v28_v6  ;;  %v86_v12 = vmax.bf16 %v549_v0, %v68_v9  ;;  %v29_v13 = vld [vmem:[%s865_s0 + $0x8] sm:$0xf]  ;;  %v30_v14 = vld [vmem:[%s865_s0 + $0xc] sm:$0xf]  ;;  %v69_v15 = vld [vmem:[%s864_s1 + $0x10] sm:$0xf] }
   0x4   :  { %v495_v16 = vcombine.low %v83_v4, %v84_v5  ;;  %v47_v17 = vmax.bf16 %v549_v0, %v29_v13  ;;  %v48_v18 = vmax.bf16 %v549_v0, %v30_v14  ;;  %v70_v19 = vld [vmem:[%s864_s1 + $0x14] sm:$0xf]  ;;  %v31_v20 = vld [vmem:[%s865_s0 + $0x10] sm:$0xf]  ;;  %v87_v24 = vmax.bf16 %v549_v0, %v69_v15  ;;  %v71_v29 = vld [vmem:[%s864_s1 + $0x18] sm:$0xf] }
   0x5   :  { %v32_v21 = vld [vmem:[%s865_s0 + $0x14] sm:$0xf]  ;;  %v507_v22 = vcombine.low %v45_v7, %v46_v10  ;;  %v496_v23 = vcombine.low %v85_v11, %v86_v12  ;;  %v88_v25 = vmax.bf16 %v549_v0, %v70_v19  ;;  %v49_v27 = vmax.bf16 %v549_v0, %v31_v20  ;;  %v72_v30 = vld [vmem:[%s864_s1 + $0x1c] sm:$0xf]  ;;  %v33_v31 = vld [vmem:[%s865_s0 + $0x18] sm:$0xf] }
   0x6   :  { %171 = vmatpush1.bf16.msra.mxu0 %v495_v16  ;;  %v508_v26 = vcombine.low %v47_v17, %v48_v18  ;;  %v50_v28 = vmax.bf16 %v549_v0, %v32_v21  ;;  %v34_v32 = vld [vmem:[%s865_s0 + $0x1c] sm:$0xf]  ;;  %v89_v34 = vmax.bf16 %v549_v0, %v71_v29  ;;  %v90_v35 = vmax.bf16 %v549_v0, %v72_v30  ;;  %v73_v39 = vld [vmem:[%s864_s1 + $0x20] sm:$0xf]  ;;  %v74_v40 = vld [vmem:[%s864_s1 + $0x24] sm:$0xf] }
   0x7   :  { %278 = vmatpush1.bf16.msra.mxu1 %v507_v22  ;;  %172 = vmatprep.subr.bf16.mxu0 %v549_v0  ;;  %v497_v33 = vcombine.low %v87_v24, %v88_v25  ;;  %v51_v37 = vmax.bf16 %v549_v0, %v33_v31  ;;  %v52_v38 = vmax.bf16 %v549_v0, %v34_v32  ;;  %v35_v41 = vld [vmem:[%s865_s0 + $0x20] sm:$0xf]  ;;  %v36_v42 = vld [vmem:[%s865_s0 + $0x24] sm:$0xf]  ;;  %v75_v50 = vld [vmem:[%s864_s1 + $0x28] sm:$0xf] }
   0x8   :  { %279 = vmatprep.subr.bf16.mxu1 %v549_v0  ;;  %v509_v36 = vcombine.low %v49_v27, %v50_v28  ;;  %v498_v43 = vcombine.low %v89_v34, %v90_v35  ;;  %v91_v44 = vmax.bf16 %v549_v0, %v73_v39  ;;  %v92_v45 = vmax.bf16 %v549_v0, %v74_v40  ;;  %v542_v46 = vld [vmem:[%s866_s4 + $0x4] ss:$8 sps:$4 sm:$0xff]   ;;  %v37_v53 = vld [vmem:[%s865_s0 + $0x28] sm:$0xf]  ;;  %v77_v61 = vld [vmem:[%s864_s1 + $0x30] sm:$0xf] }
   0x9   :  { %v510_v47 = vcombine.low %v51_v37, %v52_v38  ;;  %v53_v48 = vmax.bf16 %v549_v0, %v35_v41  ;;  %v54_v49 = vmax.bf16 %v549_v0, %v36_v42  ;;  %v76_v51 = vld [vmem:[%s864_s1 + $0x2c] sm:$0xf]  ;;  %504 = vmatprep.mubr.msk.bf16.mxu0 %vm166_vm0, %v542_v46  ;;  %v93_v56 = vmax.bf16 %v549_v0, %v75_v50  ;;  %v78_v62 = vld [vmem:[%s864_s1 + $0x34] sm:$0xf]  ;;  %v39_v63 = vld [vmem:[%s865_s0 + $0x30] sm:$0xf] }
   0xa   :  { %173 = vmatpush1.bf16.msra.mxu0 %v496_v23  ;;  %v545_v52 = vld [vmem:[%s867_s3 + $0x4] ss:$8 sps:$4 sm:$0xff]   ;;  %v499_v55 = vcombine.low %v91_v44, %v92_v45  ;;  %v94_v57 = vmax.bf16 %v549_v0, %v76_v51  ;;  %v55_v59 = vmax.bf16 %v549_v0, %v37_v53  ;;  %v40_v1 = vld [vmem:[%s865_s0 + $0x34] sm:$0xf]  ;;  %v95_v3 = vmax.bf16 %v549_v0, %v77_v61  ;;  %v79_v8 = vld [vmem:[%s864_s1 + $0x38] sm:$0xf] }
   0xb   :  { %280 = vmatpush1.bf16.msra.mxu1 %v508_v26  ;;  %174 = vmatprep.subr.bf16.mxu0 %v549_v0  ;;  %v38_v54 = vld [vmem:[%s865_s0 + $0x2c] sm:$0xf]  ;;  %v511_v58 = vcombine.low %v53_v48, %v54_v49  ;;  %v96_v4 = vmax.bf16 %v549_v0, %v78_v62  ;;  %v57_v6 = vmax.bf16 %v549_v0, %v39_v63  ;;  %v80_v9 = vld [vmem:[%s864_s1 + $0x3c] sm:$0xf]  ;;  %v465_v10 = vld [vmem:[%s869_s6] sm:$0xff] }
   0xc   :  { %281 = vmatprep.subr.bf16.mxu1 %v549_v0  ;;  %516 = vmatprep.mubr.msk.bf16.mxu1 %vm166_vm0, %v545_v52  ;;  %v56_v60 = vmax.bf16 %v549_v0, %v38_v54  ;;  %v500_v2 = vcombine.low %v93_v56, %v94_v57  ;;  %v58_v7 = vmax.bf16 %v549_v0, %v40_v1  ;;  %v41_v11 = vld [vmem:[%s865_s0 + $0x38] sm:$0xf]  ;;  %v42_v12 = vld [vmem:[%s865_s0 + $0x3c] sm:$0xf]  ;;  %v466_v13 = vld [vmem:[%s869_s6 + $0x8] sm:$0xff] }
   0xd   :  { %469 = vperm.xlu0 %539, %v465_v10   ;;  %v501_v14 = vcombine.low %v95_v3, %v96_v4  ;;  %v97_v15 = vmax.bf16 %v549_v0, %v79_v8  ;;  %v98_v16 = vmax.bf16 %v549_v0, %v80_v9  ;;  %v59_v18 = vmax.bf16 %v549_v0, %v41_v11  ;;  %v81_v20 = vld [vmem:[%s864_s1 + $0x40] sm:$0xf]  ;;  %v82_v21 = vld [vmem:[%s864_s1 + $0x44] sm:$0xf]  ;;  %v321_v37 = vld [vmem:[%s870_s2 + $0xc] sm:$0xf] }
   0xe   :  { %175 = vmatpush1.bf16.msra.mxu0 %v497_v33  ;;  %v512_v5 = vcombine.low %v55_v59, %v56_v60  ;;  %v513_v17 = vcombine.low %v57_v6, %v58_v7  ;;  %v60_v19 = vmax.bf16 %v549_v0, %v42_v12  ;;  %v43_v22 = vld [vmem:[%s865_s0 + $0x40] sm:$0xf]  ;;  %v44_v23 = vld [vmem:[%s865_s0 + $0x44] sm:$0xf]  ;;  %v99_v25 = vmax.bf16 %v549_v0, %v81_v20  ;;  %v323_v44 = vld [vmem:[%s870_s2 + $0x14] sm:$0xf] }
   0xf   :  { %282 = vmatpush1.bf16.msra.mxu1 %v509_v36  ;;  %176 = vmatprep.subr.bf16.mxu0 %v549_v0  ;;  %v502_v24 = vcombine.low %v97_v15, %v98_v16  ;;  %v100_v26 = vmax.bf16 %v549_v0, %v82_v21  ;;  %v61_v28 = vmax.bf16 %v549_v0, %v43_v22  ;;  %v318_v30 = vld [vmem:[%s870_s2] sm:$0xf]  ;;  %v319_v31 = vld [vmem:[%s870_s2 + $0x4] sm:$0xf]  ;;  %v320_v36 = vld [vmem:[%s870_s2 + $0x8] sm:$0xf] }
  0x10   :  { %283 = vmatprep.subr.bf16.mxu1 %v549_v0  ;;  %v514_v27 = vcombine.low %v59_v18, %v60_v19  ;;  %v62_v29 = vmax.bf16 %v549_v0, %v44_v23  ;;  %v336_v33 = vmax.bf16 %v549_v0, %v318_v30  ;;  %v337_v34 = vmax.bf16 %v549_v0, %v319_v31  ;;  %v540_v38 = vld [vmem:[%s866_s4] ss:$8 sps:$4 sm:$0xff]   ;;  %v546_v45 = vld [vmem:[%s868_s5 + $0x4] ss:$8 sps:$4 sm:$0xff]   ;;  %v324_v49 = vld [vmem:[%s870_s2 + $0x18] sm:$0xf] }
  0x11   :  { %474 = vperm.xlu0 %539, %v466_v13   ;;  %v503_v32 = vcombine.low %v99_v25, %v100_v26  ;;  %v543_v39 = vld [vmem:[%s867_s3] ss:$8 sps:$4 sm:$0xff]   ;;  %v338_v41 = vmax.bf16 %v549_v0, %v320_v36  ;;  %v339_v42 = vmax.bf16 %v549_v0, %v321_v37  ;;  %v341_v48 = vmax.bf16 %v549_v0, %v323_v44  ;;  %v325_v50 = vld [vmem:[%s870_s2 + $0x1c] sm:$0xf]  ;;  %v329_v60 = vld [vmem:[%s870_s2 + $0x2c] sm:$0xf] }
  0x12   :  { %177 = vmatpush1.bf16.msra.mxu0 %v498_v43  ;;  %v515_v35 = vcombine.low %v61_v28, %v62_v29  ;;  %v519_v40 = vcombine.low %v336_v33, %v337_v34  ;;  %v322_v43 = vld [vmem:[%s870_s2 + $0x10] sm:$0xf]  ;;  %v342_v52 = vmax.bf16 %v549_v0, %v324_v49  ;;  %v343_v53 = vmax.bf16 %v549_v0, %v325_v50  ;;  %v326_v54 = vld [vmem:[%s870_s2 + $0x20] sm:$0xf]  ;;  %v328_v59 = vld [vmem:[%s870_s2 + $0x28] sm:$0xf] }
  0x13   :  { %284 = vmatpush1.bf16.msra.mxu1 %v510_v47  ;;  %178 = vmatprep.subr.bf16.mxu0 %v549_v0  ;;  %v520_v46 = vcombine.low %v338_v41, %v339_v42  ;;  %v340_v47 = vmax.bf16 %v549_v0, %v322_v43  ;;  %v344_v57 = vmax.bf16 %v549_v0, %v326_v54  ;;  %v330_v1 = vld [vmem:[%s870_s2 + $0x30] sm:$0xf]  ;;  %v332_v6 = vld [vmem:[%s870_s2 + $0x38] sm:$0xf]  ;;  %v333_v7 = vld [vmem:[%s870_s2 + $0x3c] sm:$0xf] }
  0x14   :  { %285 = vmatprep.subr.bf16.mxu1 %v549_v0  ;;  %v522_v56 = vcombine.low %v342_v52, %v343_v53  ;;  %v346_v62 = vmax.bf16 %v549_v0, %v328_v59  ;;  %v347_v63 = vmax.bf16 %v549_v0, %v329_v60  ;;  %v348_v4 = vmax.bf16 %v549_v0, %v330_v1  ;;  %v334_v11 = vld [vmem:[%s870_s2 + $0x40] sm:$0xf]  ;;  %v335_v12 = vld [vmem:[%s870_s2 + $0x44] sm:$0xf] }
  0x15   :  { %v521_v51 = vcombine.low %v340_v47, %v341_v48  ;;  %v350_v9 = vmax.bf16 %v549_v0, %v332_v6  ;;  %v351_v10 = vmax.bf16 %v549_v0, %v333_v7  ;;  %v353_v15 = vmax.bf16 %v549_v0, %v335_v12 }
  0x16   :  { %179 = vmatpush1.bf16.msra.mxu0 %v499_v55  ;;  %v327_v55 = vld [vmem:[%s870_s2 + $0x24] sm:$0xf]  ;;  %v524_v3 = vcombine.low %v346_v62, %v347_v63 }
  0x17   :  { %286 = vmatpush1.bf16.msra.mxu1 %v511_v58  ;;  %180 = vmatprep.subr.bf16.mxu0 %v549_v0  ;;  %v345_v58 = vmax.bf16 %v549_v0, %v327_v55  ;;  %v526_v13 = vcombine.low %v350_v9, %v351_v10 }
  0x18   :  { %287 = vmatprep.subr.bf16.mxu1 %v549_v0 }
  0x19   :  { %v523_v61 = vcombine.low %v344_v57, %v345_v58 }
  0x1a   :  { %181 = vmatpush1.bf16.msra.mxu0 %v500_v2  ;;  %v331_v2 = vld [vmem:[%s870_s2 + $0x34] sm:$0xf] }
  0x1b   :  { %288 = vmatpush1.bf16.msra.mxu1 %v512_v5  ;;  %182 = vmatprep.subr.bf16.mxu0 %v549_v0  ;;  %v349_v5 = vmax.bf16 %v549_v0, %v331_v2 }
  0x1c   :  { %289 = vmatprep.subr.bf16.mxu1 %v549_v0 }
  0x1d   :  { %v525_v8 = vcombine.low %v348_v4, %v349_v5 }
  0x1e   :  { %183 = vmatpush1.bf16.msra.mxu0 %v501_v14  ;;  %v352_v14 = vmax.bf16 %v549_v0, %v334_v11 }
  0x1f   :  { %290 = vmatpush1.bf16.msra.mxu1 %v513_v17  ;;  %184 = vmatprep.subr.bf16.mxu0 %v549_v0  ;;  %v548_v17 = vld [vmem:[%s868_s5] ss:$8 sps:$4 sm:$0xff]  }
  0x20   :  { %291 = vmatprep.subr.bf16.mxu1 %v549_v0  ;;  %v527_v16 = vcombine.low %v352_v14, %v353_v15 }
  0x22   :  { %185 = vmatpush1.bf16.msra.mxu0 %v502_v24 }
  0x23   :  { %292 = vmatpush1.bf16.msra.mxu1 %v514_v27  ;;  %186 = vmatprep.subr.bf16.mxu0 %v549_v0 }
  0x24   :  { %293 = vmatprep.subr.bf16.mxu1 %v549_v0 }
  0x26   :  { %187 = vmatpush1.bf16.msra.mxu0 %v503_v32 }
  0x27   :  { %294 = vmatpush1.bf16.msra.mxu1 %v515_v35  ;;  %422 = vmatprep.subr.bf16.mxu0 %v549_v0 }
  0x29   :  { %203 = vmatmul.mubr.bf16.vlgmr.msra.gmra.mrb[0].mxu0 %v540_v38 }
  0x2a   :  { %310 = vmatmul.mubr.bf16.vlgmr.msra.gmra.mrb[0].mxu1 %v543_v39  ;;  %423 = vmatpush1.bf16.msra.mxu0 %v519_v40 }
  0x2b   :  { %424 = vmatprep.subr.bf16.mxu0 %v549_v0  ;;  %528 = vmatprep.mubr.msk.bf16.mxu0 %vm166_vm0, %v546_v45 }
  0x2e   :  { %425 = vmatpush1.bf16.msra.mxu0 %v520_v46 }
  0x2f   :  { %426 = vmatprep.subr.bf16.mxu0 %v549_v0 }
  0x32   :  { %427 = vmatpush1.bf16.msra.mxu0 %v521_v51 }
  0x33   :  { %428 = vmatprep.subr.bf16.mxu0 %v549_v0 }
  0x36   :  { %429 = vmatpush1.bf16.msra.mxu0 %v522_v56 }
  0x37   :  { %430 = vmatprep.subr.bf16.mxu0 %v549_v0 }
  0x3a   :  { %431 = vmatpush1.bf16.msra.mxu0 %v523_v61 }
  0x3b   :  { %432 = vmatprep.subr.bf16.mxu0 %v549_v0 }
  0x3e   :  { %433 = vmatpush1.bf16.msra.mxu0 %v524_v3 }
  0x3f   :  { %434 = vmatprep.subr.bf16.mxu0 %v549_v0 }
  0x42   :  { %435 = vmatpush1.bf16.msra.mxu0 %v525_v8 }
  0x43   :  { %436 = vmatprep.subr.bf16.mxu0 %v549_v0 }
  0x46   :  { %437 = vmatpush1.bf16.msra.mxu0 %v526_v13 }
  0x47   :  { %438 = vmatprep.subr.bf16.mxu0 %v549_v0 }
  0x4a   :  { %439 = vmatpush1.bf16.msra.mxu0 %v527_v16 }
  0x4d   :  { %455 = vmatmul.mubr.bf16.vlgmr.msra.gmra.mrb[4].mxu0 %v548_v17 }
  0x8c   :  { %v470_v28 = vpop.permute.xlu0 %469 }
  0x90   :  { %v475_v34 = vpop.permute.xlu0 %474 }
  0xfc   :  { %v204_v18 = vpop.f32.mrb[0].mxu0 }
  0xfd   :  { %v311_v19 = vpop.f32.mrb[0].mxu1  ;;  %v206_v20 = vpop.f32.mrb[1].mxu0 }
  0xfe   :  { %v312_v21 = vadd.f32 %v311_v19, %v204_v18  ;;  %v313_v22 = vpop.f32.mrb[1].mxu1  ;;  %v207_v23 = vpop.f32.mrb[2].mxu0 }
  0xff   :  { %v314_v24 = vpop.f32.mrb[2].mxu1  ;;  %v209_v25 = vpop.f32.mrb[3].mxu0 }
 0x100   :  { %v315_v26 = vadd.f32 %v314_v24, %v207_v23  ;;  %v316_v27 = vpop.f32.mrb[3].mxu1 }
 0x120   :  { %v456_v29 = vpop.f32.mrb[4].mxu0 }
 0x121   :  { %v463_v30 = vadd.f32 %v456_v29, %v312_v21  ;;  %v458_v0 = vpop.f32.mrb[5].mxu0 }
 0x122   :  { %v459_v31 = vpop.f32.mrb[6].mxu0 }
 0x123   :  { %v464_v32 = vadd.f32 %v459_v31, %v315_v26  ;;  %v461_v33 = vpop.f32.mrb[7].mxu0  ;;  %v477_v35 = vadd.f32 %v470_v28, %v463_v30 }
 0x125   :  { %v478_v36 = vadd.f32 %v475_v34, %v464_v32 }
 0x127   :  { %v536_v37 = vpack.c.bf16 %v478_v36, %v477_v35 }
 0x129   :  { %537 = vst [vmem:[%s871_s7] sm:$0xff] %v536_v37  }

// kernel: network_forward.38
= control target key start
LH: loop header
LB: loop body
LE: loop exit
PB: predicated region body
PF: predicated region fallthrough
CT: control target
= control target key end

     0   :  { %v882_v3 = vmov 0   ;;  %vm358_vm0 = vcmask 130048   ;;  %s1236_s1 = inlined_call_operand.vmem [shape: bf16[144,512], index: 1, kind: input, shape index: {}]   ;;  %s1237_s3 = inlined_call_operand.vmem [shape: bf16[16,144], index: 3, kind: input, shape index: {}]   ;;  %s1238_s4 = inlined_call_operand.vmem [shape: f32[16,1], index: 4, kind: input, shape index: {}]   ;;  %s1239_s2 = inlined_call_operand.vmem [shape: bf16[16,144], index: 2, kind: input, shape index: {}]   ;;  %s1240_s0 = inlined_call_operand.vmem [shape: bf16[144,512], index: 0, kind: input, shape index: {}]   ;;  %s1241_s5 = inlined_call_operand.vmem [shape: bf16[16,512], index: 5, kind: output, shape index: {}]  }
   0x1   :  { %v95_v0 = vld [vmem:[%s1236_s1] sm:$0xff]  ;;  %v97_v1 = vld [vmem:[%s1236_s1 + $0x10] sm:$0xff]  ;;  %v96_v2 = vld [vmem:[%s1236_s1 + $0x8] sm:$0xff]  ;;  %875 = vset.pattern.permute.xlu0 %v882_v3 }
   0x2   :  { %v131_v4 = vmax.bf16 %v882_v3, %v95_v0  ;;  %v133_v5 = vmax.bf16 %v882_v3, %v97_v1  ;;  %v98_v6 = vld [vmem:[%s1236_s1 + $0x18] sm:$0xff]  ;;  %v132_v7 = vmax.bf16 %v882_v3, %v96_v2  ;;  %v99_v8 = vld [vmem:[%s1236_s1 + $0x20] sm:$0xff]  ;;  %v101_v9 = vld [vmem:[%s1236_s1 + $0x30] sm:$0xff] }
   0x3   :  { %v134_v10 = vmax.bf16 %v882_v3, %v98_v6  ;;  %v135_v11 = vmax.bf16 %v882_v3, %v99_v8  ;;  %v137_v12 = vmax.bf16 %v882_v3, %v101_v9  ;;  %v100_v13 = vld [vmem:[%s1236_s1 + $0x28] sm:$0xff]  ;;  %v102_v14 = vld [vmem:[%s1236_s1 + $0x38] sm:$0xff]  ;;  %v103_v15 = vld [vmem:[%s1236_s1 + $0x40] sm:$0xff] }
   0x4   :  { %v781_v16 = vcombine.high %v131_v4, %v133_v5  ;;  %v780_v17 = vcombine.low %v131_v4, %v133_v5  ;;  %v136_v18 = vmax.bf16 %v882_v3, %v100_v13  ;;  %v138_v19 = vmax.bf16 %v882_v3, %v102_v14  ;;  %v105_v20 = vld [vmem:[%s1236_s1 + $0x50] sm:$0xff]  ;;  %v104_v21 = vld [vmem:[%s1236_s1 + $0x48] sm:$0xff]  ;;  %v106_v22 = vld [vmem:[%s1236_s1 + $0x58] sm:$0xff] }
   0x5   :  { %v783_v23 = vcombine.high %v132_v7, %v134_v10  ;;  %v782_v24 = vcombine.low %v132_v7, %v134_v10  ;;  %v785_v25 = vcombine.high %v135_v11, %v137_v12  ;;  %v107_v26 = vld [vmem:[%s1236_s1 + $0x60] sm:$0xff]  ;;  %v109_v27 = vld [vmem:[%s1236_s1 + $0x70] sm:$0xff]  ;;  %v784_v29 = vcombine.low %v135_v11, %v137_v12  ;;  %v108_v32 = vld [vmem:[%s1236_s1 + $0x68] sm:$0xff] }
   0x6   :  { %362 = vmatprep.subr.bf16.mxu0 %v781_v16  ;;  %v787_v28 = vcombine.high %v136_v18, %v138_v19  ;;  %v139_v30 = vmax.bf16 %v882_v3, %v103_v15  ;;  %v141_v31 = vmax.bf16 %v882_v3, %v105_v20  ;;  %v110_v33 = vld [vmem:[%s1236_s1 + $0x78] sm:$0xff]  ;;  %v786_v34 = vcombine.low %v136_v18, %v138_v19  ;;  %v111_v43 = vld [vmem:[%s1236_s1 + $0x80] sm:$0xff]  ;;  %v113_v44 = vld [vmem:[%s1236_s1 + $0x90] sm:$0xff] }
   0x7   :  { %405 = vmatprep.subr.bf16.mxu1 %v783_v23  ;;  %363 = vmatpush1.bf16.msra.mxu0 %v780_v17  ;;  %v140_v35 = vmax.bf16 %v882_v3, %v104_v21  ;;  %v142_v36 = vmax.bf16 %v882_v3, %v106_v22  ;;  %v143_v38 = vmax.bf16 %v882_v3, %v107_v26  ;;  %v112_v45 = vld [vmem:[%s1236_s1 + $0x88] sm:$0xff]  ;;  %v114_v46 = vld [vmem:[%s1236_s1 + $0x98] sm:$0xff]  ;;  %v115_v52 = vld [vmem:[%s1236_s1 + $0xa0] sm:$0xff] }
   0x8   :  { %406 = vmatpush1.bf16.msra.mxu1 %v782_v24  ;;  %364 = vmatprep.subr.bf16.mxu0 %v785_v25  ;;  %v789_v37 = vcombine.high %v139_v30, %v141_v31  ;;  %v145_v39 = vmax.bf16 %v882_v3, %v109_v27  ;;  %v144_v41 = vmax.bf16 %v882_v3, %v108_v32  ;;  %v117_v56 = vld [vmem:[%s1236_s1 + $0xb0] sm:$0xff]  ;;  %v116_v57 = vld [vmem:[%s1236_s1 + $0xa8] sm:$0xff]  ;;  %v118_v58 = vld [vmem:[%s1236_s1 + $0xb8] sm:$0xff] }
   0x9   :  { %407 = vmatprep.subr.bf16.mxu1 %v787_v28  ;;  %v791_v40 = vcombine.high %v140_v35, %v142_v36  ;;  %v146_v42 = vmax.bf16 %v882_v3, %v110_v33  ;;  %v788_v47 = vcombine.low %v139_v30, %v141_v31  ;;  %v790_v48 = vcombine.low %v140_v35, %v142_v36  ;;  %v878_v59 = vld [vmem:[%s1237_s3 + $0x4] ss:$8 sps:$4 sm:$0xff]   ;;  %v121_v6 = vld [vmem:[%s1236_s1 + $0xd0] sm:$0xff]  ;;  %v122_v8 = vld [vmem:[%s1236_s1 + $0xd8] sm:$0xff] }
   0xa   :  { %v793_v49 = vcombine.high %v143_v38, %v145_v39  ;;  %v147_v50 = vmax.bf16 %v882_v3, %v111_v43  ;;  %v149_v51 = vmax.bf16 %v882_v3, %v113_v44  ;;  %v148_v54 = vmax.bf16 %v882_v3, %v112_v45  ;;  %v119_v5 = vld [vmem:[%s1236_s1 + $0xc0] sm:$0xff]  ;;  %v120_v7 = vld [vmem:[%s1236_s1 + $0xc8] sm:$0xff]  ;;  %816 = vmatprep.mubr.msk.bf16.mxu0 %vm358_vm0, %v878_v59  ;;  %v125_v18 = vld [vmem:[%s1236_s1 + $0xf0] sm:$0xff] }
   0xb   :  { %365 = vmatpush1.bf16.msra.mxu0 %v784_v29  ;;  %v795_v53 = vcombine.high %v144_v41, %v146_v42  ;;  %v150_v55 = vmax.bf16 %v882_v3, %v114_v46  ;;  %v792_v60 = vcombine.low %v143_v38, %v145_v39  ;;  %v794_v61 = vcombine.low %v144_v41, %v146_v42  ;;  %v123_v14 = vld [vmem:[%s1236_s1 + $0xe0] sm:$0xff]  ;;  %v124_v19 = vld [vmem:[%s1236_s1 + $0xe8] sm:$0xff]  ;;  %v126_v20 = vld [vmem:[%s1236_s1 + $0xf8] sm:$0xff] }
   0xc   :  { %408 = vmatpush1.bf16.msra.mxu1 %v786_v34  ;;  %366 = vmatprep.subr.bf16.mxu0 %v789_v37  ;;  %v797_v62 = vcombine.high %v147_v50, %v149_v51  ;;  %v151_v63 = vmax.bf16 %v882_v3, %v115_v52  ;;  %v153_v0 = vmax.bf16 %v882_v3, %v117_v56  ;;  %v127_v29 = vld [vmem:[%s1236_s1 + $0x100] sm:$0xff]  ;;  %v129_v30 = vld [vmem:[%s1236_s1 + $0x110] sm:$0xff]  ;;  %v128_v31 = vld [vmem:[%s1236_s1 + $0x108] sm:$0xff] }
   0xd   :  { %409 = vmatprep.subr.bf16.mxu1 %v791_v40  ;;  %v799_v1 = vcombine.high %v148_v54, %v150_v55  ;;  %v152_v2 = vmax.bf16 %v882_v3, %v116_v57  ;;  %v154_v4 = vmax.bf16 %v882_v3, %v118_v58  ;;  %v796_v9 = vcombine.low %v147_v50, %v149_v51  ;;  %v130_v32 = vld [vmem:[%s1236_s1 + $0x118] sm:$0xff]  ;;  %v726_v35 = vld [vmem:[%s1238_s4] sm:$0xff]  ;;  %v23_v43 = vld [vmem:[%s1240_s0 + $0x10] sm:$0xff] }
   0xe   :  { %v798_v10 = vcombine.low %v148_v54, %v150_v55  ;;  %v801_v11 = vcombine.high %v151_v63, %v153_v0  ;;  %v155_v12 = vmax.bf16 %v882_v3, %v119_v5  ;;  %v157_v13 = vmax.bf16 %v882_v3, %v121_v6  ;;  %817 = vmatprep.mubr.msk.bf16.mxu1 %vm358_vm0, %v878_v59  ;;  %v21_v42 = vld [vmem:[%s1240_s0] sm:$0xff]  ;;  %v22_v44 = vld [vmem:[%s1240_s0 + $0x8] sm:$0xff]  ;;  %v24_v45 = vld [vmem:[%s1240_s0 + $0x18] sm:$0xff] }
   0xf   :  { %367 = vmatpush1.bf16.msra.mxu0 %v788_v47  ;;  %v803_v15 = vcombine.high %v152_v2, %v154_v4  ;;  %v156_v16 = vmax.bf16 %v882_v3, %v120_v7  ;;  %v158_v17 = vmax.bf16 %v882_v3, %v122_v8  ;;  %v800_v21 = vcombine.low %v151_v63, %v153_v0  ;;  %v25_v55 = vld [vmem:[%s1240_s0 + $0x20] sm:$0xff]  ;;  %v27_v56 = vld [vmem:[%s1240_s0 + $0x30] sm:$0xff]  ;;  %v26_v57 = vld [vmem:[%s1240_s0 + $0x28] sm:$0xff] }
  0x10   :  { %410 = vmatpush1.bf16.msra.mxu1 %v790_v48  ;;  %368 = vmatprep.subr.bf16.mxu0 %v793_v49  ;;  %v159_v22 = vmax.bf16 %v882_v3, %v123_v14  ;;  %v802_v23 = vcombine.low %v152_v2, %v154_v4  ;;  %v805_v24 = vcombine.high %v155_v12, %v157_v13  ;;  %v727_v48 = vld [vmem:[%s1238_s4 + $0x8] sm:$0xff]  ;;  %v28_v58 = vld [vmem:[%s1240_s0 + $0x38] sm:$0xff]  ;;  %v29_v4 = vld [vmem:[%s1240_s0 + $0x40] sm:$0xff] }
  0x11   :  { %411 = vmatprep.subr.bf16.mxu1 %v795_v53  ;;  %v161_v25 = vmax.bf16 %v882_v3, %v125_v18  ;;  %v807_v26 = vcombine.high %v156_v16, %v158_v17  ;;  %v160_v27 = vmax.bf16 %v882_v3, %v124_v19  ;;  %v162_v28 = vmax.bf16 %v882_v3, %v126_v20  ;;  %v31_v5 = vld [vmem:[%s1240_s0 + $0x50] sm:$0xff]  ;;  %v876_v6 = vld [vmem:[%s1237_s3] ss:$8 sps:$4 sm:$0xff]   ;;  %v32_v8 = vld [vmem:[%s1240_s0 + $0x58] sm:$0xff] }
  0x12   :  { %v804_v33 = vcombine.low %v155_v12, %v157_v13  ;;  %v806_v34 = vcombine.low %v156_v16, %v158_v17  ;;  %v163_v37 = vmax.bf16 %v882_v3, %v127_v29  ;;  %v165_v38 = vmax.bf16 %v882_v3, %v129_v30  ;;  %730 = vperm.xlu0 %875, %v726_v35   ;;  %v30_v7 = vld [vmem:[%s1240_s0 + $0x48] sm:$0xff]  ;;  %v33_v17 = vld [vmem:[%s1240_s0 + $0x60] sm:$0xff]  ;;  %v35_v18 = vld [vmem:[%s1240_s0 + $0x70] sm:$0xff] }
  0x13   :  { %369 = vmatpush1.bf16.msra.mxu0 %v792_v60  ;;  %v809_v36 = vcombine.high %v159_v22, %v161_v25  ;;  %v811_v39 = vcombine.high %v160_v27, %v162_v28  ;;  %v164_v40 = vmax.bf16 %v882_v3, %v128_v31  ;;  %v166_v41 = vmax.bf16 %v882_v3, %v130_v32  ;;  %v879_v19 = vld [vmem:[%s1239_s2 + $0x4] ss:$8 sps:$4 sm:$0xff]   ;;  %v39_v31 = vld [vmem:[%s1240_s0 + $0x90] sm:$0xff] }
  0x14   :  { %412 = vmatpush1.bf16.msra.mxu1 %v794_v61  ;;  %370 = vmatprep.subr.bf16.mxu0 %v797_v62  ;;  %v808_v46 = vcombine.low %v159_v22, %v161_v25  ;;  %v810_v47 = vcombine.low %v160_v27, %v162_v28  ;;  %v813_v49 = vcombine.high %v163_v37, %v165_v38  ;;  %v34_v20 = vld [vmem:[%s1240_s0 + $0x68] sm:$0xff]  ;;  %v37_v30 = vld [vmem:[%s1240_s0 + $0x80] sm:$0xff] }
  0x15   :  { %413 = vmatprep.subr.bf16.mxu1 %v799_v1  ;;  %v57_v50 = vmax.bf16 %v882_v3, %v21_v42  ;;  %v59_v51 = vmax.bf16 %v882_v3, %v23_v43  ;;  %v815_v52 = vcombine.high %v164_v40, %v166_v41  ;;  %v58_v53 = vmax.bf16 %v882_v3, %v22_v44  ;;  %v38_v32 = vld [vmem:[%s1240_s0 + $0x88] sm:$0xff]  ;;  %v41_v42 = vld [vmem:[%s1240_s0 + $0xa0] sm:$0xff]  ;;  %v43_v43 = vld [vmem:[%s1240_s0 + $0xb0] sm:$0xff] }
  0x16   :  { %v60_v54 = vmax.bf16 %v882_v3, %v24_v45  ;;  %735 = vperm.xlu0 %875, %v727_v48   ;;  %v812_v59 = vcombine.low %v163_v37, %v165_v38  ;;  %v814_v60 = vcombine.low %v164_v40, %v166_v41  ;;  %v61_v62 = vmax.bf16 %v882_v3, %v25_v55  ;;  %v42_v44 = vld [vmem:[%s1240_s0 + $0xa8] sm:$0xff]  ;;  %v44_v45 = vld [vmem:[%s1240_s0 + $0xb8] sm:$0xff]  ;;  %v47_v55 = vld [vmem:[%s1240_s0 + $0xd0] sm:$0xff] }
  0x17   :  { %371 = vmatpush1.bf16.msra.mxu0 %v796_v9  ;;  %v821_v61 = vcombine.high %v57_v50, %v59_v51  ;;  %v63_v63 = vmax.bf16 %v882_v3, %v27_v56  ;;  %v62_v1 = vmax.bf16 %v882_v3, %v26_v57  ;;  %v64_v2 = vmax.bf16 %v882_v3, %v28_v58  ;;  %v46_v56 = vld [vmem:[%s1240_s0 + $0xc8] sm:$0xff]  ;;  %v48_v57 = vld [vmem:[%s1240_s0 + $0xd8] sm:$0xff] }
  0x18   :  { %414 = vmatpush1.bf16.msra.mxu1 %v798_v10  ;;  %372 = vmatprep.subr.bf16.mxu0 %v801_v11  ;;  %v823_v0 = vcombine.high %v58_v53, %v60_v54  ;;  %v820_v9 = vcombine.low %v57_v50, %v59_v51  ;;  %v822_v10 = vcombine.low %v58_v53, %v60_v54  ;;  %v45_v54 = vld [vmem:[%s1240_s0 + $0xc0] sm:$0xff] }
  0x19   :  { %415 = vmatprep.subr.bf16.mxu1 %v803_v15  ;;  %v825_v11 = vcombine.high %v61_v62, %v63_v63  ;;  %v65_v12 = vmax.bf16 %v882_v3, %v29_v4  ;;  %v67_v13 = vmax.bf16 %v882_v3, %v31_v5  ;;  %v827_v14 = vcombine.high %v62_v1, %v64_v2  ;;  %v51_v4 = vld [vmem:[%s1240_s0 + $0xf0] sm:$0xff]  ;;  %v50_v5 = vld [vmem:[%s1240_s0 + $0xe8] sm:$0xff] }
  0x1a   :  { %v66_v15 = vmax.bf16 %v882_v3, %v30_v7  ;;  %v68_v16 = vmax.bf16 %v882_v3, %v32_v8  ;;  %v824_v22 = vcombine.low %v61_v62, %v63_v63  ;;  %v69_v25 = vmax.bf16 %v882_v3, %v33_v17  ;;  %v54_v17 = vld [vmem:[%s1240_s0 + $0x108] sm:$0xff] }
  0x1b   :  { %373 = vmatpush1.bf16.msra.mxu0 %v800_v21  ;;  %v36_v21 = vld [vmem:[%s1240_s0 + $0x78] sm:$0xff]  ;;  %v70_v28 = vmax.bf16 %v882_v3, %v34_v20  ;;  %v73_v37 = vmax.bf16 %v882_v3, %v37_v30  ;;  %v75_v38 = vmax.bf16 %v882_v3, %v39_v31  ;;  %v74_v40 = vmax.bf16 %v882_v3, %v38_v32 }
  0x1c   :  { %416 = vmatpush1.bf16.msra.mxu1 %v802_v23  ;;  %374 = vmatprep.subr.bf16.mxu0 %v805_v24  ;;  %v826_v23 = vcombine.low %v62_v1, %v64_v2  ;;  %v829_v24 = vcombine.high %v65_v12, %v67_v13  ;;  %v831_v27 = vcombine.high %v66_v15, %v68_v16  ;;  %v49_v2 = vld [vmem:[%s1240_s0 + $0xe0] sm:$0xff] }
  0x1d   :  { %417 = vmatprep.subr.bf16.mxu1 %v807_v26  ;;  %v71_v26 = vmax.bf16 %v882_v3, %v35_v18  ;;  %v72_v29 = vmax.bf16 %v882_v3, %v36_v21  ;;  %v830_v35 = vcombine.low %v66_v15, %v68_v16  ;;  %v837_v48 = vcombine.high %v73_v37, %v75_v38  ;;  %v53_v15 = vld [vmem:[%s1240_s0 + $0x100] sm:$0xff]  ;;  %v55_v16 = vld [vmem:[%s1240_s0 + $0x110] sm:$0xff]  ;;  %v56_v18 = vld [vmem:[%s1240_s0 + $0x118] sm:$0xff] }
  0x1e   :  { %v79_v50 = vmax.bf16 %v882_v3, %v43_v43  ;;  %v80_v53 = vmax.bf16 %v882_v3, %v44_v45  ;;  %v836_v58 = vcombine.low %v73_v37, %v75_v38  ;;  %v83_v62 = vmax.bf16 %v882_v3, %v47_v55 }
  0x1f   :  { %375 = vmatpush1.bf16.msra.mxu0 %v804_v33  ;;  %v40_v33 = vld [vmem:[%s1240_s0 + $0x98] sm:$0xff]  ;;  %v84_v1 = vmax.bf16 %v882_v3, %v48_v57 }
  0x20   :  { %418 = vmatpush1.bf16.msra.mxu1 %v806_v34  ;;  %376 = vmatprep.subr.bf16.mxu0 %v809_v36  ;;  %v828_v34 = vcombine.low %v65_v12, %v67_v13  ;;  %v833_v36 = vcombine.high %v69_v25, %v71_v26  ;;  %v76_v41 = vmax.bf16 %v882_v3, %v40_v33  ;;  %v881_v33 = vld [vmem:[%s1239_s2] ss:$8 sps:$4 sm:$0xff]  }
  0x21   :  { %419 = vmatprep.subr.bf16.mxu1 %v811_v39  ;;  %v835_v39 = vcombine.high %v70_v28, %v72_v29  ;;  %v86_v13 = vmax.bf16 %v882_v3, %v50_v5 }
  0x22   :  { %v839_v51 = vcombine.high %v74_v40, %v76_v41 }
  0x23   :  { %377 = vmatpush1.bf16.msra.mxu0 %v808_v46  ;;  %v832_v46 = vcombine.low %v69_v25, %v71_v26  ;;  %v90_v25 = vmax.bf16 %v882_v3, %v54_v17  ;;  %v92_v26 = vmax.bf16 %v882_v3, %v56_v18 }
  0x24   :  { %420 = vmatpush1.bf16.msra.mxu1 %v810_v47  ;;  %378 = vmatprep.subr.bf16.mxu0 %v813_v49  ;;  %v834_v47 = vcombine.low %v70_v28, %v72_v29  ;;  %v77_v49 = vmax.bf16 %v882_v3, %v41_v42 }
  0x25   :  { %421 = vmatprep.subr.bf16.mxu1 %v815_v52  ;;  %v78_v52 = vmax.bf16 %v882_v3, %v42_v44  ;;  %v855_v30 = vcombine.high %v90_v25, %v92_v26  ;;  %v854_v32 = vcombine.low %v90_v25, %v92_v26 }
  0x26   :  { %v840_v7 = vcombine.low %v77_v49, %v79_v50 }
  0x27   :  { %379 = vmatpush1.bf16.msra.mxu0 %v812_v59  ;;  %v838_v59 = vcombine.low %v74_v40, %v76_v41  ;;  %v843_v63 = vcombine.high %v78_v52, %v80_v53  ;;  %v842_v8 = vcombine.low %v78_v52, %v80_v53 }
  0x28   :  { %422 = vmatpush1.bf16.msra.mxu1 %v814_v60  ;;  %640 = vmatprep.subr.bf16.mxu0 %v821_v61  ;;  %v841_v60 = vcombine.high %v77_v49, %v79_v50  ;;  %v81_v61 = vmax.bf16 %v882_v3, %v45_v54 }
  0x29   :  { %683 = vmatprep.subr.bf16.mxu1 %v823_v0  ;;  %v82_v0 = vmax.bf16 %v882_v3, %v46_v56 }
  0x2a   :  { %395 = vmatmul.mubr.bf16.vlgmr.msra.gmra.mrb[0].mxu0 %v876_v6 }
  0x2b   :  { %438 = vmatmul.mubr.bf16.vlgmr.msra.gmra.mrb[0].mxu1 %v876_v6  ;;  %641 = vmatpush1.bf16.msra.mxu0 %v820_v9  ;;  %v52_v6 = vld [vmem:[%s1240_s0 + $0xf8] sm:$0xff]  ;;  %v845_v9 = vcombine.high %v81_v61, %v83_v62  ;;  %v847_v12 = vcombine.high %v82_v0, %v84_v1  ;;  %v846_v20 = vcombine.low %v82_v0, %v84_v1 }
  0x2c   :  { %684 = vmatpush1.bf16.msra.mxu1 %v822_v10  ;;  %642 = vmatprep.subr.bf16.mxu0 %v825_v11  ;;  %v85_v10 = vmax.bf16 %v882_v3, %v49_v2  ;;  %v87_v11 = vmax.bf16 %v882_v3, %v51_v4 }
  0x2d   :  { %685 = vmatprep.subr.bf16.mxu1 %v827_v14  ;;  %856 = vmatprep.mubr.msk.bf16.mxu0 %vm358_vm0, %v879_v19  ;;  %v88_v14 = vmax.bf16 %v882_v3, %v52_v6 }
  0x2e   :  { %857 = vmatprep.mubr.msk.bf16.mxu1 %vm358_vm0, %v879_v19  ;;  %v844_v19 = vcombine.low %v81_v61, %v83_v62  ;;  %v849_v21 = vcombine.high %v85_v10, %v87_v11 }
  0x2f   :  { %643 = vmatpush1.bf16.msra.mxu0 %v824_v22  ;;  %v89_v22 = vmax.bf16 %v882_v3, %v53_v15  ;;  %v850_v28 = vcombine.low %v86_v13, %v88_v14 }
  0x30   :  { %686 = vmatpush1.bf16.msra.mxu1 %v826_v23  ;;  %644 = vmatprep.subr.bf16.mxu0 %v829_v24  ;;  %v91_v23 = vmax.bf16 %v882_v3, %v55_v16  ;;  %v851_v24 = vcombine.high %v86_v13, %v88_v14 }
  0x31   :  { %687 = vmatprep.subr.bf16.mxu1 %v831_v27  ;;  %v848_v27 = vcombine.low %v85_v10, %v87_v11 }
  0x32   :  { %v853_v29 = vcombine.high %v89_v22, %v91_v23  ;;  %v852_v31 = vcombine.low %v89_v22, %v91_v23 }
  0x33   :  { %645 = vmatpush1.bf16.msra.mxu0 %v828_v34 }
  0x34   :  { %688 = vmatpush1.bf16.msra.mxu1 %v830_v35  ;;  %646 = vmatprep.subr.bf16.mxu0 %v833_v36 }
  0x35   :  { %689 = vmatprep.subr.bf16.mxu1 %v835_v39 }
  0x37   :  { %647 = vmatpush1.bf16.msra.mxu0 %v832_v46 }
  0x38   :  { %690 = vmatpush1.bf16.msra.mxu1 %v834_v47  ;;  %648 = vmatprep.subr.bf16.mxu0 %v837_v48 }
  0x39   :  { %691 = vmatprep.subr.bf16.mxu1 %v839_v51 }
  0x3b   :  { %649 = vmatpush1.bf16.msra.mxu0 %v836_v58 }
  0x3c   :  { %692 = vmatpush1.bf16.msra.mxu1 %v838_v59  ;;  %650 = vmatprep.subr.bf16.mxu0 %v841_v60 }
  0x3d   :  { %693 = vmatprep.subr.bf16.mxu1 %v843_v63 }
  0x3f   :  { %651 = vmatpush1.bf16.msra.mxu0 %v840_v7 }
  0x40   :  { %694 = vmatpush1.bf16.msra.mxu1 %v842_v8  ;;  %652 = vmatprep.subr.bf16.mxu0 %v845_v9 }
  0x41   :  { %695 = vmatprep.subr.bf16.mxu1 %v847_v12 }
  0x43   :  { %653 = vmatpush1.bf16.msra.mxu0 %v844_v19 }
  0x44   :  { %696 = vmatpush1.bf16.msra.mxu1 %v846_v20  ;;  %654 = vmatprep.subr.bf16.mxu0 %v849_v21 }
  0x45   :  { %697 = vmatprep.subr.bf16.mxu1 %v851_v24 }
  0x47   :  { %655 = vmatpush1.bf16.msra.mxu0 %v848_v27 }
  0x48   :  { %698 = vmatpush1.bf16.msra.mxu1 %v850_v28  ;;  %656 = vmatprep.subr.bf16.mxu0 %v853_v29 }
  0x49   :  { %699 = vmatprep.subr.bf16.mxu1 %v855_v30 }
  0x4b   :  { %657 = vmatpush1.bf16.msra.mxu0 %v852_v31 }
  0x4c   :  { %700 = vmatpush1.bf16.msra.mxu1 %v854_v32 }
  0x4e   :  { %673 = vmatmul.mubr.bf16.vlgmr.msra.gmra.mrb[0].mxu0 %v881_v33 }
  0x4f   :  { %716 = vmatmul.mubr.bf16.vlgmr.msra.gmra.mrb[0].mxu1 %v881_v33 }
  0x91   :  { %v731_v3 = vpop.permute.xlu0 %730 }
  0x95   :  { %v736_v34 = vpop.permute.xlu0 %735 }
 0x121   :  { %v674_v35 = vpop.f32.mrb[0].mxu0 }
 0x122   :  { %v738_v36 = vadd.f32 %v731_v3, %v674_v35  ;;  %v717_v37 = vpop.f32.mrb[0].mxu1  ;;  %v676_v38 = vpop.f32.mrb[1].mxu0 }
 0x123   :  { %v740_v39 = vadd.f32 %v731_v3, %v717_v37  ;;  %v739_v40 = vadd.f32 %v731_v3, %v676_v38  ;;  %v719_v41 = vpop.f32.mrb[1].mxu1  ;;  %v678_v42 = vpop.f32.mrb[2].mxu0 }
 0x124   :  { %v741_v43 = vadd.f32 %v731_v3, %v719_v41  ;;  %v742_v44 = vadd.f32 %v736_v34, %v678_v42  ;;  %v721_v45 = vpop.f32.mrb[2].mxu1  ;;  %v680_v46 = vpop.f32.mrb[3].mxu0 }
 0x125   :  { %v862_v47 = vpack.c.bf16 %v739_v40, %v738_v36  ;;  %v744_v48 = vadd.f32 %v736_v34, %v721_v45  ;;  %v743_v49 = vadd.f32 %v736_v34, %v680_v46  ;;  %v723_v50 = vpop.f32.mrb[3].mxu1 }
 0x126   :  { %v863_v51 = vpack.c.bf16 %v741_v43, %v740_v39  ;;  %v745_v52 = vadd.f32 %v736_v34, %v723_v50 }
 0x127   :  { %770 = vst [vmem:[%s1241_s5] sm:$0xff] %v862_v47  ;;  %v864_v53 = vpack.c.bf16 %v743_v49, %v742_v44 }
 0x128   :  { %771 = vst [vmem:[%s1241_s5 + $0x8] sm:$0xff] %v863_v51  ;;  %v865_v54 = vpack.c.bf16 %v745_v52, %v744_v48 }
 0x129   :  { %772 = vst [vmem:[%s1241_s5 + $0x10] sm:$0xff] %v864_v53 }
 0x12a   :  { %773 = vst [vmem:[%s1241_s5 + $0x18] sm:$0xff] %v865_v54 }

// kernel: network_forward.48
= control target key start
LH: loop header
LB: loop body
LE: loop exit
PB: predicated region body
PF: predicated region fallthrough
CT: control target
= control target key end

     0   :  { %v1299_v3 = vmov 0   ;;  %vm364_vm0 = vcmask 130048   ;;  %s1815_s1 = inlined_call_operand.vmem [shape: bf16[144,512], index: 1, kind: input, shape index: {}]   ;;  %s1816_s4 = inlined_call_operand.vmem [shape: bf16[16,144], index: 4, kind: input, shape index: {}]   ;;  %s1817_s3 = inlined_call_operand.vmem [shape: bf16[16,144], index: 3, kind: input, shape index: {}]   ;;  %s1818_s0 = inlined_call_operand.vmem [shape: bf16[144,512], index: 0, kind: input, shape index: {}]   ;;  %s1819_s5 = inlined_call_operand.vmem [shape: bf16[16,144], index: 5, kind: input, shape index: {}]   ;;  %s1820_s6 = inlined_call_operand.vmem [shape: f32[16,1], index: 6, kind: input, shape index: {}]   ;;  %s1821_s2 = inlined_call_operand.vmem [shape: bf16[144,512], index: 2, kind: input, shape index: {}]   ;;  %s1822_s7 = inlined_call_operand.vmem [shape: bf16[16,512], index: 7, kind: output, shape index: {}]  }
   0x1   :  { %v101_v0 = vld [vmem:[%s1815_s1] sm:$0xff]  ;;  %v103_v1 = vld [vmem:[%s1815_s1 + $0x10] sm:$0xff]  ;;  %v102_v2 = vld [vmem:[%s1815_s1 + $0x8] sm:$0xff]  ;;  %1289 = vset.pattern.permute.xlu0 %v1299_v3 }
   0x2   :  { %v137_v4 = vmax.bf16 %v1299_v3, %v101_v0  ;;  %v139_v5 = vmax.bf16 %v1299_v3, %v103_v1  ;;  %v104_v6 = vld [vmem:[%s1815_s1 + $0x18] sm:$0xff]  ;;  %v138_v7 = vmax.bf16 %v1299_v3, %v102_v2  ;;  %v105_v8 = vld [vmem:[%s1815_s1 + $0x20] sm:$0xff]  ;;  %v107_v9 = vld [vmem:[%s1815_s1 + $0x30] sm:$0xff] }
   0x3   :  { %v140_v10 = vmax.bf16 %v1299_v3, %v104_v6  ;;  %v141_v11 = vmax.bf16 %v1299_v3, %v105_v8  ;;  %v143_v12 = vmax.bf16 %v1299_v3, %v107_v9  ;;  %v106_v13 = vld [vmem:[%s1815_s1 + $0x28] sm:$0xff]  ;;  %v108_v14 = vld [vmem:[%s1815_s1 + $0x38] sm:$0xff]  ;;  %v109_v15 = vld [vmem:[%s1815_s1 + $0x40] sm:$0xff] }
   0x4   :  { %v1147_v16 = vcombine.high %v137_v4, %v139_v5  ;;  %v1146_v17 = vcombine.low %v137_v4, %v139_v5  ;;  %v142_v18 = vmax.bf16 %v1299_v3, %v106_v13  ;;  %v144_v19 = vmax.bf16 %v1299_v3, %v108_v14  ;;  %v111_v20 = vld [vmem:[%s1815_s1 + $0x50] sm:$0xff]  ;;  %v110_v21 = vld [vmem:[%s1815_s1 + $0x48] sm:$0xff]  ;;  %v112_v22 = vld [vmem:[%s1815_s1 + $0x58] sm:$0xff] }
   0x5   :  { %v1149_v23 = vcombine.high %v138_v7, %v140_v10  ;;  %v1148_v24 = vcombine.low %v138_v7, %v140_v10  ;;  %v1151_v25 = vcombine.high %v141_v11, %v143_v12  ;;  %v113_v26 = vld [vmem:[%s1815_s1 + $0x60] sm:$0xff]  ;;  %v115_v27 = vld [vmem:[%s1815_s1 + $0x70] sm:$0xff]  ;;  %v1150_v29 = vcombine.low %v141_v11, %v143_v12  ;;  %v114_v32 = vld [vmem:[%s1815_s1 + $0x68] sm:$0xff] }
   0x6   :  { %368 = vmatprep.subr.bf16.mxu0 %v1147_v16  ;;  %v1153_v28 = vcombine.high %v142_v18, %v144_v19  ;;  %v145_v30 = vmax.bf16 %v1299_v3, %v109_v15  ;;  %v147_v31 = vmax.bf16 %v1299_v3, %v111_v20  ;;  %v116_v33 = vld [vmem:[%s1815_s1 + $0x78] sm:$0xff]  ;;  %v1152_v34 = vcombine.low %v142_v18, %v144_v19  ;;  %v117_v43 = vld [vmem:[%s1815_s1 + $0x80] sm:$0xff]  ;;  %v119_v44 = vld [vmem:[%s1815_s1 + $0x90] sm:$0xff] }
   0x7   :  { %411 = vmatprep.subr.bf16.mxu1 %v1149_v23  ;;  %369 = vmatpush1.bf16.msra.mxu0 %v1146_v17  ;;  %v146_v35 = vmax.bf16 %v1299_v3, %v110_v21  ;;  %v148_v36 = vmax.bf16 %v1299_v3, %v112_v22  ;;  %v149_v38 = vmax.bf16 %v1299_v3, %v113_v26  ;;  %v118_v45 = vld [vmem:[%s1815_s1 + $0x88] sm:$0xff]  ;;  %v120_v46 = vld [vmem:[%s1815_s1 + $0x98] sm:$0xff]  ;;  %v121_v52 = vld [vmem:[%s1815_s1 + $0xa0] sm:$0xff] }
   0x8   :  { %412 = vmatpush1.bf16.msra.mxu1 %v1148_v24  ;;  %370 = vmatprep.subr.bf16.mxu0 %v1151_v25  ;;  %v1155_v37 = vcombine.high %v145_v30, %v147_v31  ;;  %v151_v39 = vmax.bf16 %v1299_v3, %v115_v27  ;;  %v150_v41 = vmax.bf16 %v1299_v3, %v114_v32  ;;  %v123_v56 = vld [vmem:[%s1815_s1 + $0xb0] sm:$0xff]  ;;  %v122_v57 = vld [vmem:[%s1815_s1 + $0xa8] sm:$0xff]  ;;  %v124_v58 = vld [vmem:[%s1815_s1 + $0xb8] sm:$0xff] }
   0x9   :  { %413 = vmatprep.subr.bf16.mxu1 %v1153_v28  ;;  %v1157_v40 = vcombine.high %v146_v35, %v148_v36  ;;  %v152_v42 = vmax.bf16 %v1299_v3, %v116_v33  ;;  %v1154_v47 = vcombine.low %v145_v30, %v147_v31  ;;  %v1156_v48 = vcombine.low %v146_v35, %v148_v36  ;;  %v1292_v59 = vld [vmem:[%s1816_s4 + $0x4] ss:$8 sps:$4 sm:$0xff]   ;;  %v127_v6 = vld [vmem:[%s1815_s1 + $0xd0] sm:$0xff]  ;;  %v128_v8 = vld [vmem:[%s1815_s1 + $0xd8] sm:$0xff] }
   0xa   :  { %v1159_v49 = vcombine.high %v149_v38, %v151_v39  ;;  %v153_v50 = vmax.bf16 %v1299_v3, %v117_v43  ;;  %v155_v51 = vmax.bf16 %v1299_v3, %v119_v44  ;;  %v154_v54 = vmax.bf16 %v1299_v3, %v118_v45  ;;  %v125_v5 = vld [vmem:[%s1815_s1 + $0xc0] sm:$0xff]  ;;  %v126_v7 = vld [vmem:[%s1815_s1 + $0xc8] sm:$0xff]  ;;  %1182 = vmatprep.mubr.msk.bf16.mxu0 %vm364_vm0, %v1292_v59  ;;  %v131_v18 = vld [vmem:[%s1815_s1 + $0xf0] sm:$0xff] }
   0xb   :  { %371 = vmatpush1.bf16.msra.mxu0 %v1150_v29  ;;  %v1161_v53 = vcombine.high %v150_v41, %v152_v42  ;;  %v156_v55 = vmax.bf16 %v1299_v3, %v120_v46  ;;  %v1158_v60 = vcombine.low %v149_v38, %v151_v39  ;;  %v1160_v61 = vcombine.low %v150_v41, %v152_v42  ;;  %v129_v14 = vld [vmem:[%s1815_s1 + $0xe0] sm:$0xff]  ;;  %v130_v19 = vld [vmem:[%s1815_s1 + $0xe8] sm:$0xff]  ;;  %v132_v20 = vld [vmem:[%s1815_s1 + $0xf8] sm:$0xff] }
   0xc   :  { %414 = vmatpush1.bf16.msra.mxu1 %v1152_v34  ;;  %372 = vmatprep.subr.bf16.mxu0 %v1155_v37  ;;  %v1163_v62 = vcombine.high %v153_v50, %v155_v51  ;;  %v157_v63 = vmax.bf16 %v1299_v3, %v121_v52  ;;  %v159_v0 = vmax.bf16 %v1299_v3, %v123_v56  ;;  %v133_v29 = vld [vmem:[%s1815_s1 + $0x100] sm:$0xff]  ;;  %v135_v30 = vld [vmem:[%s1815_s1 + $0x110] sm:$0xff]  ;;  %v134_v31 = vld [vmem:[%s1815_s1 + $0x108] sm:$0xff] }
   0xd   :  { %415 = vmatprep.subr.bf16.mxu1 %v1157_v40  ;;  %v1165_v1 = vcombine.high %v154_v54, %v156_v55  ;;  %v158_v2 = vmax.bf16 %v1299_v3, %v122_v57  ;;  %v160_v4 = vmax.bf16 %v1299_v3, %v124_v58  ;;  %v1162_v9 = vcombine.low %v153_v50, %v155_v51  ;;  %v136_v32 = vld [vmem:[%s1815_s1 + $0x118] sm:$0xff]  ;;  %v27_v41 = vld [vmem:[%s1818_s0] sm:$0xff]  ;;  %v29_v42 = vld [vmem:[%s1818_s0 + $0x10] sm:$0xff] }
   0xe   :  { %v1164_v10 = vcombine.low %v154_v54, %v156_v55  ;;  %v1167_v11 = vcombine.high %v157_v63, %v159_v0  ;;  %v161_v12 = vmax.bf16 %v1299_v3, %v125_v5  ;;  %v163_v13 = vmax.bf16 %v1299_v3, %v127_v6  ;;  %1183 = vmatprep.mubr.msk.bf16.mxu1 %vm364_vm0, %v1292_v59  ;;  %v28_v43 = vld [vmem:[%s1818_s0 + $0x8] sm:$0xff]  ;;  %v30_v44 = vld [vmem:[%s1818_s0 + $0x18] sm:$0xff]  ;;  %v33_v54 = vld [vmem:[%s1818_s0 + $0x30] sm:$0xff] }
   0xf   :  { %373 = vmatpush1.bf16.msra.mxu0 %v1154_v47  ;;  %v1169_v15 = vcombine.high %v158_v2, %v160_v4  ;;  %v162_v16 = vmax.bf16 %v1299_v3, %v126_v7  ;;  %v164_v17 = vmax.bf16 %v1299_v3, %v128_v8  ;;  %v1166_v21 = vcombine.low %v157_v63, %v159_v0  ;;  %v32_v55 = vld [vmem:[%s1818_s0 + $0x28] sm:$0xff]  ;;  %v34_v56 = vld [vmem:[%s1818_s0 + $0x38] sm:$0xff] }
  0x10   :  { %416 = vmatpush1.bf16.msra.mxu1 %v1156_v48  ;;  %374 = vmatprep.subr.bf16.mxu0 %v1159_v49  ;;  %v165_v22 = vmax.bf16 %v1299_v3, %v129_v14  ;;  %v1168_v23 = vcombine.low %v158_v2, %v160_v4  ;;  %v1171_v24 = vcombine.high %v161_v12, %v163_v13  ;;  %v37_v2 = vld [vmem:[%s1818_s0 + $0x50] sm:$0xff]  ;;  %v1290_v4 = vld [vmem:[%s1816_s4] ss:$8 sps:$4 sm:$0xff]   ;;  %v38_v6 = vld [vmem:[%s1818_s0 + $0x58] sm:$0xff] }
  0x11   :  { %417 = vmatprep.subr.bf16.mxu1 %v1161_v53  ;;  %v167_v25 = vmax.bf16 %v1299_v3, %v131_v18  ;;  %v1173_v26 = vcombine.high %v162_v16, %v164_v17  ;;  %v166_v27 = vmax.bf16 %v1299_v3, %v130_v19  ;;  %v168_v28 = vmax.bf16 %v1299_v3, %v132_v20  ;;  %v31_v53 = vld [vmem:[%s1818_s0 + $0x20] sm:$0xff]  ;;  %v36_v5 = vld [vmem:[%s1818_s0 + $0x48] sm:$0xff]  ;;  %v42_v19 = vld [vmem:[%s1818_s0 + $0x78] sm:$0xff] }
  0x12   :  { %v1170_v33 = vcombine.low %v161_v12, %v163_v13  ;;  %v1172_v34 = vcombine.low %v162_v16, %v164_v17  ;;  %v169_v36 = vmax.bf16 %v1299_v3, %v133_v29  ;;  %v171_v37 = vmax.bf16 %v1299_v3, %v135_v30  ;;  %v41_v16 = vld [vmem:[%s1818_s0 + $0x70] sm:$0xff]  ;;  %v1293_v17 = vld [vmem:[%s1817_s3 + $0x4] ss:$8 sps:$4 sm:$0xff]  }
  0x13   :  { %375 = vmatpush1.bf16.msra.mxu0 %v1158_v60  ;;  %v1175_v35 = vcombine.high %v165_v22, %v167_v25  ;;  %v1177_v38 = vcombine.high %v166_v27, %v168_v28  ;;  %v170_v39 = vmax.bf16 %v1299_v3, %v134_v31  ;;  %v172_v40 = vmax.bf16 %v1299_v3, %v136_v32  ;;  %v40_v18 = vld [vmem:[%s1818_s0 + $0x68] sm:$0xff]  ;;  %v45_v29 = vld [vmem:[%s1818_s0 + $0x90] sm:$0xff]  ;;  %v46_v31 = vld [vmem:[%s1818_s0 + $0x98] sm:$0xff] }
  0x14   :  { %418 = vmatpush1.bf16.msra.mxu1 %v1160_v61  ;;  %376 = vmatprep.subr.bf16.mxu0 %v1163_v62  ;;  %v1174_v45 = vcombine.low %v165_v22, %v167_v25  ;;  %v1176_v46 = vcombine.low %v166_v27, %v168_v28  ;;  %v1179_v47 = vcombine.high %v169_v36, %v171_v37  ;;  %v43_v28 = vld [vmem:[%s1818_s0 + $0x80] sm:$0xff]  ;;  %v44_v30 = vld [vmem:[%s1818_s0 + $0x88] sm:$0xff] }
  0x15   :  { %419 = vmatprep.subr.bf16.mxu1 %v1165_v1  ;;  %v63_v48 = vmax.bf16 %v1299_v3, %v27_v41  ;;  %v65_v49 = vmax.bf16 %v1299_v3, %v29_v42  ;;  %v1181_v50 = vcombine.high %v170_v39, %v172_v40  ;;  %v64_v51 = vmax.bf16 %v1299_v3, %v28_v43  ;;  %v35_v1 = vld [vmem:[%s1818_s0 + $0x40] sm:$0xff]  ;;  %v49_v42 = vld [vmem:[%s1818_s0 + $0xb0] sm:$0xff]  ;;  %v48_v43 = vld [vmem:[%s1818_s0 + $0xa8] sm:$0xff] }
  0x16   :  { %v66_v52 = vmax.bf16 %v1299_v3, %v30_v44  ;;  %v1178_v57 = vcombine.low %v169_v36, %v171_v37  ;;  %v1180_v58 = vcombine.low %v170_v39, %v172_v40  ;;  %v67_v60 = vmax.bf16 %v1299_v3, %v31_v53  ;;  %v47_v41 = vld [vmem:[%s1818_s0 + $0xa0] sm:$0xff]  ;;  %v50_v44 = vld [vmem:[%s1818_s0 + $0xb8] sm:$0xff] }
  0x17   :  { %377 = vmatpush1.bf16.msra.mxu0 %v1162_v9  ;;  %v1187_v59 = vcombine.high %v63_v48, %v65_v49  ;;  %v69_v61 = vmax.bf16 %v1299_v3, %v33_v54  ;;  %v68_v63 = vmax.bf16 %v1299_v3, %v32_v55  ;;  %v70_v0 = vmax.bf16 %v1299_v3, %v34_v56  ;;  %v51_v54 = vld [vmem:[%s1818_s0 + $0xc0] sm:$0xff]  ;;  %v53_v55 = vld [vmem:[%s1818_s0 + $0xd0] sm:$0xff]  ;;  %v52_v56 = vld [vmem:[%s1818_s0 + $0xc8] sm:$0xff] }
  0x18   :  { %420 = vmatpush1.bf16.msra.mxu1 %v1164_v10  ;;  %378 = vmatprep.subr.bf16.mxu0 %v1167_v11  ;;  %v1189_v62 = vcombine.high %v64_v51, %v66_v52  ;;  %v1186_v7 = vcombine.low %v63_v48, %v65_v49  ;;  %v1188_v8 = vcombine.low %v64_v51, %v66_v52 }
  0x19   :  { %421 = vmatprep.subr.bf16.mxu1 %v1169_v15  ;;  %v1191_v9 = vcombine.high %v67_v60, %v69_v61  ;;  %v71_v10 = vmax.bf16 %v1299_v3, %v35_v1  ;;  %v73_v11 = vmax.bf16 %v1299_v3, %v37_v2  ;;  %v1193_v12 = vcombine.high %v68_v63, %v70_v0  ;;  %v39_v15 = vld [vmem:[%s1818_s0 + $0x60] sm:$0xff] }
  0x1a   :  { %v72_v13 = vmax.bf16 %v1299_v3, %v36_v5  ;;  %v74_v14 = vmax.bf16 %v1299_v3, %v38_v6  ;;  %v1190_v20 = vcombine.low %v67_v60, %v69_v61  ;;  %v78_v27 = vmax.bf16 %v1299_v3, %v42_v19  ;;  %v55_v2 = vld [vmem:[%s1818_s0 + $0xe0] sm:$0xff]  ;;  %v56_v5 = vld [vmem:[%s1818_s0 + $0xe8] sm:$0xff]  ;;  %v58_v6 = vld [vmem:[%s1818_s0 + $0xf8] sm:$0xff] }
  0x1b   :  { %379 = vmatpush1.bf16.msra.mxu0 %v1166_v21  ;;  %v1192_v21 = vcombine.low %v68_v63, %v70_v0  ;;  %v1195_v22 = vcombine.high %v71_v10, %v73_v11  ;;  %v1194_v32 = vcombine.low %v71_v10, %v73_v11  ;;  %v79_v36 = vmax.bf16 %v1299_v3, %v43_v28  ;;  %v734_v28 = vld [vmem:[%s1821_s2 + $0x10] sm:$0xff] }
  0x1c   :  { %422 = vmatpush1.bf16.msra.mxu1 %v1168_v23  ;;  %380 = vmatprep.subr.bf16.mxu0 %v1171_v24  ;;  %v75_v23 = vmax.bf16 %v1299_v3, %v39_v15  ;;  %v77_v24 = vmax.bf16 %v1299_v3, %v41_v16  ;;  %v1197_v25 = vcombine.high %v72_v13, %v74_v14  ;;  %v59_v15 = vld [vmem:[%s1818_s0 + $0x100] sm:$0xff]  ;;  %v61_v16 = vld [vmem:[%s1818_s0 + $0x110] sm:$0xff] }
  0x1d   :  { %423 = vmatprep.subr.bf16.mxu1 %v1173_v26  ;;  %v76_v26 = vmax.bf16 %v1299_v3, %v40_v18  ;;  %v81_v37 = vmax.bf16 %v1299_v3, %v45_v29  ;;  %v80_v39 = vmax.bf16 %v1299_v3, %v44_v30  ;;  %v82_v40 = vmax.bf16 %v1299_v3, %v46_v31  ;;  %v62_v18 = vld [vmem:[%s1818_s0 + $0x118] sm:$0xff]  ;;  %v733_v29 = vld [vmem:[%s1821_s2 + $0x8] sm:$0xff] }
  0x1e   :  { %v83_v49 = vmax.bf16 %v1299_v3, %v47_v41  ;;  %v84_v52 = vmax.bf16 %v1299_v3, %v48_v43  ;;  %v86_v53 = vmax.bf16 %v1299_v3, %v50_v44  ;;  %v87_v61 = vmax.bf16 %v1299_v3, %v51_v54  ;;  %v735_v30 = vld [vmem:[%s1821_s2 + $0x18] sm:$0xff]  ;;  %v737_v41 = vld [vmem:[%s1821_s2 + $0x28] sm:$0xff] }
  0x1f   :  { %381 = vmatpush1.bf16.msra.mxu0 %v1170_v33  ;;  %v1196_v33 = vcombine.low %v72_v13, %v74_v14  ;;  %v1203_v48 = vcombine.high %v79_v36, %v81_v37  ;;  %v1205_v51 = vcombine.high %v80_v39, %v82_v40  ;;  %v88_v0 = vmax.bf16 %v1299_v3, %v52_v56  ;;  %v741_v54 = vld [vmem:[%s1821_s2 + $0x48] sm:$0xff] }
  0x20   :  { %424 = vmatpush1.bf16.msra.mxu1 %v1172_v34  ;;  %382 = vmatprep.subr.bf16.mxu0 %v1175_v35  ;;  %v1092_v34 = vld [vmem:[%s1820_s6] sm:$0xff]  ;;  %v1199_v35 = vcombine.high %v75_v23, %v77_v24  ;;  %v1209_v63 = vcombine.high %v84_v52, %v86_v53  ;;  %v91_v10 = vmax.bf16 %v1299_v3, %v55_v2 }
  0x21   :  { %425 = vmatprep.subr.bf16.mxu1 %v1177_v38  ;;  %v1201_v38 = vcombine.high %v76_v26, %v78_v27  ;;  %1096 = vperm.xlu0 %1289, %v1092_v34   ;;  %v92_v13 = vmax.bf16 %v1299_v3, %v56_v5  ;;  %v94_v14 = vmax.bf16 %v1299_v3, %v58_v6  ;;  %v1296_v2 = vld [vmem:[%s1819_s5 + $0x4] ss:$8 sps:$4 sm:$0xff]   ;;  %v747_v5 = vld [vmem:[%s1821_s2 + $0x78] sm:$0xff] }
  0x23   :  { %383 = vmatpush1.bf16.msra.mxu0 %v1174_v45  ;;  %v1198_v45 = vcombine.low %v75_v23, %v77_v24  ;;  %v97_v23 = vmax.bf16 %v1299_v3, %v61_v16  ;;  %v1217_v24 = vcombine.high %v92_v13, %v94_v14  ;;  %v749_v16 = vld [vmem:[%s1821_s2 + $0x88] sm:$0xff] }
  0x24   :  { %426 = vmatpush1.bf16.msra.mxu1 %v1176_v46  ;;  %384 = vmatprep.subr.bf16.mxu0 %v1179_v47  ;;  %v1200_v46 = vcombine.low %v76_v26, %v78_v27  ;;  %v1093_v47 = vld [vmem:[%s1820_s6 + $0x8] sm:$0xff]  ;;  %v98_v26 = vmax.bf16 %v1299_v3, %v62_v18  ;;  %v732_v27 = vld [vmem:[%s1821_s2] sm:$0xff] }
  0x25   :  { %427 = vmatprep.subr.bf16.mxu1 %v1181_v50  ;;  %v85_v50 = vmax.bf16 %v1299_v3, %v49_v42  ;;  %1101 = vperm.xlu0 %1289, %v1093_v47   ;;  %v768_v34 = vmax.bf16 %v1299_v3, %v732_v27  ;;  %v739_v42 = vld [vmem:[%s1821_s2 + $0x38] sm:$0xff]  ;;  %v754_v27 = vld [vmem:[%s1821_s2 + $0xb0] sm:$0xff] }
  0x27   :  { %385 = vmatpush1.bf16.msra.mxu0 %v1178_v57  ;;  %v54_v57 = vld [vmem:[%s1818_s0 + $0xd8] sm:$0xff]  ;;  %v1207_v60 = vcombine.high %v83_v49, %v85_v50 }
  0x28   :  { %428 = vmatpush1.bf16.msra.mxu1 %v1180_v58  ;;  %646 = vmatprep.subr.bf16.mxu0 %v1187_v59  ;;  %v1202_v58 = vcombine.low %v79_v36, %v81_v37  ;;  %v1204_v59 = vcombine.low %v80_v39, %v82_v40  ;;  %v90_v1 = vmax.bf16 %v1299_v3, %v54_v57  ;;  %v736_v39 = vld [vmem:[%s1821_s2 + $0x20] sm:$0xff]  ;;  %v738_v40 = vld [vmem:[%s1821_s2 + $0x30] sm:$0xff] }
  0x29   :  { %689 = vmatprep.subr.bf16.mxu1 %v1189_v62  ;;  %v89_v62 = vmax.bf16 %v1299_v3, %v53_v55  ;;  %v769_v37 = vmax.bf16 %v1299_v3, %v733_v29  ;;  %v774_v47 = vmax.bf16 %v1299_v3, %v738_v40  ;;  %v743_v55 = vld [vmem:[%s1821_s2 + $0x58] sm:$0xff]  ;;  %v757_v40 = vld [vmem:[%s1821_s2 + $0xc8] sm:$0xff] }
  0x2a   :  { %401 = vmatmul.mubr.bf16.vlgmr.msra.gmra.mrb[0].mxu0 %v1290_v4  ;;  %v755_v29 = vld [vmem:[%s1821_s2 + $0xb8] sm:$0xff] }
  0x2b   :  { %444 = vmatmul.mubr.bf16.vlgmr.msra.gmra.mrb[0].mxu1 %v1290_v4  ;;  %647 = vmatpush1.bf16.msra.mxu0 %v1186_v7  ;;  %v57_v4 = vld [vmem:[%s1818_s0 + $0xf0] sm:$0xff]  ;;  %v1206_v7 = vcombine.low %v83_v49, %v85_v50  ;;  %v1210_v19 = vcombine.low %v87_v61, %v89_v62  ;;  %v773_v49 = vmax.bf16 %v1299_v3, %v737_v41  ;;  %v759_v41 = vld [vmem:[%s1821_s2 + $0xd8] sm:$0xff] }
  0x2c   :  { %690 = vmatpush1.bf16.msra.mxu1 %v1188_v8  ;;  %648 = vmatprep.subr.bf16.mxu0 %v1191_v9  ;;  %v1208_v8 = vcombine.low %v84_v52, %v86_v53  ;;  %v1211_v9 = vcombine.high %v87_v61, %v89_v62  ;;  %v93_v11 = vmax.bf16 %v1299_v3, %v57_v4  ;;  %v742_v52 = vld [vmem:[%s1821_s2 + $0x50] sm:$0xff]  ;;  %v1295_v53 = vld [vmem:[%s1817_s3] ss:$8 sps:$4 sm:$0xff]  }
  0x2d   :  { %691 = vmatprep.subr.bf16.mxu1 %v1193_v12  ;;  %1222 = vmatprep.mubr.msk.bf16.mxu0 %vm364_vm0, %v1293_v17  ;;  %v1213_v12 = vcombine.high %v88_v0, %v90_v1  ;;  %v775_v50 = vmax.bf16 %v1299_v3, %v739_v42  ;;  %v777_v62 = vmax.bf16 %v1299_v3, %v741_v54  ;;  %v745_v4 = vld [vmem:[%s1821_s2 + $0x68] sm:$0xff] }
  0x2e   :  { %1223 = vmatprep.mubr.msk.bf16.mxu1 %vm364_vm0, %v1293_v17  ;;  %v60_v17 = vld [vmem:[%s1818_s0 + $0x108] sm:$0xff]  ;;  %v1214_v31 = vcombine.low %v91_v10, %v93_v11 }
  0x2f   :  { %649 = vmatpush1.bf16.msra.mxu0 %v1190_v20  ;;  %v1212_v20 = vcombine.low %v88_v0, %v90_v1  ;;  %v1233_v61 = vcombine.high %v773_v49, %v775_v50  ;;  %v744_v0 = vld [vmem:[%s1821_s2 + $0x60] sm:$0xff]  ;;  %v746_v1 = vld [vmem:[%s1821_s2 + $0x70] sm:$0xff] }
  0x30   :  { %692 = vmatpush1.bf16.msra.mxu1 %v1192_v21  ;;  %650 = vmatprep.subr.bf16.mxu0 %v1195_v22  ;;  %v1215_v21 = vcombine.high %v91_v10, %v93_v11  ;;  %v95_v22 = vmax.bf16 %v1299_v3, %v59_v15  ;;  %v782_v10 = vmax.bf16 %v1299_v3, %v746_v1  ;;  %v750_v15 = vld [vmem:[%s1821_s2 + $0x90] sm:$0xff]  ;;  %v767_v1 = vld [vmem:[%s1821_s2 + $0x118] sm:$0xff] }
  0x31   :  { %693 = vmatprep.subr.bf16.mxu1 %v1197_v25  ;;  %v96_v25 = vmax.bf16 %v1299_v3, %v60_v17  ;;  %v751_v17 = vld [vmem:[%s1821_s2 + $0x98] sm:$0xff] }
  0x32   :  { %v1218_v43 = vcombine.low %v95_v22, %v97_v23 }
  0x33   :  { %651 = vmatpush1.bf16.msra.mxu0 %v1194_v32  ;;  %v1216_v32 = vcombine.low %v92_v13, %v94_v14  ;;  %v1221_v36 = vcombine.high %v96_v25, %v98_v26  ;;  %v1220_v44 = vcombine.low %v96_v25, %v98_v26  ;;  %v783_v13 = vmax.bf16 %v1299_v3, %v747_v5  ;;  %v748_v14 = vld [vmem:[%s1821_s2 + $0x80] sm:$0xff] }
  0x34   :  { %694 = vmatpush1.bf16.msra.mxu1 %v1196_v33  ;;  %652 = vmatprep.subr.bf16.mxu0 %v1199_v35  ;;  %v1219_v33 = vcombine.high %v95_v22, %v97_v23  ;;  %v770_v35 = vmax.bf16 %v1299_v3, %v734_v28  ;;  %v786_v22 = vmax.bf16 %v1299_v3, %v750_v15  ;;  %v752_v26 = vld [vmem:[%s1821_s2 + $0xa0] sm:$0xff]  ;;  %v753_v28 = vld [vmem:[%s1821_s2 + $0xa8] sm:$0xff] }
  0x35   :  { %695 = vmatprep.subr.bf16.mxu1 %v1201_v38  ;;  %v771_v38 = vmax.bf16 %v1299_v3, %v735_v30  ;;  %v787_v25 = vmax.bf16 %v1299_v3, %v751_v17  ;;  %v1298_v17 = vld [vmem:[%s1819_s5] ss:$8 sps:$4 sm:$0xff]  }
  0x36   :  { %v1226_v56 = vcombine.low %v768_v34, %v770_v35 }
  0x37   :  { %653 = vmatpush1.bf16.msra.mxu0 %v1198_v45  ;;  %v1227_v45 = vcombine.high %v768_v34, %v770_v35  ;;  %v1228_v57 = vcombine.low %v769_v37, %v771_v38  ;;  %v790_v34 = vmax.bf16 %v1299_v3, %v754_v27 }
  0x38   :  { %696 = vmatpush1.bf16.msra.mxu1 %v1200_v46  ;;  %654 = vmatprep.subr.bf16.mxu0 %v1203_v48  ;;  %v772_v46 = vmax.bf16 %v1299_v3, %v736_v39  ;;  %v1229_v48 = vcombine.high %v769_v37, %v771_v38  ;;  %v791_v37 = vmax.bf16 %v1299_v3, %v755_v29  ;;  %v756_v38 = vld [vmem:[%s1821_s2 + $0xc0] sm:$0xff]  ;;  %v758_v39 = vld [vmem:[%s1821_s2 + $0xd0] sm:$0xff] }
  0x39   :  { %697 = vmatprep.subr.bf16.mxu1 %v1205_v51  ;;  %v740_v51 = vld [vmem:[%s1821_s2 + $0x40] sm:$0xff] }
  0x3a   :  { %v1230_v6 = vcombine.low %v772_v46, %v774_v47 }
  0x3b   :  { %655 = vmatpush1.bf16.msra.mxu0 %v1202_v58  ;;  %v1231_v58 = vcombine.high %v772_v46, %v774_v47  ;;  %v794_v46 = vmax.bf16 %v1299_v3, %v758_v39 }
  0x3c   :  { %698 = vmatpush1.bf16.msra.mxu1 %v1204_v59  ;;  %656 = vmatprep.subr.bf16.mxu0 %v1207_v60  ;;  %v776_v59 = vmax.bf16 %v1299_v3, %v740_v51  ;;  %v778_v60 = vmax.bf16 %v1299_v3, %v742_v52  ;;  %v762_v51 = vld [vmem:[%s1821_s2 + $0xf0] sm:$0xff]  ;;  %v761_v52 = vld [vmem:[%s1821_s2 + $0xe8] sm:$0xff] }
  0x3d   :  { %699 = vmatprep.subr.bf16.mxu1 %v1209_v63  ;;  %v779_v63 = vmax.bf16 %v1299_v3, %v743_v55 }
  0x3e   :  { %v1234_v18 = vcombine.low %v776_v59, %v778_v60 }
  0x3f   :  { %657 = vmatpush1.bf16.msra.mxu0 %v1206_v7  ;;  %v1232_v7 = vcombine.low %v773_v49, %v775_v50  ;;  %v1237_v11 = vcombine.high %v777_v62, %v779_v63  ;;  %v795_v49 = vmax.bf16 %v1299_v3, %v759_v41  ;;  %v760_v50 = vld [vmem:[%s1821_s2 + $0xe0] sm:$0xff] }
  0x40   :  { %700 = vmatpush1.bf16.msra.mxu1 %v1208_v8  ;;  %658 = vmatprep.subr.bf16.mxu0 %v1211_v9  ;;  %v1235_v8 = vcombine.high %v776_v59, %v778_v60  ;;  %v780_v9 = vmax.bf16 %v1299_v3, %v744_v0  ;;  %v797_v60 = vmax.bf16 %v1299_v3, %v761_v52  ;;  %v765_v0 = vld [vmem:[%s1821_s2 + $0x108] sm:$0xff] }
  0x41   :  { %701 = vmatprep.subr.bf16.mxu1 %v1213_v12  ;;  %v781_v12 = vmax.bf16 %v1299_v3, %v745_v4 }
  0x42   :  { %v1238_v30 = vcombine.low %v780_v9, %v782_v10 }
  0x43   :  { %659 = vmatpush1.bf16.msra.mxu0 %v1210_v19  ;;  %v1236_v19 = vcombine.low %v777_v62, %v779_v63  ;;  %v1241_v23 = vcombine.high %v781_v12, %v783_v13  ;;  %v764_v62 = vld [vmem:[%s1821_s2 + $0x100] sm:$0xff]  ;;  %v766_v63 = vld [vmem:[%s1821_s2 + $0x110] sm:$0xff] }
  0x44   :  { %702 = vmatpush1.bf16.msra.mxu1 %v1212_v20  ;;  %660 = vmatprep.subr.bf16.mxu0 %v1215_v21  ;;  %v1239_v20 = vcombine.high %v780_v9, %v782_v10  ;;  %v784_v21 = vmax.bf16 %v1299_v3, %v748_v14  ;;  %v801_v9 = vmax.bf16 %v1299_v3, %v765_v0 }
  0x45   :  { %703 = vmatprep.subr.bf16.mxu1 %v1217_v24  ;;  %v785_v24 = vmax.bf16 %v1299_v3, %v749_v16  ;;  %v803_v10 = vmax.bf16 %v1299_v3, %v767_v1 }
  0x46   :  { %v1242_v42 = vcombine.low %v784_v21, %v786_v22 }
  0x47   :  { %661 = vmatpush1.bf16.msra.mxu0 %v1214_v31  ;;  %v1240_v31 = vcombine.low %v781_v12, %v783_v13  ;;  %v1245_v35 = vcombine.high %v785_v24, %v787_v25  ;;  %v1261_v14 = vcombine.high %v801_v9, %v803_v10  ;;  %v1260_v16 = vcombine.low %v801_v9, %v803_v10 }
  0x48   :  { %704 = vmatpush1.bf16.msra.mxu1 %v1216_v32  ;;  %662 = vmatprep.subr.bf16.mxu0 %v1219_v33  ;;  %v1243_v32 = vcombine.high %v784_v21, %v786_v22  ;;  %v788_v33 = vmax.bf16 %v1299_v3, %v752_v26 }
  0x49   :  { %705 = vmatprep.subr.bf16.mxu1 %v1221_v36  ;;  %v789_v36 = vmax.bf16 %v1299_v3, %v753_v28 }
  0x4a   :  { %v1246_v54 = vcombine.low %v788_v33, %v790_v34 }
  0x4b   :  { %663 = vmatpush1.bf16.msra.mxu0 %v1218_v43  ;;  %v1244_v43 = vcombine.low %v785_v24, %v787_v25  ;;  %v1249_v47 = vcombine.high %v789_v36, %v791_v37  ;;  %v1248_v55 = vcombine.low %v789_v36, %v791_v37 }
  0x4c   :  { %706 = vmatpush1.bf16.msra.mxu1 %v1220_v44  ;;  %998 = vmatprep.subr.bf16.mxu0 %v1227_v45  ;;  %v1247_v44 = vcombine.high %v788_v33, %v790_v34  ;;  %v792_v45 = vmax.bf16 %v1299_v3, %v756_v38 }
  0x4d   :  { %1041 = vmatprep.subr.bf16.mxu1 %v1229_v48  ;;  %v793_v48 = vmax.bf16 %v1299_v3, %v757_v40 }
  0x4e   :  { %679 = vmatmul.mubr.bf16.vlgmr.msra.gmra.mrb[0].mxu0 %v1295_v53 }
  0x4f   :  { %722 = vmatmul.mubr.bf16.vlgmr.msra.gmra.mrb[0].mxu1 %v1295_v53  ;;  %999 = vmatpush1.bf16.msra.mxu0 %v1226_v56  ;;  %v763_v53 = vld [vmem:[%s1821_s2 + $0xf8] sm:$0xff]  ;;  %v1251_v56 = vcombine.high %v792_v45, %v794_v46  ;;  %v1253_v59 = vcombine.high %v793_v48, %v795_v49  ;;  %v1252_v4 = vcombine.low %v793_v48, %v795_v49 }
  0x50   :  { %1042 = vmatpush1.bf16.msra.mxu1 %v1228_v57  ;;  %1000 = vmatprep.subr.bf16.mxu0 %v1231_v58  ;;  %v796_v57 = vmax.bf16 %v1299_v3, %v760_v50  ;;  %v798_v58 = vmax.bf16 %v1299_v3, %v762_v51 }
  0x51   :  { %1043 = vmatprep.subr.bf16.mxu1 %v1233_v61  ;;  %1262 = vmatprep.mubr.msk.bf16.mxu0 %vm364_vm0, %v1296_v2  ;;  %v799_v61 = vmax.bf16 %v1299_v3, %v763_v53 }
  0x52   :  { %1263 = vmatprep.mubr.msk.bf16.mxu1 %vm364_vm0, %v1296_v2  ;;  %v1250_v2 = vcombine.low %v792_v45, %v794_v46  ;;  %v1255_v5 = vcombine.high %v796_v57, %v798_v58 }
  0x53   :  { %1001 = vmatpush1.bf16.msra.mxu0 %v1230_v6  ;;  %v800_v6 = vmax.bf16 %v1299_v3, %v764_v62  ;;  %v1256_v12 = vcombine.low %v797_v60, %v799_v61 }
  0x54   :  { %1044 = vmatpush1.bf16.msra.mxu1 %v1232_v7  ;;  %1002 = vmatprep.subr.bf16.mxu0 %v1235_v8  ;;  %v802_v7 = vmax.bf16 %v1299_v3, %v766_v63  ;;  %v1257_v8 = vcombine.high %v797_v60, %v799_v61 }
  0x55   :  { %1045 = vmatprep.subr.bf16.mxu1 %v1237_v11  ;;  %v1254_v11 = vcombine.low %v796_v57, %v798_v58 }
  0x56   :  { %v1259_v13 = vcombine.high %v800_v6, %v802_v7  ;;  %v1258_v15 = vcombine.low %v800_v6, %v802_v7 }
  0x57   :  { %1003 = vmatpush1.bf16.msra.mxu0 %v1234_v18 }
  0x58   :  { %1046 = vmatpush1.bf16.msra.mxu1 %v1236_v19  ;;  %1004 = vmatprep.subr.bf16.mxu0 %v1239_v20 }
  0x59   :  { %1047 = vmatprep.subr.bf16.mxu1 %v1241_v23 }
  0x5b   :  { %1005 = vmatpush1.bf16.msra.mxu0 %v1238_v30 }
  0x5c   :  { %1048 = vmatpush1.bf16.msra.mxu1 %v1240_v31  ;;  %1006 = vmatprep.subr.bf16.mxu0 %v1243_v32 }
  0x5d   :  { %1049 = vmatprep.subr.bf16.mxu1 %v1245_v35 }
  0x5f   :  { %1007 = vmatpush1.bf16.msra.mxu0 %v1242_v42 }
  0x60   :  { %1050 = vmatpush1.bf16.msra.mxu1 %v1244_v43  ;;  %1008 = vmatprep.subr.bf16.mxu0 %v1247_v44 }
  0x61   :  { %1051 = vmatprep.subr.bf16.mxu1 %v1249_v47 }
  0x63   :  { %1009 = vmatpush1.bf16.msra.mxu0 %v1246_v54 }
  0x64   :  { %1052 = vmatpush1.bf16.msra.mxu1 %v1248_v55  ;;  %1010 = vmatprep.subr.bf16.mxu0 %v1251_v56 }
  0x65   :  { %1053 = vmatprep.subr.bf16.mxu1 %v1253_v59 }
  0x67   :  { %1011 = vmatpush1.bf16.msra.mxu0 %v1250_v2 }
  0x68   :  { %1054 = vmatpush1.bf16.msra.mxu1 %v1252_v4  ;;  %1012 = vmatprep.subr.bf16.mxu0 %v1255_v5 }
  0x69   :  { %1055 = vmatprep.subr.bf16.mxu1 %v1257_v8 }
  0x6b   :  { %1013 = vmatpush1.bf16.msra.mxu0 %v1254_v11 }
  0x6c   :  { %1056 = vmatpush1.bf16.msra.mxu1 %v1256_v12  ;;  %1014 = vmatprep.subr.bf16.mxu0 %v1259_v13 }
  0x6d   :  { %1057 = vmatprep.subr.bf16.mxu1 %v1261_v14 }
  0x6f   :  { %1015 = vmatpush1.bf16.msra.mxu0 %v1258_v15 }
  0x70   :  { %1058 = vmatpush1.bf16.msra.mxu1 %v1260_v16 }
  0x72   :  { %1031 = vmatmul.mubr.bf16.vlgmr.msra.gmra.mrb[0].mxu0 %v1298_v17 }
  0x73   :  { %1074 = vmatmul.mubr.bf16.vlgmr.msra.gmra.mrb[0].mxu1 %v1298_v17 }
  0xa0   :  { %v1097_v3 = vpop.permute.xlu0 %1096 }
  0xa4   :  { %v1102_v18 = vpop.permute.xlu0 %1101 }
 0x145   :  { %v1032_v19 = vpop.f32.mrb[0].mxu0 }
 0x146   :  { %v1104_v20 = vadd.f32 %v1097_v3, %v1032_v19  ;;  %v1075_v21 = vpop.f32.mrb[0].mxu1  ;;  %v1034_v22 = vpop.f32.mrb[1].mxu0 }
 0x147   :  { %v1106_v23 = vadd.f32 %v1097_v3, %v1075_v21  ;;  %v1105_v24 = vadd.f32 %v1097_v3, %v1034_v22  ;;  %v1077_v25 = vpop.f32.mrb[1].mxu1  ;;  %v1036_v26 = vpop.f32.mrb[2].mxu0 }
 0x148   :  { %v1107_v27 = vadd.f32 %v1097_v3, %v1077_v25  ;;  %v1108_v28 = vadd.f32 %v1102_v18, %v1036_v26  ;;  %v1079_v29 = vpop.f32.mrb[2].mxu1  ;;  %v1038_v30 = vpop.f32.mrb[3].mxu0 }
 0x149   :  { %v1268_v31 = vpack.c.bf16 %v1105_v24, %v1104_v20  ;;  %v1110_v32 = vadd.f32 %v1102_v18, %v1079_v29  ;;  %v1109_v33 = vadd.f32 %v1102_v18, %v1038_v30  ;;  %v1081_v34 = vpop.f32.mrb[3].mxu1 }
 0x14a   :  { %v1269_v35 = vpack.c.bf16 %v1107_v27, %v1106_v23  ;;  %v1111_v36 = vadd.f32 %v1102_v18, %v1081_v34 }
 0x14b   :  { %1136 = vst [vmem:[%s1822_s7] sm:$0xff] %v1268_v31  ;;  %v1270_v37 = vpack.c.bf16 %v1109_v33, %v1108_v28 }
 0x14c   :  { %1137 = vst [vmem:[%s1822_s7 + $0x8] sm:$0xff] %v1269_v35  ;;  %v1271_v38 = vpack.c.bf16 %v1111_v36, %v1110_v32 }
 0x14d   :  { %1138 = vst [vmem:[%s1822_s7 + $0x10] sm:$0xff] %v1270_v37 }
 0x14e   :  { %1139 = vst [vmem:[%s1822_s7 + $0x18] sm:$0xff] %v1271_v38 }

// kernel: network_forward.63
= control target key start
LH: loop header
LB: loop body
LE: loop exit
PB: predicated region body
PF: predicated region fallthrough
CT: control target
= control target key end

     0   :  { %v442_v3 = vmov 0   ;;  %vm287_vm0 = vcmask 130048   ;;  %s639_s0 = inlined_call_operand.vmem [shape: bf16[144,512], index: 0, kind: input, shape index: {}]   ;;  %s640_s2 = inlined_call_operand.vmem [shape: f32[3,1], index: 2, kind: input, shape index: {}]   ;;  %s641_s1 = inlined_call_operand.vmem [shape: bf16[3,144], index: 1, kind: input, shape index: {}]   ;;  %s642_s3 = inlined_call_operand.vmem [shape: f32[3,512], index: 3, kind: input, shape index: {}]   ;;  %s643_s4 = inlined_call_operand.vmem [shape: f32[3,512], index: 4, kind: output, shape index: {}]  }
   0x1   :  { %v18_v0 = vld [vmem:[%s639_s0] sm:$0xff]  ;;  %v20_v1 = vld [vmem:[%s639_s0 + $0x10] sm:$0xff]  ;;  %v19_v2 = vld [vmem:[%s639_s0 + $0x8] sm:$0xff]  ;;  %439 = vset.pattern.permute.xlu0 %v442_v3 }
   0x2   :  { %v54_v4 = vmax.bf16 %v442_v3, %v18_v0  ;;  %v56_v5 = vmax.bf16 %v442_v3, %v20_v1  ;;  %v21_v6 = vld [vmem:[%s639_s0 + $0x18] sm:$0xff]  ;;  %v55_v7 = vmax.bf16 %v442_v3, %v19_v2  ;;  %v22_v8 = vld [vmem:[%s639_s0 + $0x20] sm:$0xff]  ;;  %v24_v9 = vld [vmem:[%s639_s0 + $0x30] sm:$0xff] }
   0x3   :  { %v57_v10 = vmax.bf16 %v442_v3, %v21_v6  ;;  %v58_v11 = vmax.bf16 %v442_v3, %v22_v8  ;;  %v60_v12 = vmax.bf16 %v442_v3, %v24_v9  ;;  %v23_v13 = vld [vmem:[%s639_s0 + $0x28] sm:$0xff]  ;;  %v25_v14 = vld [vmem:[%s639_s0 + $0x38] sm:$0xff]  ;;  %v26_v15 = vld [vmem:[%s639_s0 + $0x40] sm:$0xff] }
   0x4   :  { %v401_v16 = vcombine.high %v54_v4, %v56_v5  ;;  %v400_v17 = vcombine.low %v54_v4, %v56_v5  ;;  %v59_v18 = vmax.bf16 %v442_v3, %v23_v13  ;;  %v61_v19 = vmax.bf16 %v442_v3, %v25_v14  ;;  %v28_v20 = vld [vmem:[%s639_s0 + $0x50] sm:$0xff]  ;;  %v27_v21 = vld [vmem:[%s639_s0 + $0x48] sm:$0xff]  ;;  %v29_v22 = vld [vmem:[%s639_s0 + $0x58] sm:$0xff] }
   0x5   :  { %v403_v23 = vcombine.high %v55_v7, %v57_v10  ;;  %v402_v24 = vcombine.low %v55_v7, %v57_v10  ;;  %v405_v25 = vcombine.high %v58_v11, %v60_v12  ;;  %v30_v26 = vld [vmem:[%s639_s0 + $0x60] sm:$0xff]  ;;  %v32_v27 = vld [vmem:[%s639_s0 + $0x70] sm:$0xff]  ;;  %v404_v29 = vcombine.low %v58_v11, %v60_v12  ;;  %v31_v32 = vld [vmem:[%s639_s0 + $0x68] sm:$0xff] }
   0x6   :  { %291 = vmatprep.subr.bf16.mxu0 %v401_v16  ;;  %v407_v28 = vcombine.high %v59_v18, %v61_v19  ;;  %v62_v30 = vmax.bf16 %v442_v3, %v26_v15  ;;  %v64_v31 = vmax.bf16 %v442_v3, %v28_v20  ;;  %v33_v33 = vld [vmem:[%s639_s0 + $0x78] sm:$0xff]  ;;  %v406_v34 = vcombine.low %v59_v18, %v61_v19  ;;  %v34_v43 = vld [vmem:[%s639_s0 + $0x80] sm:$0xff]  ;;  %v36_v44 = vld [vmem:[%s639_s0 + $0x90] sm:$0xff] }
   0x7   :  { %332 = vmatprep.subr.bf16.mxu1 %v403_v23  ;;  %292 = vmatpush1.bf16.msra.mxu0 %v400_v17  ;;  %v63_v35 = vmax.bf16 %v442_v3, %v27_v21  ;;  %v65_v36 = vmax.bf16 %v442_v3, %v29_v22  ;;  %v66_v38 = vmax.bf16 %v442_v3, %v30_v26  ;;  %v35_v45 = vld [vmem:[%s639_s0 + $0x88] sm:$0xff]  ;;  %v37_v46 = vld [vmem:[%s639_s0 + $0x98] sm:$0xff]  ;;  %v38_v55 = vld [vmem:[%s639_s0 + $0xa0] sm:$0xff] }
   0x8   :  { %333 = vmatpush1.bf16.msra.mxu1 %v402_v24  ;;  %293 = vmatprep.subr.bf16.mxu0 %v405_v25  ;;  %v409_v37 = vcombine.high %v62_v30, %v64_v31  ;;  %v68_v39 = vmax.bf16 %v442_v3, %v32_v27  ;;  %v67_v41 = vmax.bf16 %v442_v3, %v31_v32  ;;  %v40_v56 = vld [vmem:[%s639_s0 + $0xb0] sm:$0xff]  ;;  %v91_v57 = vld [vmem:[%s640_s2] sm:$0x7]  ;;  %v39_v58 = vld [vmem:[%s639_s0 + $0xa8] sm:$0xff] }
   0x9   :  { %334 = vmatprep.subr.bf16.mxu1 %v407_v28  ;;  %v411_v40 = vcombine.high %v63_v35, %v65_v36  ;;  %v69_v42 = vmax.bf16 %v442_v3, %v33_v33  ;;  %v408_v47 = vcombine.low %v62_v30, %v64_v31  ;;  %v410_v48 = vcombine.low %v63_v35, %v65_v36  ;;  %v41_v59 = vld [vmem:[%s639_s0 + $0xb8] sm:$0xff]  ;;  %v42_v5 = vld [vmem:[%s639_s0 + $0xc0] sm:$0xff]  ;;  %v44_v6 = vld [vmem:[%s639_s0 + $0xd0] sm:$0xff] }
   0xa   :  { %v413_v49 = vcombine.high %v66_v38, %v68_v39  ;;  %v70_v50 = vmax.bf16 %v442_v3, %v34_v43  ;;  %v72_v51 = vmax.bf16 %v442_v3, %v36_v44  ;;  %v71_v53 = vmax.bf16 %v442_v3, %v35_v45  ;;  %94 = vperm.xlu0 %439, %v91_v57   ;;  %v43_v7 = vld [vmem:[%s639_s0 + $0xc8] sm:$0xff]  ;;  %v45_v8 = vld [vmem:[%s639_s0 + $0xd8] sm:$0xff]  ;;  %v583_v9 = vld.sshfl [vmem:[%s641_s1] sm:$0x33 pattern:$0x76325410] }
   0xb   :  { %294 = vmatpush1.bf16.msra.mxu0 %v404_v29  ;;  %v415_v52 = vcombine.high %v67_v41, %v69_v42  ;;  %v73_v54 = vmax.bf16 %v442_v3, %v37_v46  ;;  %v412_v60 = vcombine.low %v66_v38, %v68_v39  ;;  %v414_v61 = vcombine.low %v67_v41, %v69_v42  ;;  %v46_v15 = vld [vmem:[%s639_s0 + $0xe0] sm:$0xff]  ;;  %v48_v19 = vld [vmem:[%s639_s0 + $0xf0] sm:$0xff]  ;;  %v47_v21 = vld [vmem:[%s639_s0 + $0xe8] sm:$0xff] }
   0xc   :  { %335 = vmatpush1.bf16.msra.mxu1 %v406_v34  ;;  %295 = vmatprep.subr.bf16.mxu0 %v409_v37  ;;  %v417_v62 = vcombine.high %v70_v50, %v72_v51  ;;  %v74_v63 = vmax.bf16 %v442_v3, %v38_v55  ;;  %v76_v0 = vmax.bf16 %v442_v3, %v40_v56  ;;  %v49_v22 = vld [vmem:[%s639_s0 + $0xf8] sm:$0xff]  ;;  %v50_v31 = vld [vmem:[%s639_s0 + $0x100] sm:$0xff]  ;;  %v52_v32 = vld [vmem:[%s639_s0 + $0x110] sm:$0xff] }
   0xd   :  { %336 = vmatprep.subr.bf16.mxu1 %v411_v40  ;;  %v419_v1 = vcombine.high %v71_v53, %v73_v54  ;;  %v75_v2 = vmax.bf16 %v442_v3, %v39_v58  ;;  %v77_v4 = vmax.bf16 %v442_v3, %v41_v59  ;;  %v416_v10 = vcombine.low %v70_v50, %v72_v51  ;;  %v51_v33 = vld [vmem:[%s639_s0 + $0x108] sm:$0xff]  ;;  %v53_v34 = vld [vmem:[%s639_s0 + $0x118] sm:$0xff] }
   0xe   :  { %v418_v11 = vcombine.low %v71_v53, %v73_v54  ;;  %v421_v12 = vcombine.high %v74_v63, %v76_v0  ;;  %v78_v13 = vmax.bf16 %v442_v3, %v42_v5  ;;  %v80_v14 = vmax.bf16 %v442_v3, %v44_v6  ;;  %v374_v50 = vld [vmem:[%s642_s3 + $0x8] sm:$0x77] }
   0xf   :  { %296 = vmatpush1.bf16.msra.mxu0 %v408_v47  ;;  %v423_v16 = vcombine.high %v75_v2, %v77_v4  ;;  %v79_v17 = vmax.bf16 %v442_v3, %v43_v7  ;;  %v81_v18 = vmax.bf16 %v442_v3, %v45_v8  ;;  %v105_v20 = vcombine.high %v583_v9, %v583_v9 }
  0x10   :  { %337 = vmatpush1.bf16.msra.mxu1 %v410_v48  ;;  %297 = vmatprep.subr.bf16.mxu0 %v413_v49  ;;  %v420_v23 = vcombine.low %v74_v63, %v76_v0  ;;  %v82_v24 = vmax.bf16 %v442_v3, %v46_v15  ;;  %v422_v25 = vcombine.low %v75_v2, %v77_v4 }
  0x11   :  { %338 = vmatprep.subr.bf16.mxu1 %v415_v52  ;;  %436 = vmatprep.mubr.msk.bf16.mxu0 %vm287_vm0, %v105_v20  ;;  %v425_v26 = vcombine.high %v78_v13, %v80_v14  ;;  %v84_v27 = vmax.bf16 %v442_v3, %v48_v19  ;;  %v427_v28 = vcombine.high %v79_v17, %v81_v18 }
  0x12   :  { %v83_v29 = vmax.bf16 %v442_v3, %v47_v21  ;;  %v85_v30 = vmax.bf16 %v442_v3, %v49_v22  ;;  %437 = vmatprep.mubr.msk.bf16.mxu1 %vm287_vm0, %v105_v20  ;;  %v424_v35 = vcombine.low %v78_v13, %v80_v14  ;;  %v426_v36 = vcombine.low %v79_v17, %v81_v18 }
  0x13   :  { %298 = vmatpush1.bf16.msra.mxu0 %v412_v60  ;;  %v429_v37 = vcombine.high %v82_v24, %v84_v27  ;;  %v86_v38 = vmax.bf16 %v442_v3, %v50_v31  ;;  %v88_v39 = vmax.bf16 %v442_v3, %v52_v32  ;;  %v87_v41 = vmax.bf16 %v442_v3, %v51_v33 }
  0x14   :  { %339 = vmatpush1.bf16.msra.mxu1 %v414_v61  ;;  %299 = vmatprep.subr.bf16.mxu0 %v417_v62  ;;  %v431_v40 = vcombine.high %v83_v29, %v85_v30  ;;  %v89_v42 = vmax.bf16 %v442_v3, %v53_v34  ;;  %v428_v43 = vcombine.low %v82_v24, %v84_v27  ;;  %v373_v3 = vld [vmem:[%s642_s3] sm:$0x77] }
  0x15   :  { %340 = vmatprep.subr.bf16.mxu1 %v419_v1  ;;  %v430_v44 = vcombine.low %v83_v29, %v85_v30  ;;  %v433_v45 = vcombine.high %v86_v38, %v88_v39  ;;  %v432_v47 = vcombine.low %v86_v38, %v88_v39  ;;  %v377_v52 = vcombine.high %v373_v3, %v373_v3 }
  0x16   :  { %v435_v46 = vcombine.high %v87_v41, %v89_v42  ;;  %v434_v48 = vcombine.low %v87_v41, %v89_v42  ;;  %v378_v56 = vcombine.high %v374_v50, %v374_v50 }
  0x17   :  { %300 = vmatpush1.bf16.msra.mxu0 %v416_v10 }
  0x18   :  { %341 = vmatpush1.bf16.msra.mxu1 %v418_v11  ;;  %301 = vmatprep.subr.bf16.mxu0 %v421_v12 }
  0x19   :  { %342 = vmatprep.subr.bf16.mxu1 %v423_v16 }
  0x1b   :  { %302 = vmatpush1.bf16.msra.mxu0 %v420_v23 }
  0x1c   :  { %343 = vmatpush1.bf16.msra.mxu1 %v422_v25  ;;  %303 = vmatprep.subr.bf16.mxu0 %v425_v26 }
  0x1d   :  { %344 = vmatprep.subr.bf16.mxu1 %v427_v28 }
  0x1f   :  { %304 = vmatpush1.bf16.msra.mxu0 %v424_v35 }
  0x20   :  { %345 = vmatpush1.bf16.msra.mxu1 %v426_v36  ;;  %305 = vmatprep.subr.bf16.mxu0 %v429_v37 }
  0x21   :  { %346 = vmatprep.subr.bf16.mxu1 %v431_v40 }
  0x23   :  { %306 = vmatpush1.bf16.msra.mxu0 %v428_v43 }
  0x24   :  { %347 = vmatpush1.bf16.msra.mxu1 %v430_v44  ;;  %307 = vmatprep.subr.bf16.mxu0 %v433_v45 }
  0x25   :  { %348 = vmatprep.subr.bf16.mxu1 %v435_v46 }
  0x27   :  { %308 = vmatpush1.bf16.msra.mxu0 %v432_v47 }
  0x28   :  { %349 = vmatpush1.bf16.msra.mxu1 %v434_v48 }
  0x2a   :  { %324 = vmatmul.mubr.bf16.vlgmr.msra.gmra.mrb[0].mxu0 %v583_v9 }
  0x2b   :  { %365 = vmatmul.mubr.bf16.vlgmr.msra.gmra.mrb[0].mxu1 %v583_v9 }
  0x89   :  { %v95_v49 = vpop.permute.xlu0 %94 }
  0xfd   :  { %v325_v51 = vpop.f32.mrb[0].mxu0 }
  0xfe   :  { %v326_v53 = vadd.f32 %v325_v51, %v95_v49  ;;  %v366_v54 = vpop.f32.mrb[0].mxu1  ;;  %v327_v55 = vpop.f32.mrb[1].mxu0 }
  0xff   :  { %v367_v57 = vadd.f32 %v366_v54, %v95_v49  ;;  %v328_v58 = vadd.f32 %v327_v55, %v95_v49  ;;  %v368_v59 = vpop.f32.mrb[1].mxu1  ;;  %v329_v60 = vpop.f32.mrb[2].mxu0 }
 0x100   :  { %v381_v61 = vadd.f32 %v373_v3, %v326_v53  ;;  %v369_v62 = vadd.f32 %v368_v59, %v95_v49  ;;  %v370_v63 = vpop.f32.mrb[2].mxu1  ;;  %v330_v0 = vpop.f32.mrb[3].mxu0 }
 0x101   :  { %v383_v1 = vadd.f32 %v374_v50, %v367_v57  ;;  %v382_v2 = vadd.f32 %v377_v52, %v328_v58  ;;  %v371_v4 = vpop.f32.mrb[3].mxu1 }
 0x102   :  { %v384_v5 = vadd.f32 %v378_v56, %v369_v62 }
 0x103   :  { %v389_v6 = vcombine.low %v381_v61, %v382_v2 }
 0x104   :  { %v390_v7 = vcombine.low %v383_v1, %v384_v5 }
 0x105   :  { %393 = vst [vmem:[%s643_s4] sm:$0x77] %v389_v6 }
 0x106   :  { %394 = vst [vmem:[%s643_s4 + $0x8] sm:$0x77] %v390_v7 }

// kernel: network_forward.61
= control target key start
LH: loop header
LB: loop body
LE: loop exit
PB: predicated region body
PF: predicated region fallthrough
CT: control target
= control target key end

     0   :  { %v1716_v3 = vmov 0   ;;  %vm370_vm0 = vcmask 130048   ;;  %s2394_s1 = inlined_call_operand.vmem [shape: bf16[144,512], index: 1, kind: input, shape index: {}]   ;;  %s2395_s5 = inlined_call_operand.vmem [shape: bf16[16,144], index: 5, kind: input, shape index: {}]   ;;  %s2396_s4 = inlined_call_operand.vmem [shape: bf16[16,144], index: 4, kind: input, shape index: {}]   ;;  %s2397_s0 = inlined_call_operand.vmem [shape: bf16[144,512], index: 0, kind: input, shape index: {}]   ;;  %s2398_s6 = inlined_call_operand.vmem [shape: bf16[16,144], index: 6, kind: input, shape index: {}]   ;;  %s2399_s7 = inlined_call_operand.vmem [shape: bf16[16,144], index: 7, kind: input, shape index: {}]   ;;  %s2400_s8 = inlined_call_operand.vmem [shape: f32[16,1], index: 8, kind: input, shape index: {}]   ;;  %s2401_s2 = inlined_call_operand.vmem [shape: bf16[144,512], index: 2, kind: input, shape index: {}]   ;;  %s2402_s3 = inlined_call_operand.vmem [shape: bf16[144,512], index: 3, kind: input, shape index: {}]   ;;  %s2403_s9 = inlined_call_operand.vmem [shape: bf16[16,512], index: 9, kind: output, shape index: {}]  }
   0x1   :  { %v107_v0 = vld [vmem:[%s2394_s1] sm:$0xff]  ;;  %v109_v1 = vld [vmem:[%s2394_s1 + $0x10] sm:$0xff]  ;;  %v108_v2 = vld [vmem:[%s2394_s1 + $0x8] sm:$0xff]  ;;  %1703 = vset.pattern.permute.xlu0 %v1716_v3 }
   0x2   :  { %v143_v4 = vmax.bf16 %v1716_v3, %v107_v0  ;;  %v145_v5 = vmax.bf16 %v1716_v3, %v109_v1  ;;  %v110_v6 = vld [vmem:[%s2394_s1 + $0x18] sm:$0xff]  ;;  %v144_v7 = vmax.bf16 %v1716_v3, %v108_v2  ;;  %v111_v8 = vld [vmem:[%s2394_s1 + $0x20] sm:$0xff]  ;;  %v113_v9 = vld [vmem:[%s2394_s1 + $0x30] sm:$0xff] }
   0x3   :  { %v146_v10 = vmax.bf16 %v1716_v3, %v110_v6  ;;  %v147_v11 = vmax.bf16 %v1716_v3, %v111_v8  ;;  %v149_v12 = vmax.bf16 %v1716_v3, %v113_v9  ;;  %v112_v13 = vld [vmem:[%s2394_s1 + $0x28] sm:$0xff]  ;;  %v114_v14 = vld [vmem:[%s2394_s1 + $0x38] sm:$0xff]  ;;  %v115_v15 = vld [vmem:[%s2394_s1 + $0x40] sm:$0xff] }
   0x4   :  { %v1513_v16 = vcombine.high %v143_v4, %v145_v5  ;;  %v1512_v17 = vcombine.low %v143_v4, %v145_v5  ;;  %v148_v18 = vmax.bf16 %v1716_v3, %v112_v13  ;;  %v150_v19 = vmax.bf16 %v1716_v3, %v114_v14  ;;  %v117_v20 = vld [vmem:[%s2394_s1 + $0x50] sm:$0xff]  ;;  %v116_v21 = vld [vmem:[%s2394_s1 + $0x48] sm:$0xff]  ;;  %v118_v22 = vld [vmem:[%s2394_s1 + $0x58] sm:$0xff] }
   0x5   :  { %v1515_v23 = vcombine.high %v144_v7, %v146_v10  ;;  %v1514_v24 = vcombine.low %v144_v7, %v146_v10  ;;  %v1517_v25 = vcombine.high %v147_v11, %v149_v12  ;;  %v119_v26 = vld [vmem:[%s2394_s1 + $0x60] sm:$0xff]  ;;  %v121_v27 = vld [vmem:[%s2394_s1 + $0x70] sm:$0xff]  ;;  %v1516_v29 = vcombine.low %v147_v11, %v149_v12  ;;  %v120_v32 = vld [vmem:[%s2394_s1 + $0x68] sm:$0xff] }
   0x6   :  { %374 = vmatprep.subr.bf16.mxu0 %v1513_v16  ;;  %v1519_v28 = vcombine.high %v148_v18, %v150_v19  ;;  %v151_v30 = vmax.bf16 %v1716_v3, %v115_v15  ;;  %v153_v31 = vmax.bf16 %v1716_v3, %v117_v20  ;;  %v122_v33 = vld [vmem:[%s2394_s1 + $0x78] sm:$0xff]  ;;  %v1518_v34 = vcombine.low %v148_v18, %v150_v19  ;;  %v123_v43 = vld [vmem:[%s2394_s1 + $0x80] sm:$0xff]  ;;  %v125_v44 = vld [vmem:[%s2394_s1 + $0x90] sm:$0xff] }
   0x7   :  { %417 = vmatprep.subr.bf16.mxu1 %v1515_v23  ;;  %375 = vmatpush1.bf16.msra.mxu0 %v1512_v17  ;;  %v152_v35 = vmax.bf16 %v1716_v3, %v116_v21  ;;  %v154_v36 = vmax.bf16 %v1716_v3, %v118_v22  ;;  %v155_v38 = vmax.bf16 %v1716_v3, %v119_v26  ;;  %v124_v45 = vld [vmem:[%s2394_s1 + $0x88] sm:$0xff]  ;;  %v126_v46 = vld [vmem:[%s2394_s1 + $0x98] sm:$0xff]  ;;  %v127_v52 = vld [vmem:[%s2394_s1 + $0xa0] sm:$0xff] }
   0x8   :  { %418 = vmatpush1.bf16.msra.mxu1 %v1514_v24  ;;  %376 = vmatprep.subr.bf16.mxu0 %v1517_v25  ;;  %v1521_v37 = vcombine.high %v151_v30, %v153_v31  ;;  %v157_v39 = vmax.bf16 %v1716_v3, %v121_v27  ;;  %v156_v41 = vmax.bf16 %v1716_v3, %v120_v32  ;;  %v129_v56 = vld [vmem:[%s2394_s1 + $0xb0] sm:$0xff]  ;;  %v128_v57 = vld [vmem:[%s2394_s1 + $0xa8] sm:$0xff]  ;;  %v130_v58 = vld [vmem:[%s2394_s1 + $0xb8] sm:$0xff] }
   0x9   :  { %419 = vmatprep.subr.bf16.mxu1 %v1519_v28  ;;  %v1523_v40 = vcombine.high %v152_v35, %v154_v36  ;;  %v158_v42 = vmax.bf16 %v1716_v3, %v122_v33  ;;  %v1520_v47 = vcombine.low %v151_v30, %v153_v31  ;;  %v1522_v48 = vcombine.low %v152_v35, %v154_v36  ;;  %v1706_v59 = vld [vmem:[%s2395_s5 + $0x4] ss:$8 sps:$4 sm:$0xff]   ;;  %v133_v6 = vld [vmem:[%s2394_s1 + $0xd0] sm:$0xff]  ;;  %v134_v8 = vld [vmem:[%s2394_s1 + $0xd8] sm:$0xff] }
   0xa   :  { %v1525_v49 = vcombine.high %v155_v38, %v157_v39  ;;  %v159_v50 = vmax.bf16 %v1716_v3, %v123_v43  ;;  %v161_v51 = vmax.bf16 %v1716_v3, %v125_v44  ;;  %v160_v54 = vmax.bf16 %v1716_v3, %v124_v45  ;;  %v131_v5 = vld [vmem:[%s2394_s1 + $0xc0] sm:$0xff]  ;;  %v132_v7 = vld [vmem:[%s2394_s1 + $0xc8] sm:$0xff]  ;;  %1548 = vmatprep.mubr.msk.bf16.mxu0 %vm370_vm0, %v1706_v59  ;;  %v137_v18 = vld [vmem:[%s2394_s1 + $0xf0] sm:$0xff] }
   0xb   :  { %377 = vmatpush1.bf16.msra.mxu0 %v1516_v29  ;;  %v1527_v53 = vcombine.high %v156_v41, %v158_v42  ;;  %v162_v55 = vmax.bf16 %v1716_v3, %v126_v46  ;;  %v1524_v60 = vcombine.low %v155_v38, %v157_v39  ;;  %v1526_v61 = vcombine.low %v156_v41, %v158_v42  ;;  %v135_v14 = vld [vmem:[%s2394_s1 + $0xe0] sm:$0xff]  ;;  %v136_v19 = vld [vmem:[%s2394_s1 + $0xe8] sm:$0xff]  ;;  %v138_v20 = vld [vmem:[%s2394_s1 + $0xf8] sm:$0xff] }
   0xc   :  { %420 = vmatpush1.bf16.msra.mxu1 %v1518_v34  ;;  %378 = vmatprep.subr.bf16.mxu0 %v1521_v37  ;;  %v1529_v62 = vcombine.high %v159_v50, %v161_v51  ;;  %v163_v63 = vmax.bf16 %v1716_v3, %v127_v52  ;;  %v165_v0 = vmax.bf16 %v1716_v3, %v129_v56  ;;  %v139_v29 = vld [vmem:[%s2394_s1 + $0x100] sm:$0xff]  ;;  %v141_v30 = vld [vmem:[%s2394_s1 + $0x110] sm:$0xff]  ;;  %v140_v31 = vld [vmem:[%s2394_s1 + $0x108] sm:$0xff] }
   0xd   :  { %421 = vmatprep.subr.bf16.mxu1 %v1523_v40  ;;  %v1531_v1 = vcombine.high %v160_v54, %v162_v55  ;;  %v164_v2 = vmax.bf16 %v1716_v3, %v128_v57  ;;  %v166_v4 = vmax.bf16 %v1716_v3, %v130_v58  ;;  %v1528_v9 = vcombine.low %v159_v50, %v161_v51  ;;  %v142_v32 = vld [vmem:[%s2394_s1 + $0x118] sm:$0xff]  ;;  %v33_v41 = vld [vmem:[%s2397_s0] sm:$0xff]  ;;  %v35_v42 = vld [vmem:[%s2397_s0 + $0x10] sm:$0xff] }
   0xe   :  { %v1530_v10 = vcombine.low %v160_v54, %v162_v55  ;;  %v1533_v11 = vcombine.high %v163_v63, %v165_v0  ;;  %v167_v12 = vmax.bf16 %v1716_v3, %v131_v5  ;;  %v169_v13 = vmax.bf16 %v1716_v3, %v133_v6  ;;  %1549 = vmatprep.mubr.msk.bf16.mxu1 %vm370_vm0, %v1706_v59  ;;  %v34_v43 = vld [vmem:[%s2397_s0 + $0x8] sm:$0xff]  ;;  %v36_v44 = vld [vmem:[%s2397_s0 + $0x18] sm:$0xff]  ;;  %v39_v54 = vld [vmem:[%s2397_s0 + $0x30] sm:$0xff] }
   0xf   :  { %379 = vmatpush1.bf16.msra.mxu0 %v1520_v47  ;;  %v1535_v15 = vcombine.high %v164_v2, %v166_v4  ;;  %v168_v16 = vmax.bf16 %v1716_v3, %v132_v7  ;;  %v170_v17 = vmax.bf16 %v1716_v3, %v134_v8  ;;  %v1532_v21 = vcombine.low %v163_v63, %v165_v0  ;;  %v38_v55 = vld [vmem:[%s2397_s0 + $0x28] sm:$0xff]  ;;  %v40_v56 = vld [vmem:[%s2397_s0 + $0x38] sm:$0xff] }
  0x10   :  { %422 = vmatpush1.bf16.msra.mxu1 %v1522_v48  ;;  %380 = vmatprep.subr.bf16.mxu0 %v1525_v49  ;;  %v171_v22 = vmax.bf16 %v1716_v3, %v135_v14  ;;  %v1534_v23 = vcombine.low %v164_v2, %v166_v4  ;;  %v1537_v24 = vcombine.high %v167_v12, %v169_v13  ;;  %v43_v2 = vld [vmem:[%s2397_s0 + $0x50] sm:$0xff]  ;;  %v1704_v4 = vld [vmem:[%s2395_s5] ss:$8 sps:$4 sm:$0xff]   ;;  %v44_v6 = vld [vmem:[%s2397_s0 + $0x58] sm:$0xff] }
  0x11   :  { %423 = vmatprep.subr.bf16.mxu1 %v1527_v53  ;;  %v173_v25 = vmax.bf16 %v1716_v3, %v137_v18  ;;  %v1539_v26 = vcombine.high %v168_v16, %v170_v17  ;;  %v172_v27 = vmax.bf16 %v1716_v3, %v136_v19  ;;  %v174_v28 = vmax.bf16 %v1716_v3, %v138_v20  ;;  %v37_v53 = vld [vmem:[%s2397_s0 + $0x20] sm:$0xff]  ;;  %v42_v5 = vld [vmem:[%s2397_s0 + $0x48] sm:$0xff]  ;;  %v48_v19 = vld [vmem:[%s2397_s0 + $0x78] sm:$0xff] }
  0x12   :  { %v1536_v33 = vcombine.low %v167_v12, %v169_v13  ;;  %v1538_v34 = vcombine.low %v168_v16, %v170_v17  ;;  %v175_v36 = vmax.bf16 %v1716_v3, %v139_v29  ;;  %v177_v37 = vmax.bf16 %v1716_v3, %v141_v30  ;;  %v47_v16 = vld [vmem:[%s2397_s0 + $0x70] sm:$0xff]  ;;  %v1707_v17 = vld [vmem:[%s2396_s4 + $0x4] ss:$8 sps:$4 sm:$0xff]  }
  0x13   :  { %381 = vmatpush1.bf16.msra.mxu0 %v1524_v60  ;;  %v1541_v35 = vcombine.high %v171_v22, %v173_v25  ;;  %v1543_v38 = vcombine.high %v172_v27, %v174_v28  ;;  %v176_v39 = vmax.bf16 %v1716_v3, %v140_v31  ;;  %v178_v40 = vmax.bf16 %v1716_v3, %v142_v32  ;;  %v46_v18 = vld [vmem:[%s2397_s0 + $0x68] sm:$0xff]  ;;  %v51_v29 = vld [vmem:[%s2397_s0 + $0x90] sm:$0xff]  ;;  %v52_v31 = vld [vmem:[%s2397_s0 + $0x98] sm:$0xff] }
  0x14   :  { %424 = vmatpush1.bf16.msra.mxu1 %v1526_v61  ;;  %382 = vmatprep.subr.bf16.mxu0 %v1529_v62  ;;  %v1540_v45 = vcombine.low %v171_v22, %v173_v25  ;;  %v1542_v46 = vcombine.low %v172_v27, %v174_v28  ;;  %v1545_v47 = vcombine.high %v175_v36, %v177_v37  ;;  %v49_v28 = vld [vmem:[%s2397_s0 + $0x80] sm:$0xff]  ;;  %v50_v30 = vld [vmem:[%s2397_s0 + $0x88] sm:$0xff] }
  0x15   :  { %425 = vmatprep.subr.bf16.mxu1 %v1531_v1  ;;  %v69_v48 = vmax.bf16 %v1716_v3, %v33_v41  ;;  %v71_v49 = vmax.bf16 %v1716_v3, %v35_v42  ;;  %v1547_v50 = vcombine.high %v176_v39, %v178_v40  ;;  %v70_v51 = vmax.bf16 %v1716_v3, %v34_v43  ;;  %v41_v1 = vld [vmem:[%s2397_s0 + $0x40] sm:$0xff]  ;;  %v55_v41 = vld [vmem:[%s2397_s0 + $0xb0] sm:$0xff]  ;;  %v54_v42 = vld [vmem:[%s2397_s0 + $0xa8] sm:$0xff] }
  0x16   :  { %v72_v52 = vmax.bf16 %v1716_v3, %v36_v44  ;;  %v1544_v57 = vcombine.low %v175_v36, %v177_v37  ;;  %v1546_v58 = vcombine.low %v176_v39, %v178_v40  ;;  %v73_v60 = vmax.bf16 %v1716_v3, %v37_v53  ;;  %v53_v40 = vld [vmem:[%s2397_s0 + $0xa0] sm:$0xff]  ;;  %v56_v43 = vld [vmem:[%s2397_s0 + $0xb8] sm:$0xff]  ;;  %v59_v53 = vld [vmem:[%s2397_s0 + $0xd0] sm:$0xff] }
  0x17   :  { %383 = vmatpush1.bf16.msra.mxu0 %v1528_v9  ;;  %v1553_v59 = vcombine.high %v69_v48, %v71_v49  ;;  %v75_v61 = vmax.bf16 %v1716_v3, %v39_v54  ;;  %v74_v63 = vmax.bf16 %v1716_v3, %v38_v55  ;;  %v76_v0 = vmax.bf16 %v1716_v3, %v40_v56  ;;  %v58_v54 = vld [vmem:[%s2397_s0 + $0xc8] sm:$0xff]  ;;  %v60_v55 = vld [vmem:[%s2397_s0 + $0xd8] sm:$0xff] }
  0x18   :  { %426 = vmatpush1.bf16.msra.mxu1 %v1530_v10  ;;  %384 = vmatprep.subr.bf16.mxu0 %v1533_v11  ;;  %v1555_v62 = vcombine.high %v70_v51, %v72_v52  ;;  %v1552_v7 = vcombine.low %v69_v48, %v71_v49  ;;  %v1554_v8 = vcombine.low %v70_v51, %v72_v52  ;;  %v57_v49 = vld [vmem:[%s2397_s0 + $0xc0] sm:$0xff] }
  0x19   :  { %427 = vmatprep.subr.bf16.mxu1 %v1535_v15  ;;  %v1557_v9 = vcombine.high %v73_v60, %v75_v61  ;;  %v77_v10 = vmax.bf16 %v1716_v3, %v41_v1  ;;  %v79_v11 = vmax.bf16 %v1716_v3, %v43_v2  ;;  %v1559_v12 = vcombine.high %v74_v63, %v76_v0  ;;  %v45_v15 = vld [vmem:[%s2397_s0 + $0x60] sm:$0xff]  ;;  %v63_v2 = vld [vmem:[%s2397_s0 + $0xf0] sm:$0xff] }
  0x1a   :  { %v78_v13 = vmax.bf16 %v1716_v3, %v42_v5  ;;  %v80_v14 = vmax.bf16 %v1716_v3, %v44_v6  ;;  %v1556_v20 = vcombine.low %v73_v60, %v75_v61  ;;  %v84_v27 = vmax.bf16 %v1716_v3, %v48_v19  ;;  %v61_v1 = vld [vmem:[%s2397_s0 + $0xe0] sm:$0xff]  ;;  %v64_v5 = vld [vmem:[%s2397_s0 + $0xf8] sm:$0xff] }
  0x1b   :  { %385 = vmatpush1.bf16.msra.mxu0 %v1532_v21  ;;  %v1558_v21 = vcombine.low %v74_v63, %v76_v0  ;;  %v1561_v22 = vcombine.high %v77_v10, %v79_v11  ;;  %v1560_v32 = vcombine.low %v77_v10, %v79_v11  ;;  %v87_v36 = vmax.bf16 %v1716_v3, %v51_v29  ;;  %v739_v29 = vld [vmem:[%s2401_s2 + $0x8] sm:$0xff] }
  0x1c   :  { %428 = vmatpush1.bf16.msra.mxu1 %v1534_v23  ;;  %386 = vmatprep.subr.bf16.mxu0 %v1537_v24  ;;  %v81_v23 = vmax.bf16 %v1716_v3, %v45_v15  ;;  %v83_v24 = vmax.bf16 %v1716_v3, %v47_v16  ;;  %v1563_v25 = vcombine.high %v78_v13, %v80_v14  ;;  %v65_v15 = vld [vmem:[%s2397_s0 + $0x100] sm:$0xff]  ;;  %v67_v16 = vld [vmem:[%s2397_s0 + $0x110] sm:$0xff] }
  0x1d   :  { %429 = vmatprep.subr.bf16.mxu1 %v1539_v26  ;;  %v82_v26 = vmax.bf16 %v1716_v3, %v46_v18  ;;  %v88_v39 = vmax.bf16 %v1716_v3, %v52_v31  ;;  %v91_v48 = vmax.bf16 %v1716_v3, %v55_v41  ;;  %v90_v51 = vmax.bf16 %v1716_v3, %v54_v42  ;;  %v68_v18 = vld [vmem:[%s2397_s0 + $0x118] sm:$0xff]  ;;  %v743_v41 = vld [vmem:[%s2401_s2 + $0x28] sm:$0xff] }
  0x1e   :  { %v1564_v44 = vcombine.low %v81_v23, %v83_v24  ;;  %v92_v52 = vmax.bf16 %v1716_v3, %v56_v43  ;;  %v93_v60 = vmax.bf16 %v1716_v3, %v57_v49  ;;  %v95_v61 = vmax.bf16 %v1716_v3, %v59_v53  ;;  %v745_v42 = vld [vmem:[%s2401_s2 + $0x38] sm:$0xff]  ;;  %v1709_v53 = vld [vmem:[%s2396_s4] ss:$8 sps:$4 sm:$0xff]  }
  0x1f   :  { %387 = vmatpush1.bf16.msra.mxu0 %v1536_v33  ;;  %v1562_v33 = vcombine.low %v78_v13, %v80_v14  ;;  %v1567_v37 = vcombine.high %v82_v26, %v84_v27  ;;  %v94_v63 = vmax.bf16 %v1716_v3, %v58_v54  ;;  %v96_v0 = vmax.bf16 %v1716_v3, %v60_v55  ;;  %v747_v54 = vld [vmem:[%s2401_s2 + $0x48] sm:$0xff]  ;;  %v749_v55 = vld [vmem:[%s2401_s2 + $0x58] sm:$0xff] }
  0x20   :  { %430 = vmatpush1.bf16.msra.mxu1 %v1538_v34  ;;  %388 = vmatprep.subr.bf16.mxu0 %v1541_v35  ;;  %v1565_v34 = vcombine.high %v81_v23, %v83_v24  ;;  %v85_v35 = vmax.bf16 %v1716_v3, %v49_v28  ;;  %v97_v10 = vmax.bf16 %v1716_v3, %v61_v1  ;;  %v740_v28 = vld [vmem:[%s2401_s2 + $0x10] sm:$0xff] }
  0x21   :  { %431 = vmatprep.subr.bf16.mxu1 %v1543_v38  ;;  %v86_v38 = vmax.bf16 %v1716_v3, %v50_v30  ;;  %v99_v11 = vmax.bf16 %v1716_v3, %v63_v2  ;;  %v100_v14 = vmax.bf16 %v1716_v3, %v64_v5  ;;  %v1576_v19 = vcombine.low %v93_v60, %v95_v61  ;;  %v741_v30 = vld [vmem:[%s2401_s2 + $0x18] sm:$0xff]  ;;  %v752_v1 = vld [vmem:[%s2401_s2 + $0x70] sm:$0xff]  ;;  %v1710_v2 = vld [vmem:[%s2398_s6 + $0x4] ss:$8 sps:$4 sm:$0xff]  }
  0x22   :  { %v1568_v56 = vcombine.low %v85_v35, %v87_v36  ;;  %v103_v23 = vmax.bf16 %v1716_v3, %v67_v16  ;;  %v779_v49 = vmax.bf16 %v1716_v3, %v743_v41  ;;  %v753_v5 = vld [vmem:[%s2401_s2 + $0x78] sm:$0xff]  ;;  %v755_v16 = vld [vmem:[%s2401_s2 + $0x88] sm:$0xff] }
  0x23   :  { %389 = vmatpush1.bf16.msra.mxu0 %v1540_v45  ;;  %v1566_v45 = vcombine.low %v82_v26, %v84_v27  ;;  %v104_v26 = vmax.bf16 %v1716_v3, %v68_v18  ;;  %v738_v27 = vld [vmem:[%s2401_s2] sm:$0xff]  ;;  %v1580_v31 = vcombine.low %v97_v10, %v99_v11  ;;  %v765_v41 = vld [vmem:[%s2401_s2 + $0xd8] sm:$0xff] }
  0x24   :  { %432 = vmatpush1.bf16.msra.mxu1 %v1542_v46  ;;  %390 = vmatprep.subr.bf16.mxu0 %v1545_v47  ;;  %v1569_v46 = vcombine.high %v85_v35, %v87_v36  ;;  %v89_v47 = vmax.bf16 %v1716_v3, %v53_v40  ;;  %v776_v35 = vmax.bf16 %v1716_v3, %v740_v28  ;;  %v744_v40 = vld [vmem:[%s2401_s2 + $0x30] sm:$0xff]  ;;  %v759_v28 = vld [vmem:[%s2401_s2 + $0xa8] sm:$0xff] }
  0x25   :  { %433 = vmatprep.subr.bf16.mxu1 %v1547_v50  ;;  %v1571_v50 = vcombine.high %v86_v38, %v88_v39 }
  0x26   :  { %v1572_v6 = vcombine.low %v89_v47, %v91_v48 }
  0x27   :  { %391 = vmatpush1.bf16.msra.mxu0 %v1544_v57  ;;  %v1570_v57 = vcombine.low %v86_v38, %v88_v39  ;;  %v777_v38 = vmax.bf16 %v1716_v3, %v741_v30  ;;  %v742_v39 = vld [vmem:[%s2401_s2 + $0x20] sm:$0xff] }
  0x28   :  { %434 = vmatpush1.bf16.msra.mxu1 %v1546_v58  ;;  %652 = vmatprep.subr.bf16.mxu0 %v1553_v59  ;;  %v1458_v58 = vld [vmem:[%s2400_s8] sm:$0xff]  ;;  %v1573_v59 = vcombine.high %v89_v47, %v91_v48  ;;  %v780_v47 = vmax.bf16 %v1716_v3, %v744_v40  ;;  %v763_v40 = vld [vmem:[%s2401_s2 + $0xc8] sm:$0xff] }
  0x29   :  { %695 = vmatprep.subr.bf16.mxu1 %v1555_v62  ;;  %v1575_v62 = vcombine.high %v90_v51, %v92_v52  ;;  %1462 = vperm.xlu0 %1703, %v1458_v58  }
  0x2a   :  { %407 = vmatmul.mubr.bf16.vlgmr.msra.gmra.mrb[0].mxu0 %v1704_v4 }
  0x2b   :  { %450 = vmatmul.mubr.bf16.vlgmr.msra.gmra.mrb[0].mxu1 %v1704_v4  ;;  %653 = vmatpush1.bf16.msra.mxu0 %v1552_v7  ;;  %v62_v4 = vld [vmem:[%s2397_s0 + $0xe8] sm:$0xff]  ;;  %v1574_v7 = vcombine.low %v90_v51, %v92_v52  ;;  %v746_v51 = vld [vmem:[%s2401_s2 + $0x40] sm:$0xff]  ;;  %v748_v52 = vld [vmem:[%s2401_s2 + $0x50] sm:$0xff] }
  0x2c   :  { %696 = vmatpush1.bf16.msra.mxu1 %v1554_v8  ;;  %654 = vmatprep.subr.bf16.mxu0 %v1557_v9  ;;  %v1459_v8 = vld [vmem:[%s2400_s8 + $0x8] sm:$0xff]  ;;  %v1577_v9 = vcombine.high %v93_v60, %v95_v61  ;;  %v98_v13 = vmax.bf16 %v1716_v3, %v62_v4  ;;  %v784_v60 = vmax.bf16 %v1716_v3, %v748_v52 }
  0x2d   :  { %697 = vmatprep.subr.bf16.mxu1 %v1559_v12  ;;  %1588 = vmatprep.mubr.msk.bf16.mxu0 %vm370_vm0, %v1707_v17  ;;  %v1579_v12 = vcombine.high %v94_v63, %v96_v0  ;;  %v751_v4 = vld [vmem:[%s2401_s2 + $0x68] sm:$0xff] }
  0x2e   :  { %1589 = vmatprep.mubr.msk.bf16.mxu1 %vm370_vm0, %v1707_v17  ;;  %v66_v17 = vld [vmem:[%s2397_s0 + $0x108] sm:$0xff]  ;;  %1467 = vperm.xlu0 %1703, %v1459_v8   ;;  %v1583_v24 = vcombine.high %v98_v13, %v100_v14 }
  0x2f   :  { %655 = vmatpush1.bf16.msra.mxu0 %v1556_v20  ;;  %v1578_v20 = vcombine.low %v94_v63, %v96_v0  ;;  %v785_v63 = vmax.bf16 %v1716_v3, %v749_v55  ;;  %v750_v0 = vld [vmem:[%s2401_s2 + $0x60] sm:$0xff]  ;;  %v767_v52 = vld [vmem:[%s2401_s2 + $0xe8] sm:$0xff] }
  0x30   :  { %698 = vmatpush1.bf16.msra.mxu1 %v1558_v21  ;;  %656 = vmatprep.subr.bf16.mxu0 %v1561_v22  ;;  %v1581_v21 = vcombine.high %v97_v10, %v99_v11  ;;  %v101_v22 = vmax.bf16 %v1716_v3, %v65_v15  ;;  %v788_v10 = vmax.bf16 %v1716_v3, %v752_v1  ;;  %v756_v15 = vld [vmem:[%s2401_s2 + $0x90] sm:$0xff]  ;;  %v773_v1 = vld [vmem:[%s2401_s2 + $0x118] sm:$0xff] }
  0x31   :  { %699 = vmatprep.subr.bf16.mxu1 %v1563_v25  ;;  %v102_v25 = vmax.bf16 %v1716_v3, %v66_v17  ;;  %v757_v17 = vld [vmem:[%s2401_s2 + $0x98] sm:$0xff] }
  0x32   :  { %v1584_v43 = vcombine.low %v101_v22, %v103_v23 }
  0x33   :  { %657 = vmatpush1.bf16.msra.mxu0 %v1560_v32  ;;  %v1582_v32 = vcombine.low %v98_v13, %v100_v14  ;;  %v1587_v36 = vcombine.high %v102_v25, %v104_v26  ;;  %v789_v13 = vmax.bf16 %v1716_v3, %v753_v5  ;;  %v754_v14 = vld [vmem:[%s2401_s2 + $0x80] sm:$0xff] }
  0x34   :  { %700 = vmatpush1.bf16.msra.mxu1 %v1562_v33  ;;  %658 = vmatprep.subr.bf16.mxu0 %v1565_v34  ;;  %v1585_v33 = vcombine.high %v101_v22, %v103_v23  ;;  %v774_v34 = vmax.bf16 %v1716_v3, %v738_v27  ;;  %v792_v22 = vmax.bf16 %v1716_v3, %v756_v15  ;;  %v760_v27 = vld [vmem:[%s2401_s2 + $0xb0] sm:$0xff] }
  0x35   :  { %701 = vmatprep.subr.bf16.mxu1 %v1567_v37  ;;  %v775_v37 = vmax.bf16 %v1716_v3, %v739_v29  ;;  %v761_v29 = vld [vmem:[%s2401_s2 + $0xb8] sm:$0xff] }
  0x37   :  { %659 = vmatpush1.bf16.msra.mxu0 %v1564_v44  ;;  %v1586_v44 = vcombine.low %v102_v25, %v104_v26  ;;  %v1595_v48 = vcombine.high %v775_v37, %v777_v38  ;;  %v793_v25 = vmax.bf16 %v1716_v3, %v757_v17  ;;  %v758_v26 = vld [vmem:[%s2401_s2 + $0xa0] sm:$0xff] }
  0x38   :  { %702 = vmatpush1.bf16.msra.mxu1 %v1566_v45  ;;  %660 = vmatprep.subr.bf16.mxu0 %v1569_v46  ;;  %v1593_v45 = vcombine.high %v774_v34, %v776_v35  ;;  %v778_v46 = vmax.bf16 %v1716_v3, %v742_v39  ;;  %v764_v39 = vld [vmem:[%s2401_s2 + $0xd0] sm:$0xff] }
  0x39   :  { %703 = vmatprep.subr.bf16.mxu1 %v1571_v50  ;;  %v781_v50 = vmax.bf16 %v1716_v3, %v745_v42 }
  0x3a   :  { %v1597_v58 = vcombine.high %v778_v46, %v780_v47 }
  0x3b   :  { %661 = vmatpush1.bf16.msra.mxu0 %v1568_v56  ;;  %v1592_v56 = vcombine.low %v774_v34, %v776_v35  ;;  %v1599_v61 = vcombine.high %v779_v49, %v781_v50  ;;  %v796_v34 = vmax.bf16 %v1716_v3, %v760_v27 }
  0x3c   :  { %704 = vmatpush1.bf16.msra.mxu1 %v1570_v57  ;;  %662 = vmatprep.subr.bf16.mxu0 %v1573_v59  ;;  %v1594_v57 = vcombine.low %v775_v37, %v777_v38  ;;  %v782_v59 = vmax.bf16 %v1716_v3, %v746_v51  ;;  %v797_v37 = vmax.bf16 %v1716_v3, %v761_v29  ;;  %v762_v38 = vld [vmem:[%s2401_s2 + $0xc0] sm:$0xff]  ;;  %v768_v51 = vld [vmem:[%s2401_s2 + $0xf0] sm:$0xff] }
  0x3d   :  { %705 = vmatprep.subr.bf16.mxu1 %v1575_v62  ;;  %v783_v62 = vmax.bf16 %v1716_v3, %v747_v54 }
  0x3e   :  { %v1601_v8 = vcombine.high %v782_v59, %v784_v60  ;;  %v1600_v18 = vcombine.low %v782_v59, %v784_v60  ;;  %v803_v60 = vmax.bf16 %v1716_v3, %v767_v52  ;;  %v1113_v52 = vld [vmem:[%s2402_s3 + $0x78] sm:$0xff] }
  0x3f   :  { %663 = vmatpush1.bf16.msra.mxu0 %v1572_v6  ;;  %v1596_v6 = vcombine.low %v778_v46, %v780_v47  ;;  %v1603_v11 = vcombine.high %v783_v62, %v785_v63  ;;  %v800_v46 = vmax.bf16 %v1716_v3, %v764_v39  ;;  %v1109_v39 = vld [vmem:[%s2402_s3 + $0x58] sm:$0xff] }
  0x40   :  { %706 = vmatpush1.bf16.msra.mxu1 %v1574_v7  ;;  %664 = vmatprep.subr.bf16.mxu0 %v1577_v9  ;;  %v1598_v7 = vcombine.low %v779_v49, %v781_v50  ;;  %v786_v9 = vmax.bf16 %v1716_v3, %v750_v0  ;;  %v801_v49 = vmax.bf16 %v1716_v3, %v765_v41  ;;  %v766_v50 = vld [vmem:[%s2401_s2 + $0xe0] sm:$0xff]  ;;  %v771_v0 = vld [vmem:[%s2401_s2 + $0x108] sm:$0xff] }
  0x41   :  { %707 = vmatprep.subr.bf16.mxu1 %v1579_v12  ;;  %v787_v12 = vmax.bf16 %v1716_v3, %v751_v4 }
  0x42   :  { %v1604_v30 = vcombine.low %v786_v9, %v788_v10 }
  0x43   :  { %665 = vmatpush1.bf16.msra.mxu0 %v1576_v19  ;;  %v1602_v19 = vcombine.low %v783_v62, %v785_v63  ;;  %v1607_v23 = vcombine.high %v787_v12, %v789_v13  ;;  %v770_v62 = vld [vmem:[%s2401_s2 + $0x100] sm:$0xff]  ;;  %v772_v63 = vld [vmem:[%s2401_s2 + $0x110] sm:$0xff] }
  0x44   :  { %708 = vmatpush1.bf16.msra.mxu1 %v1578_v20  ;;  %666 = vmatprep.subr.bf16.mxu0 %v1581_v21  ;;  %v1605_v20 = vcombine.high %v786_v9, %v788_v10  ;;  %v790_v21 = vmax.bf16 %v1716_v3, %v754_v14  ;;  %v807_v9 = vmax.bf16 %v1716_v3, %v771_v0  ;;  %v1101_v14 = vld [vmem:[%s2402_s3 + $0x18] sm:$0xff] }
  0x45   :  { %709 = vmatprep.subr.bf16.mxu1 %v1583_v24  ;;  %v791_v24 = vmax.bf16 %v1716_v3, %v755_v16  ;;  %v809_v10 = vmax.bf16 %v1716_v3, %v773_v1  ;;  %v1117_v0 = vld [vmem:[%s2402_s3 + $0x98] sm:$0xff] }
  0x46   :  { %v1608_v42 = vcombine.low %v790_v21, %v792_v22 }
  0x47   :  { %667 = vmatpush1.bf16.msra.mxu0 %v1580_v31  ;;  %v1606_v31 = vcombine.low %v787_v12, %v789_v13  ;;  %v1611_v35 = vcombine.high %v791_v24, %v793_v25  ;;  %v1100_v12 = vld [vmem:[%s2402_s3 + $0x10] sm:$0xff]  ;;  %v1099_v13 = vld [vmem:[%s2402_s3 + $0x8] sm:$0xff] }
  0x48   :  { %710 = vmatpush1.bf16.msra.mxu1 %v1582_v32  ;;  %668 = vmatprep.subr.bf16.mxu0 %v1585_v33  ;;  %v1609_v32 = vcombine.high %v790_v21, %v792_v22  ;;  %v794_v33 = vmax.bf16 %v1716_v3, %v758_v26  ;;  %v1135_v21 = vmax.bf16 %v1716_v3, %v1099_v13  ;;  %v1105_v26 = vld [vmem:[%s2402_s3 + $0x38] sm:$0xff] }
  0x49   :  { %711 = vmatprep.subr.bf16.mxu1 %v1587_v36  ;;  %v795_v36 = vmax.bf16 %v1716_v3, %v759_v28  ;;  %v1137_v22 = vmax.bf16 %v1716_v3, %v1101_v14  ;;  %v1626_v28 = vcombine.low %v807_v9, %v809_v10  ;;  %v1121_v13 = vld [vmem:[%s2402_s3 + $0xb8] sm:$0xff] }
  0x4a   :  { %v1612_v54 = vcombine.low %v794_v33, %v796_v34 }
  0x4b   :  { %669 = vmatpush1.bf16.msra.mxu0 %v1584_v43  ;;  %v1610_v43 = vcombine.low %v791_v24, %v793_v25  ;;  %v1615_v47 = vcombine.high %v795_v36, %v797_v37  ;;  %v1614_v55 = vcombine.low %v795_v36, %v797_v37  ;;  %v1104_v24 = vld [vmem:[%s2402_s3 + $0x30] sm:$0xff]  ;;  %v1103_v25 = vld [vmem:[%s2402_s3 + $0x28] sm:$0xff]  ;;  %v1634_v41 = vcombine.low %v1135_v21, %v1137_v22 }
  0x4c   :  { %712 = vmatpush1.bf16.msra.mxu1 %v1586_v44  ;;  %1004 = vmatprep.subr.bf16.mxu0 %v1593_v45  ;;  %v1613_v44 = vcombine.high %v794_v33, %v796_v34  ;;  %v798_v45 = vmax.bf16 %v1716_v3, %v762_v38  ;;  %v1139_v33 = vmax.bf16 %v1716_v3, %v1103_v25  ;;  %v1108_v36 = vld [vmem:[%s2402_s3 + $0x50] sm:$0xff]  ;;  %v1712_v37 = vld [vmem:[%s2398_s6] ss:$8 sps:$4 sm:$0xff]   ;;  %v1125_v25 = vld [vmem:[%s2402_s3 + $0xd8] sm:$0xff] }
  0x4d   :  { %1047 = vmatprep.subr.bf16.mxu1 %v1595_v48  ;;  %v799_v48 = vmax.bf16 %v1716_v3, %v763_v40  ;;  %v1141_v34 = vmax.bf16 %v1716_v3, %v1105_v26  ;;  %v1107_v38 = vld [vmem:[%s2402_s3 + $0x48] sm:$0xff] }
  0x4e   :  { %685 = vmatmul.mubr.bf16.vlgmr.msra.gmra.mrb[0].mxu0 %v1709_v53 }
  0x4f   :  { %728 = vmatmul.mubr.bf16.vlgmr.msra.gmra.mrb[0].mxu1 %v1709_v53  ;;  %1005 = vmatpush1.bf16.msra.mxu0 %v1592_v56  ;;  %v769_v53 = vld [vmem:[%s2401_s2 + $0xf8] sm:$0xff]  ;;  %v1617_v56 = vcombine.high %v798_v45, %v800_v46  ;;  %v1619_v59 = vcombine.high %v799_v48, %v801_v49  ;;  %v1618_v4 = vcombine.low %v799_v48, %v801_v49  ;;  %v1110_v48 = vld [vmem:[%s2402_s3 + $0x60] sm:$0xff]  ;;  %v1112_v49 = vld [vmem:[%s2402_s3 + $0x70] sm:$0xff] }
  0x50   :  { %1048 = vmatpush1.bf16.msra.mxu1 %v1594_v57  ;;  %1006 = vmatprep.subr.bf16.mxu0 %v1597_v58  ;;  %v802_v57 = vmax.bf16 %v1716_v3, %v766_v50  ;;  %v804_v58 = vmax.bf16 %v1716_v3, %v768_v51  ;;  %v1713_v50 = vld [vmem:[%s2399_s7 + $0x4] ss:$8 sps:$4 sm:$0xff]  }
  0x51   :  { %1049 = vmatprep.subr.bf16.mxu1 %v1599_v61  ;;  %1628 = vmatprep.mubr.msk.bf16.mxu0 %vm370_vm0, %v1710_v2  ;;  %v805_v61 = vmax.bf16 %v1716_v3, %v769_v53  ;;  %v1111_v51 = vld [vmem:[%s2402_s3 + $0x68] sm:$0xff] }
  0x52   :  { %1629 = vmatprep.mubr.msk.bf16.mxu1 %vm370_vm0, %v1710_v2  ;;  %v1616_v2 = vcombine.low %v798_v45, %v800_v46  ;;  %v1621_v5 = vcombine.high %v802_v57, %v804_v58  ;;  %v1620_v15 = vcombine.low %v802_v57, %v804_v58  ;;  %v1639_v45 = vcombine.high %v1139_v33, %v1141_v34  ;;  %v1114_v58 = vld [vmem:[%s2402_s3 + $0x80] sm:$0xff] }
  0x53   :  { %1007 = vmatpush1.bf16.msra.mxu0 %v1596_v6  ;;  %v806_v6 = vmax.bf16 %v1716_v3, %v770_v62  ;;  %v1622_v16 = vcombine.low %v803_v60, %v805_v61  ;;  %v1143_v46 = vmax.bf16 %v1716_v3, %v1107_v38  ;;  %v1148_v57 = vmax.bf16 %v1716_v3, %v1112_v49  ;;  %v1116_v62 = vld [vmem:[%s2402_s3 + $0x90] sm:$0xff]  ;;  %v1133_v49 = vld [vmem:[%s2402_s3 + $0x118] sm:$0xff] }
  0x54   :  { %1050 = vmatpush1.bf16.msra.mxu1 %v1598_v7  ;;  %1008 = vmatprep.subr.bf16.mxu0 %v1601_v8  ;;  %v808_v7 = vmax.bf16 %v1716_v3, %v772_v63  ;;  %v1623_v8 = vcombine.high %v803_v60, %v805_v61  ;;  %v1147_v60 = vmax.bf16 %v1716_v3, %v1111_v51  ;;  %v1115_v63 = vld [vmem:[%s2402_s3 + $0x88] sm:$0xff] }
  0x55   :  { %1051 = vmatprep.subr.bf16.mxu1 %v1603_v11  ;;  %v1098_v11 = vld [vmem:[%s2402_s3] sm:$0xff]  ;;  %v1149_v61 = vmax.bf16 %v1716_v3, %v1113_v52 }
  0x56   :  { %v1625_v17 = vcombine.high %v806_v6, %v808_v7  ;;  %v1624_v27 = vcombine.low %v806_v6, %v808_v7  ;;  %v1152_v6 = vmax.bf16 %v1716_v3, %v1116_v62 }
  0x57   :  { %1009 = vmatpush1.bf16.msra.mxu0 %v1600_v18  ;;  %v1134_v18 = vmax.bf16 %v1716_v3, %v1098_v11  ;;  %v1647_v7 = vcombine.high %v1147_v60, %v1149_v61  ;;  %v1120_v11 = vld [vmem:[%s2402_s3 + $0xb0] sm:$0xff] }
  0x58   :  { %1052 = vmatpush1.bf16.msra.mxu1 %v1602_v19  ;;  %1010 = vmatprep.subr.bf16.mxu0 %v1605_v20  ;;  %v1136_v19 = vmax.bf16 %v1716_v3, %v1100_v12  ;;  %v1627_v20 = vcombine.high %v807_v9, %v809_v10  ;;  %v1153_v9 = vmax.bf16 %v1716_v3, %v1117_v0  ;;  %v1118_v10 = vld [vmem:[%s2402_s3 + $0xa0] sm:$0xff]  ;;  %v1119_v12 = vld [vmem:[%s2402_s3 + $0xa8] sm:$0xff] }
  0x59   :  { %1053 = vmatprep.subr.bf16.mxu1 %v1607_v23  ;;  %v1102_v23 = vld [vmem:[%s2402_s3 + $0x20] sm:$0xff] }
  0x5a   :  { %v1633_v29 = vcombine.high %v1134_v18, %v1136_v19  ;;  %v1632_v40 = vcombine.low %v1134_v18, %v1136_v19  ;;  %v1156_v18 = vmax.bf16 %v1716_v3, %v1120_v11  ;;  %v1715_v0 = vld [vmem:[%s2399_s7] ss:$8 sps:$4 sm:$0xff]  }
  0x5b   :  { %1011 = vmatpush1.bf16.msra.mxu0 %v1604_v30  ;;  %v1138_v30 = vmax.bf16 %v1716_v3, %v1102_v23  ;;  %v1124_v23 = vld [vmem:[%s2402_s3 + $0xd0] sm:$0xff] }
  0x5c   :  { %1054 = vmatpush1.bf16.msra.mxu1 %v1606_v31  ;;  %1012 = vmatprep.subr.bf16.mxu0 %v1609_v32  ;;  %v1140_v31 = vmax.bf16 %v1716_v3, %v1104_v24  ;;  %v1635_v32 = vcombine.high %v1135_v21, %v1137_v22  ;;  %v1157_v21 = vmax.bf16 %v1716_v3, %v1121_v13  ;;  %v1122_v22 = vld [vmem:[%s2402_s3 + $0xc0] sm:$0xff]  ;;  %v1123_v24 = vld [vmem:[%s2402_s3 + $0xc8] sm:$0xff] }
  0x5d   :  { %1055 = vmatprep.subr.bf16.mxu1 %v1611_v35  ;;  %v1106_v35 = vld [vmem:[%s2402_s3 + $0x40] sm:$0xff] }
  0x5e   :  { %v1636_v53 = vcombine.low %v1138_v30, %v1140_v31 }
  0x5f   :  { %1013 = vmatpush1.bf16.msra.mxu0 %v1608_v42  ;;  %v1637_v42 = vcombine.high %v1138_v30, %v1140_v31  ;;  %v1160_v30 = vmax.bf16 %v1716_v3, %v1124_v23 }
  0x60   :  { %1056 = vmatpush1.bf16.msra.mxu1 %v1610_v43  ;;  %1014 = vmatprep.subr.bf16.mxu0 %v1613_v44  ;;  %v1142_v43 = vmax.bf16 %v1716_v3, %v1106_v35  ;;  %v1144_v44 = vmax.bf16 %v1716_v3, %v1108_v36  ;;  %v1128_v35 = vld [vmem:[%s2402_s3 + $0xf0] sm:$0xff]  ;;  %v1127_v36 = vld [vmem:[%s2402_s3 + $0xe8] sm:$0xff] }
  0x61   :  { %1057 = vmatprep.subr.bf16.mxu1 %v1615_v47  ;;  %v1145_v47 = vmax.bf16 %v1716_v3, %v1109_v39 }
  0x62   :  { %v1640_v1 = vcombine.low %v1142_v43, %v1144_v44 }
  0x63   :  { %1015 = vmatpush1.bf16.msra.mxu0 %v1612_v54  ;;  %v1638_v54 = vcombine.low %v1139_v33, %v1141_v34  ;;  %v1161_v33 = vmax.bf16 %v1716_v3, %v1125_v25  ;;  %v1126_v34 = vld [vmem:[%s2402_s3 + $0xe0] sm:$0xff] }
  0x64   :  { %1058 = vmatpush1.bf16.msra.mxu1 %v1614_v55  ;;  %1016 = vmatprep.subr.bf16.mxu0 %v1617_v56  ;;  %v1641_v55 = vcombine.high %v1142_v43, %v1144_v44  ;;  %v1146_v56 = vmax.bf16 %v1716_v3, %v1110_v48  ;;  %v1130_v43 = vld [vmem:[%s2402_s3 + $0x100] sm:$0xff]  ;;  %v1131_v48 = vld [vmem:[%s2402_s3 + $0x108] sm:$0xff] }
  0x65   :  { %1059 = vmatprep.subr.bf16.mxu1 %v1619_v59  ;;  %v1643_v59 = vcombine.high %v1143_v46, %v1145_v47  ;;  %v1166_v51 = vmax.bf16 %v1716_v3, %v1130_v43 }
  0x66   :  { %v1644_v14 = vcombine.low %v1146_v56, %v1148_v57 }
  0x67   :  { %1017 = vmatpush1.bf16.msra.mxu0 %v1616_v2  ;;  %v1150_v2 = vmax.bf16 %v1716_v3, %v1114_v58 }
  0x68   :  { %1060 = vmatpush1.bf16.msra.mxu1 %v1618_v4  ;;  %1018 = vmatprep.subr.bf16.mxu0 %v1621_v5  ;;  %v1642_v4 = vcombine.low %v1143_v46, %v1145_v47  ;;  %v1645_v5 = vcombine.high %v1146_v56, %v1148_v57  ;;  %v1132_v47 = vld [vmem:[%s2402_s3 + $0x110] sm:$0xff]  ;;  %v1167_v56 = vmax.bf16 %v1716_v3, %v1131_v48 }
  0x69   :  { %1061 = vmatprep.subr.bf16.mxu1 %v1623_v8  ;;  %v1151_v8 = vmax.bf16 %v1716_v3, %v1115_v63  ;;  %v1648_v26 = vcombine.low %v1150_v2, %v1152_v6  ;;  %v1169_v57 = vmax.bf16 %v1716_v3, %v1133_v49 }
  0x6b   :  { %1019 = vmatpush1.bf16.msra.mxu0 %v1620_v15  ;;  %v1646_v15 = vcombine.low %v1147_v60, %v1149_v61  ;;  %v1651_v19 = vcombine.high %v1151_v8, %v1153_v9  ;;  %v1667_v61 = vcombine.high %v1167_v56, %v1169_v57  ;;  %v1666_v63 = vcombine.low %v1167_v56, %v1169_v57 }
  0x6c   :  { %1062 = vmatpush1.bf16.msra.mxu1 %v1622_v16  ;;  %1020 = vmatprep.subr.bf16.mxu0 %v1625_v17  ;;  %v1649_v16 = vcombine.high %v1150_v2, %v1152_v6  ;;  %v1154_v17 = vmax.bf16 %v1716_v3, %v1118_v10 }
  0x6d   :  { %1063 = vmatprep.subr.bf16.mxu1 %v1627_v20  ;;  %v1155_v20 = vmax.bf16 %v1716_v3, %v1119_v12 }
  0x6e   :  { %v1652_v38 = vcombine.low %v1154_v17, %v1156_v18 }
  0x6f   :  { %1021 = vmatpush1.bf16.msra.mxu0 %v1624_v27  ;;  %v1650_v27 = vcombine.low %v1151_v8, %v1153_v9  ;;  %v1655_v31 = vcombine.high %v1155_v20, %v1157_v21  ;;  %v1654_v39 = vcombine.low %v1155_v20, %v1157_v21 }
  0x70   :  { %1064 = vmatpush1.bf16.msra.mxu1 %v1626_v28  ;;  %1364 = vmatprep.subr.bf16.mxu0 %v1633_v29  ;;  %v1653_v28 = vcombine.high %v1154_v17, %v1156_v18  ;;  %v1158_v29 = vmax.bf16 %v1716_v3, %v1122_v22 }
  0x71   :  { %1407 = vmatprep.subr.bf16.mxu1 %v1635_v32  ;;  %v1159_v32 = vmax.bf16 %v1716_v3, %v1123_v24 }
  0x72   :  { %1037 = vmatmul.mubr.bf16.vlgmr.msra.gmra.mrb[0].mxu0 %v1712_v37 }
  0x73   :  { %1080 = vmatmul.mubr.bf16.vlgmr.msra.gmra.mrb[0].mxu1 %v1712_v37  ;;  %1365 = vmatpush1.bf16.msra.mxu0 %v1632_v40  ;;  %v1129_v37 = vld [vmem:[%s2402_s3 + $0xf8] sm:$0xff]  ;;  %v1657_v40 = vcombine.high %v1158_v29, %v1160_v30  ;;  %v1659_v44 = vcombine.high %v1159_v32, %v1161_v33  ;;  %v1658_v52 = vcombine.low %v1159_v32, %v1161_v33 }
  0x74   :  { %1408 = vmatpush1.bf16.msra.mxu1 %v1634_v41  ;;  %1366 = vmatprep.subr.bf16.mxu0 %v1637_v42  ;;  %v1162_v41 = vmax.bf16 %v1716_v3, %v1126_v34  ;;  %v1164_v42 = vmax.bf16 %v1716_v3, %v1128_v35  ;;  %v1165_v46 = vmax.bf16 %v1716_v3, %v1129_v37 }
  0x75   :  { %1409 = vmatprep.subr.bf16.mxu1 %v1639_v45  ;;  %1668 = vmatprep.mubr.msk.bf16.mxu0 %vm370_vm0, %v1713_v50  ;;  %v1163_v45 = vmax.bf16 %v1716_v3, %v1127_v36 }
  0x76   :  { %1669 = vmatprep.mubr.msk.bf16.mxu1 %vm370_vm0, %v1713_v50  ;;  %v1656_v50 = vcombine.low %v1158_v29, %v1160_v30  ;;  %v1660_v58 = vcombine.low %v1162_v41, %v1164_v42 }
  0x77   :  { %1367 = vmatpush1.bf16.msra.mxu0 %v1636_v53  ;;  %v1661_v53 = vcombine.high %v1162_v41, %v1164_v42 }
  0x78   :  { %1410 = vmatpush1.bf16.msra.mxu1 %v1638_v54  ;;  %1368 = vmatprep.subr.bf16.mxu0 %v1641_v55  ;;  %v1168_v54 = vmax.bf16 %v1716_v3, %v1132_v47  ;;  %v1663_v55 = vcombine.high %v1163_v45, %v1165_v46 }
  0x79   :  { %1411 = vmatprep.subr.bf16.mxu1 %v1643_v59  ;;  %v1662_v59 = vcombine.low %v1163_v45, %v1165_v46 }
  0x7a   :  { %v1665_v60 = vcombine.high %v1166_v51, %v1168_v54  ;;  %v1664_v62 = vcombine.low %v1166_v51, %v1168_v54 }
  0x7b   :  { %1369 = vmatpush1.bf16.msra.mxu0 %v1640_v1 }
  0x7c   :  { %1412 = vmatpush1.bf16.msra.mxu1 %v1642_v4  ;;  %1370 = vmatprep.subr.bf16.mxu0 %v1645_v5 }
  0x7d   :  { %1413 = vmatprep.subr.bf16.mxu1 %v1647_v7 }
  0x7f   :  { %1371 = vmatpush1.bf16.msra.mxu0 %v1644_v14 }
  0x80   :  { %1414 = vmatpush1.bf16.msra.mxu1 %v1646_v15  ;;  %1372 = vmatprep.subr.bf16.mxu0 %v1649_v16 }
  0x81   :  { %1415 = vmatprep.subr.bf16.mxu1 %v1651_v19 }
  0x83   :  { %1373 = vmatpush1.bf16.msra.mxu0 %v1648_v26 }
  0x84   :  { %1416 = vmatpush1.bf16.msra.mxu1 %v1650_v27  ;;  %1374 = vmatprep.subr.bf16.mxu0 %v1653_v28 }
  0x85   :  { %1417 = vmatprep.subr.bf16.mxu1 %v1655_v31 }
  0x87   :  { %1375 = vmatpush1.bf16.msra.mxu0 %v1652_v38 }
  0x88   :  { %1418 = vmatpush1.bf16.msra.mxu1 %v1654_v39  ;;  %1376 = vmatprep.subr.bf16.mxu0 %v1657_v40 }
  0x89   :  { %1419 = vmatprep.subr.bf16.mxu1 %v1659_v44 }
  0x8b   :  { %1377 = vmatpush1.bf16.msra.mxu0 %v1656_v50 }
  0x8c   :  { %1420 = vmatpush1.bf16.msra.mxu1 %v1658_v52  ;;  %1378 = vmatprep.subr.bf16.mxu0 %v1661_v53 }
  0x8d   :  { %1421 = vmatprep.subr.bf16.mxu1 %v1663_v55 }
  0x8f   :  { %1379 = vmatpush1.bf16.msra.mxu0 %v1660_v58 }
  0x90   :  { %1422 = vmatpush1.bf16.msra.mxu1 %v1662_v59  ;;  %1380 = vmatprep.subr.bf16.mxu0 %v1665_v60 }
  0x91   :  { %1423 = vmatprep.subr.bf16.mxu1 %v1667_v61 }
  0x93   :  { %1381 = vmatpush1.bf16.msra.mxu0 %v1664_v62 }
  0x94   :  { %1424 = vmatpush1.bf16.msra.mxu1 %v1666_v63 }
  0x96   :  { %1397 = vmatmul.mubr.bf16.vlgmr.msra.gmra.mrb[0].mxu0 %v1715_v0 }
  0x97   :  { %1440 = vmatmul.mubr.bf16.vlgmr.msra.gmra.mrb[0].mxu1 %v1715_v0 }
  0xa8   :  { %v1463_v3 = vpop.permute.xlu0 %1462 }
  0xad   :  { %v1468_v1 = vpop.permute.xlu0 %1467 }
 0x169   :  { %v1398_v2 = vpop.f32.mrb[0].mxu0 }
 0x16a   :  { %v1470_v4 = vadd.f32 %v1463_v3, %v1398_v2  ;;  %v1441_v5 = vpop.f32.mrb[0].mxu1  ;;  %v1400_v6 = vpop.f32.mrb[1].mxu0 }
 0x16b   :  { %v1472_v7 = vadd.f32 %v1463_v3, %v1441_v5  ;;  %v1471_v8 = vadd.f32 %v1463_v3, %v1400_v6  ;;  %v1443_v9 = vpop.f32.mrb[1].mxu1  ;;  %v1402_v10 = vpop.f32.mrb[2].mxu0 }
 0x16c   :  { %v1473_v11 = vadd.f32 %v1463_v3, %v1443_v9  ;;  %v1474_v12 = vadd.f32 %v1468_v1, %v1402_v10  ;;  %v1445_v13 = vpop.f32.mrb[2].mxu1  ;;  %v1404_v14 = vpop.f32.mrb[3].mxu0 }
 0x16d   :  { %v1674_v15 = vpack.c.bf16 %v1471_v8, %v1470_v4  ;;  %v1476_v16 = vadd.f32 %v1468_v1, %v1445_v13  ;;  %v1475_v17 = vadd.f32 %v1468_v1, %v1404_v14  ;;  %v1447_v18 = vpop.f32.mrb[3].mxu1 }
 0x16e   :  { %v1675_v19 = vpack.c.bf16 %v1473_v11, %v1472_v7  ;;  %v1477_v20 = vadd.f32 %v1468_v1, %v1447_v18 }
 0x16f   :  { %1502 = vst [vmem:[%s2403_s9] sm:$0xff] %v1674_v15  ;;  %v1676_v21 = vpack.c.bf16 %v1475_v17, %v1474_v12 }
 0x170   :  { %1503 = vst [vmem:[%s2403_s9 + $0x8] sm:$0xff] %v1675_v19  ;;  %v1677_v22 = vpack.c.bf16 %v1477_v20, %v1476_v16 }
 0x171   :  { %1504 = vst [vmem:[%s2403_s9 + $0x10] sm:$0xff] %v1676_v21 }
 0x172   :  { %1505 = vst [vmem:[%s2403_s9 + $0x18] sm:$0xff] %v1677_v22 }

</bundles_post_ra>
